<compile_context>
chip_gen: v7x
topology: tpu7x:2x2x1
jax: 0.10.0
libtpu: 0.0.40
codegen_flags: <defaults>
</compile_context>

<pallas_src>
import functools

import jax
import jax.numpy as jnp
from jax.experimental import pallas as pl
from jax.experimental.pallas import tpu as pltpu


def _round_up(x, m):
    return (x + m - 1) // m * m


def _num_tensorcores():
    """Best-effort TensorCore count of device 0 (v7x = 2/chip, v5e/v6e = 1)."""
    try:
        dev = jax.devices()[0]
        nc = getattr(dev, "num_cores", None)
        if isinstance(nc, int) and nc >= 1:
            return nc
        if "7" in str(getattr(dev, "device_kind", "")):
            return 2
    except Exception:
        pass
    return 1


def _pick_tn(out_padded, in_features, elt_bytes, num_cores,
             stream_budget_bytes=16 * 1024 * 1024):
    """Lane-aligned output-tile width for the streamed (2, F, tn) weight slab.

    1-TC chips: prefer a single full-width tile (grid=1) when the slab fits the
    stream budget.  Multi-TC chips (v7x): keep >= num_cores tiles so the
    'parallel' grid axis can shard across TensorCores while the double-buffered
    stream (2 bufs x 2 weights x F x tn x elt) stays inside the budget — well
    under v7x's 64 MiB physical / 32 MiB scoped-default VMEM.
    """
    assert out_padded % 128 == 0
    if num_cores <= 1 and 2 * in_features * out_padded * elt_bytes <= stream_budget_bytes:
        return out_padded                       # grid == 1: one big DMA, no step overhead
    cap = stream_budget_bytes // (4 * in_features * elt_bytes)   # double-buffered stack
    if out_padded >= 128 * num_cores:
        cap = min(cap, out_padded // num_cores)                  # >= num_cores tiles
    cap = min(cap, out_padded)
    tn = max(128, cap // 128 * 128)
    while tn > 128 and out_padded % tn != 0:
        tn -= 128
    return tn                                   # out_padded % 128 == 0, so 128 always divides


def prepare_params(w1, b1, w2, b2, stream_dtype=jnp.bfloat16):
    """One-time parameter packing.  Call OUTSIDE the jitted hot path.

    Transposes the nn.Linear weights to (F, out) (so no per-call transpose copy
    feeds the kernel), zero-pads the output axis to a multiple of 128 (lane-dense
    stores, bounded tiles), stacks fc1/fc2 into one slab (one DMA stream instead
    of four inputs) and casts the streamed weights to `stream_dtype`
    (bf16 works on v5e/v6e/v7x; pass jnp.float32 for exact f32 numerics).
    """
    out_features, in_features = w1.shape
    assert w2.shape == (out_features, in_features)
    out_padded = _round_up(out_features, 128)
    pad = out_padded - out_features
    w_stacked = jnp.stack([w1.T, w2.T])                        # (2, F, out)
    b_stacked = jnp.stack([b1, b2]).reshape(2, 1, out_features)
    if pad:
        w_stacked = jnp.pad(w_stacked, ((0, 0), (0, 0), (0, pad)))
        b_stacked = jnp.pad(b_stacked, ((0, 0), (0, 0), (0, pad)))
    return w_stacked.astype(stream_dtype), b_stacked.astype(jnp.float32)


def _spatial_corr_kernel(xi_ref, xj_ref, w_ref, b_ref, rij_ref):
    """Grid = (out_tiles,).  Straight-line: 2x (matmul + bias + relu), then mul."""
    yi = jnp.maximum(
        jnp.dot(xi_ref[...], w_ref[0], preferred_element_type=jnp.float32)
        + b_ref[0], 0.0)                                       # relu(fc1(xi))
    yj = jnp.maximum(
        jnp.dot(xj_ref[...], w_ref[1], preferred_element_type=jnp.float32)
        + b_ref[1], 0.0)                                       # relu(fc2(xj))
    rij_ref[...] = (yi * yj).astype(rij_ref.dtype)


@functools.partial(jax.jit, static_argnames=("tn",))
def spatial_correlation(xi, xj, w_stacked, b_stacked, *, tn=None):
    """xi, xj: (B, C, H, W).  w_stacked, b_stacked: from prepare_params()."""
    B, C, H, W = xi.shape
    F = C * H * W
    out_features = F                    # module reshapes the fc output back to (B,C,H,W)
    _, F_w, out_padded = w_stacked.shape
    assert F_w == F, "prepare_params weights must have in_features == C*H*W"
    assert out_padded >= out_features and out_padded % 128 == 0

    stream_dtype = w_stacked.dtype
    xi_flat = xi.reshape(B, F).astype(stream_dtype)   # tiny (B*F) per-call cast
    xj_flat = xj.reshape(B, F).astype(stream_dtype)

    if tn is None:
        tn = _pick_tn(out_padded, F, stream_dtype.itemsize, _num_tensorcores())
    assert out_padded % tn == 0, "tn must divide the padded output width"
    grid = (out_padded // tn,)

    elt = stream_dtype.itemsize
    cost = pl.CostEstimate(
        flops=4 * B * F * out_padded,                     # two (B,F)@(F,out) matmuls
        transcendentals=0,
        bytes_accessed=(2 * F * out_padded * elt          # weight stream (dominant)
                        + 2 * B * F * elt                 # xi, xj
                        + 2 * out_padded * 4              # biases (f32)
                        + B * out_padded * 4),            # rij writeback (f32)
    )

    rij_flat = pl.pallas_call(
        _spatial_corr_kernel,
        out_shape=jax.ShapeDtypeStruct((B, out_padded), jnp.float32),
        grid_spec=pltpu.PrefetchScalarGridSpec(
            num_scalar_prefetch=0,
            grid=grid,
            in_specs=[
                pl.BlockSpec((B, F), lambda j: (0, 0)),         # xi (VMEM resident)
                pl.BlockSpec((B, F), lambda j: (0, 0)),         # xj (VMEM resident)
                pl.BlockSpec((2, F, tn), lambda j: (0, 0, j)),  # stacked weights (stream)
                pl.BlockSpec((2, 1, tn), lambda j: (0, 0, j)),  # stacked biases
            ],
            out_specs=pl.BlockSpec((B, tn), lambda j: (0, j)),  # rij
        ),
        compiler_params=pltpu.CompilerParams(
            dimension_semantics=("parallel",),
            # v5e's scoped-VMEM default is 16 MiB; the budgeted weight stream
            # (<=16 MiB) plus the tiny resident activations fit in 32 MiB on
            # every generation (v7x physical VMEM is 64 MiB per TC).
            vmem_limit_bytes=32 * 1024 * 1024,
        ),
        cost_estimate=cost,
    )(xi_flat, xj_flat, w_stacked, b_stacked)

    rij = rij_flat[:, :out_features].reshape(B, C, H, W)
    # rji == rij (elementwise product is commutative): write it to HBM only once.
    return rij, rij


def _reference(xi, xj, w1, b1, w2, b2, operand_dtype=jnp.float32):
    B, C, H, W = xi.shape
    xi_f = xi.reshape(B, -1).astype(operand_dtype)
    xj_f = xj.reshape(B, -1).astype(operand_dtype)
    yi = jax.nn.relu(jnp.dot(xi_f, w1.T.astype(operand_dtype),
                             preferred_element_type=jnp.float32) + b1)
    yj = jax.nn.relu(jnp.dot(xj_f, w2.T.astype(operand_dtype),
                             preferred_element_type=jnp.float32) + b2)
    r = (yi * yj).reshape(B, C, H, W)
    return r, r


if __name__ == "__main__":
    key = jax.random.PRNGKey(0)
    B, C, H, W = 2, 4, 16, 16
    in_features = C * H * W            # 1024
    out_features = in_features         # reshape back to (B, C, H, W) requires this

    k_xi, k_xj, k_w1, k_b1, k_w2, k_b2 = jax.random.split(key, 6)
    xi = jax.random.normal(k_xi, (B, C, H, W), dtype=jnp.float32)
    xj = jax.random.normal(k_xj, (B, C, H, W), dtype=jnp.float32)

    # Deterministic nn.Linear-style init: U(-1/sqrt(in), 1/sqrt(in)).
    bound = 1.0 / (in_features ** 0.5)
    w1 = jax.random.uniform(k_w1, (out_features, in_features), jnp.float32, -bound, bound)
    b1 = jax.random.uniform(k_b1, (out_features,), jnp.float32, -bound, bound)
    w2 = jax.random.uniform(k_w2, (out_features, in_features), jnp.float32, -bound, bound)
    b2 = jax.random.uniform(k_b2, (out_features,), jnp.float32, -bound, bound)

    # One-time packing (outside the jitted hot path): transpose + pad + stack + bf16.
    w_stacked, b_stacked = prepare_params(w1, b1, w2, b2, stream_dtype=jnp.bfloat16)

    rij, rji = spatial_correlation(xi, xj, w_stacked, b_stacked)
    jax.block_until_ready((rij, rji))

    assert rij.shape == (B, C, H, W) and rji.shape == (B, C, H, W)

    # Precision-matched reference (bf16 operands, f32 accumulation): tight check.
    r_bf16, _ = _reference(xi, xj, w1, b1, w2, b2, operand_dtype=jnp.bfloat16)
    assert jnp.allclose(rij, r_bf16, atol=1e-3, rtol=1e-3)
    assert jnp.allclose(rji, r_bf16, atol=1e-3, rtol=1e-3)

    # Full-f32 reference: loose sanity check on the bf16 weight stream.
    r_f32, _ = _reference(xi, xj, w1, b1, w2, b2, operand_dtype=jnp.float32)
    assert jnp.allclose(rij, r_f32, atol=5e-2, rtol=5e-2)

    print("KERNEL_OK")
</pallas_src>

<mosaic_0001>
module attributes {stable_mosaic.version = 11 : i64} {
  func.func @_spatial_corr_kernel(%arg0: i32, %arg1: memref<2x1024xbf16, #tpu.memory_space<vmem>>, %arg2: memref<2x1024xbf16, #tpu.memory_space<vmem>>, %arg3: memref<2x1024x1024xbf16, #tpu.memory_space<vmem>>, %arg4: memref<2x1x1024xf32, #tpu.memory_space<vmem>>, %arg5: memref<2x1024xf32, #tpu.memory_space<vmem>>) attributes {dimension_semantics = [#tpu.dimension_semantics<parallel>], iteration_bounds = array<i64: 1>, scalar_prefetch = 0 : i64, scratch_operands = 0 : i64, tpu.core_type = #tpu.core_type<tc>, window_params = [{pipeline_mode = #tpu.pipeline_mode<synchronous>, transform_indices = @transform_0, window_bounds = array<i64: 2, 1024>}, {pipeline_mode = #tpu.pipeline_mode<synchronous>, transform_indices = @transform_1, window_bounds = array<i64: 2, 1024>}, {transform_indices = @transform_2, window_bounds = array<i64: 2, 1024, 1024>}, {transform_indices = @transform_3, window_bounds = array<i64: 2, 1, 1024>}, {transform_indices = @transform_4, window_bounds = array<i64: 2, 1024>}]} {
    %c0 = arith.constant 0 : index
    %c0_0 = arith.constant 0 : index
    %0 = vector.load %arg1[%c0, %c0_0] : memref<2x1024xbf16, #tpu.memory_space<vmem>>, vector<2x1024xbf16>
    %c0_1 = arith.constant 0 : index
    %c0_2 = arith.constant 0 : index
    %c0_3 = arith.constant 0 : index
    %1 = vector.load %arg3[%c0_1, %c0_2, %c0_3] : memref<2x1024x1024xbf16, #tpu.memory_space<vmem>>, vector<1x1024x1024xbf16>
    %2 = vector.shape_cast %1 : vector<1x1024x1024xbf16> to vector<1024x1024xbf16>
    %cst = arith.constant dense<0.000000e+00> : vector<2x1024xf32>
    %3 = tpu.matmul %0, %2, %cst {dimension_numbers = #tpu.dot_dimension_numbers<[1], [0], [0], [1], [0, 0, 1, 1], [], []>} : vector<2x1024xbf16>, vector<1024x1024xbf16>, vector<2x1024xf32> -> vector<2x1024xf32>
    %c0_4 = arith.constant 0 : index
    %c0_5 = arith.constant 0 : index
    %c0_6 = arith.constant 0 : index
    %4 = vector.load %arg4[%c0_4, %c0_5, %c0_6] : memref<2x1x1024xf32, #tpu.memory_space<vmem>>, vector<1x1x1024xf32>
    %5 = vector.shape_cast %4 : vector<1x1x1024xf32> to vector<1x1024xf32>
    %6 = vector.broadcast %5 : vector<1x1024xf32> to vector<2x1024xf32>
    %7 = arith.addf %3, %6 : vector<2x1024xf32>
    %cst_7 = arith.constant 0.000000e+00 : f32
    %8 = vector.broadcast %cst_7 : f32 to vector<2x1024xf32>
    %9 = arith.maximumf %7, %8 : vector<2x1024xf32>
    %c0_8 = arith.constant 0 : index
    %c0_9 = arith.constant 0 : index
    %10 = vector.load %arg2[%c0_8, %c0_9] : memref<2x1024xbf16, #tpu.memory_space<vmem>>, vector<2x1024xbf16>
    %c1 = arith.constant 1 : index
    %c0_10 = arith.constant 0 : index
    %c0_11 = arith.constant 0 : index
    %11 = vector.load %arg3[%c1, %c0_10, %c0_11] : memref<2x1024x1024xbf16, #tpu.memory_space<vmem>>, vector<1x1024x1024xbf16>
    %12 = vector.shape_cast %11 : vector<1x1024x1024xbf16> to vector<1024x1024xbf16>
    %cst_12 = arith.constant dense<0.000000e+00> : vector<2x1024xf32>
    %13 = tpu.matmul %10, %12, %cst_12 {dimension_numbers = #tpu.dot_dimension_numbers<[1], [0], [0], [1], [0, 0, 1, 1], [], []>} : vector<2x1024xbf16>, vector<1024x1024xbf16>, vector<2x1024xf32> -> vector<2x1024xf32>
    %c1_13 = arith.constant 1 : index
    %c0_14 = arith.constant 0 : index
    %c0_15 = arith.constant 0 : index
    %14 = vector.load %arg4[%c1_13, %c0_14, %c0_15] : memref<2x1x1024xf32, #tpu.memory_space<vmem>>, vector<1x1x1024xf32>
    %15 = vector.shape_cast %14 : vector<1x1x1024xf32> to vector<1x1024xf32>
    %16 = vector.broadcast %15 : vector<1x1024xf32> to vector<2x1024xf32>
    %17 = arith.addf %13, %16 : vector<2x1024xf32>
    %cst_16 = arith.constant 0.000000e+00 : f32
    %18 = vector.broadcast %cst_16 : f32 to vector<2x1024xf32>
    %19 = arith.maximumf %17, %18 : vector<2x1024xf32>
    %20 = arith.mulf %9, %19 : vector<2x1024xf32>
    %c0_17 = arith.constant 0 : index
    %c0_18 = arith.constant 0 : index
    %21 = vector.load %arg5[%c0_17, %c0_18] : memref<2x1024xf32, #tpu.memory_space<vmem>>, vector<2x1024xf32>
    tpu.vector_store %arg5[%c0_17, %c0_18], %20 {strides = array<i32>} : memref<2x1024xf32, #tpu.memory_space<vmem>>, vector<2x1024xf32>,
    return
  }
  func.func @transform_0(%arg0: i32) -> (i32, i32) {
    %c0_i32 = arith.constant 0 : i32
    %c0_i32_0 = arith.constant 0 : i32
    %c0_i32_1 = arith.constant 0 : i32
    return %c0_i32, %c0_i32_0 : i32, i32
  }
  func.func @transform_1(%arg0: i32) -> (i32, i32) {
    %c0_i32 = arith.constant 0 : i32
    %c0_i32_0 = arith.constant 0 : i32
    %c0_i32_1 = arith.constant 0 : i32
    return %c0_i32, %c0_i32_0 : i32, i32
  }
  func.func @transform_2(%arg0: i32) -> (i32, i32, i32) {
    %c0_i32 = arith.constant 0 : i32
    %c0_i32_0 = arith.constant 0 : i32
    %c0_i32_1 = arith.constant 0 : i32
    return %c0_i32, %c0_i32_0, %arg0 : i32, i32, i32
  }
  func.func @transform_3(%arg0: i32) -> (i32, i32, i32) {
    %c0_i32 = arith.constant 0 : i32
    %c0_i32_0 = arith.constant 0 : i32
    %c0_i32_1 = arith.constant 0 : i32
    return %c0_i32, %c0_i32_0, %arg0 : i32, i32, i32
  }
  func.func @transform_4(%arg0: i32) -> (i32, i32) {
    %c0_i32 = arith.constant 0 : i32
    %c0_i32_0 = arith.constant 0 : i32
    return %c0_i32, %arg0 : i32, i32
  }
}

</mosaic_0001>

<bundles_post_ra>
// kernel: spatial_correlation.1
= control target key start
LH: loop header
LB: loop body
LE: loop exit
PB: predicated region body
PF: predicated region fallthrough
CT: control target
= control target key end

     0   :  { %9 = vsyncpa [#allocation3], 0  ;;  %s9270_s0 = inlined_call_operand.vmem [shape: bf16[2,1024], index: 0, kind: input, shape index: {}]   ;;  %s9271_s1 = inlined_call_operand.vmem [shape: bf16[2,1024], index: 1, kind: input, shape index: {}]   ;;  %s9272_s2 = inlined_call_operand.hbm [shape: bf16[2,1024,1024], index: 2, kind: input, shape index: {}]   ;;  %s9273_s3 = inlined_call_operand.hbm [shape: f32[2,1,1024], index: 3, kind: input, shape index: {}]   ;;  %s9274_s4 = inlined_call_operand.vmem [shape: f32[2,1024], index: 4, kind: output, shape index: {}]  }
   0x1   :  { %10 = vsyncpa [#allocation5], 0  ;;  %s8975_s15 = smov [#allocation2]   ;;  %s8927_s19 = scalar_lea.hbm %s9272_s2, 131072 }
   0x2   :  { %s20_s16 = sshll.u32 %s8975_s15, 4  ;;  %p8928_p0 = scmp.ne.s32.totalorder %s9272_s2, %s8927_s19  ;;  %s21_s16 = int_to_ptr.vmem [resolvable:$true] %s20_s16 }
   0x3   :  { %p8931_p1 = scmp.lt.u32.totalorder %s8927_s19, %s9272_s2 }
   0x5   :  { %p8933_p2 = pnand %p8931_p1, %p8928_p0 }
   0x7   :  { %8936 = shalt.err (!%p8933_p2)
}
   0x8   :  { %s8937_s24 = scalar_lea.vmem %s21_s16, 131072  ;;  %p8942_p4 = scmp.lt.s32.totalorder %s21_s16, %s21_s16 }
   0x9   :  { %p8938_p3 = scmp.ne.s32.totalorder %s21_s16, %s8937_s24  ;;  %p8943_p5 = scmp.lt.s32.totalorder %s8937_s24, %s8937_s24 }
   0xb   :  { %p8944_p6 = por %p8943_p5, %p8942_p4 }
   0xd   :  { %p8945_p7 = pnand %p8944_p6, %p8938_p3 }
   0xf   :  { %8948 = shalt.err (!%p8945_p7)
}
  0x10   :  { %s8976_s25 = smov 512   ;;  %s8977_s26 = smov 32  }
  0x11   :  { %26 = dma.hbm_to_vmem [thread:$0]  %s9272_s2, 131072, %s21_s16, [#allocation3], %s8976_s25, %s8976_s25, %s8977_s26  }
  0x12   :  { %s8978_s29 = smov [#allocation4]   ;;  %s8949_s7 = scalar_lea.hbm %s9273_s3, 256 }
  0x13   :  { %s32_s30 = sshll.u32 %s8978_s29, 4  ;;  %p8950_p8 = scmp.ne.s32.totalorder %s9273_s3, %s8949_s7  ;;  %s33_s30 = int_to_ptr.vmem [resolvable:$true] %s32_s30 }
  0x14   :  { %p8953_p9 = scmp.lt.u32.totalorder %s8949_s7, %s9273_s3 }
  0x16   :  { %p8955_p10 = pnand %p8953_p9, %p8950_p8 }
  0x18   :  { %8958 = shalt.err (!%p8955_p10)
}
  0x19   :  { %s8959_s12 = scalar_lea.vmem %s33_s30, 256  ;;  %p8964_p12 = scmp.lt.s32.totalorder %s33_s30, %s33_s30 }
  0x1a   :  { %p8960_p11 = scmp.ne.s32.totalorder %s33_s30, %s8959_s12  ;;  %p8965_p13 = scmp.lt.s32.totalorder %s8959_s12, %s8959_s12 }
  0x1c   :  { %p8966_p0 = por %p8965_p13, %p8964_p12 }
  0x1e   :  { %p8967_p1 = pnand %p8966_p0, %p8960_p11 }
  0x20   :  { %8970 = shalt.err (!%p8967_p1)
}
  0x21   :  { %s8979_s2 = smov 128   ;;  %s8980_s13 = smov 8  }
  0x22   :  { %38 = dma.hbm_to_vmem [thread:$0]  %s9273_s3, 256, %s33_s30, [#allocation5], %s8979_s2, %s8979_s2, %s8980_s13  }
  0x23   :  { %8971 = dma.done.wait [#allocation3], 131072  }
  0x24   :  { %8972 = vsyncadd [#allocation3], 4294836224 }
  0x25   :  { %8973 = dma.done.wait [#allocation5], 256  }
  0x26   :  { %8974 = vsyncadd [#allocation5], 4294967040  ;;  %v46_v0 = vld [vmem:[#allocation2] sm:$0xff]  ;;  %v47_v2 = vld [vmem:[#allocation2 + $0x8] sm:$0xff]  ;;  %v560_v32 = vlaneseq  ;;  %v8981_v33 = vmov 1966171168  }
  0x27   :  { %v50_v1 = vld [vmem:[#allocation2 + $0x20] sm:$0xff]  ;;  %v51_v4 = vld [vmem:[#allocation2 + $0x28] sm:$0xff]  ;;  %v603_v34 = vunpack.c.l.s4 %v8981_v33 }
  0x28   :  { %v7782_v3 = vcombine.high %v46_v0, %v50_v1  ;;  %v7781_v5 = vcombine.low %v46_v0, %v50_v1  ;;  %v54_v6 = vld [vmem:[#allocation2 + $0x40] sm:$0xff]  ;;  %v7784_v8 = vcombine.high %v47_v2, %v51_v4  ;;  %v7783_v9 = vcombine.low %v47_v2, %v51_v4  ;;  %v55_v11 = vld [vmem:[#allocation2 + $0x48] sm:$0xff] }
  0x29   :  { %v58_v7 = vld [vmem:[#allocation2 + $0x60] sm:$0xff]  ;;  %v59_v12 = vld [vmem:[#allocation2 + $0x68] sm:$0xff]  ;;  %v9032_v43 = vshrl.u32 %v560_v32, 7  ;;  %v604_v44 = vunpack.c.0.s8 %v603_v34 }
  0x2a   :  { %v7790_v10 = vcombine.high %v54_v6, %v58_v7  ;;  %v62_v13 = vld [vmem:[#allocation2 + $0x80] sm:$0xff]  ;;  %3218 = vmatprep.subr.bf16.mxu0 %v7782_v3  ;;  %v7792_v14 = vcombine.high %v55_v11, %v59_v12  ;;  %v63_v16 = vld [vmem:[#allocation2 + $0x88] sm:$0xff]  ;;  %3382 = vmatprep.subr.bf16.mxu1 %v7784_v8  ;;  %v7789_v18 = vcombine.low %v54_v6, %v58_v7 }
  0x2b   :  { %v66_v15 = vld [vmem:[#allocation2 + $0xa0] sm:$0xff]  ;;  %v67_v17 = vld [vmem:[#allocation2 + $0xa8] sm:$0xff]  ;;  %3219 = vmatpush1.bf16.msra.mxu0 %v7781_v5  ;;  %3383 = vmatpush1.bf16.msra.mxu1 %v7783_v9  ;;  %v7791_v19 = vcombine.low %v55_v11, %v59_v12  ;;  %v9035_v53 = vsub.s32 %v604_v44, %v9032_v43 }
  0x2c   :  { %3220 = vmatprep.subr.bf16.mxu0 %v7790_v10  ;;  %v7798_v20 = vcombine.high %v62_v13, %v66_v15  ;;  %3384 = vmatprep.subr.bf16.mxu1 %v7792_v14  ;;  %v7800_v21 = vcombine.high %v63_v16, %v67_v17  ;;  %v70_v22 = vld [vmem:[#allocation2 + $0xc0] sm:$0xff]  ;;  %v71_v24 = vld [vmem:[#allocation2 + $0xc8] sm:$0xff]  ;;  %v7797_v26 = vcombine.low %v62_v13, %v66_v15 }
  0x2d   :  { %v74_v23 = vld [vmem:[#allocation2 + $0xe0] sm:$0xff]  ;;  %v75_v25 = vld [vmem:[#allocation2 + $0xe8] sm:$0xff]  ;;  %v7799_v27 = vcombine.low %v63_v16, %v67_v17 }
  0x2e   :  { %v7806_v28 = vcombine.high %v70_v22, %v74_v23  ;;  %v7808_v29 = vcombine.high %v71_v24, %v75_v25  ;;  %v78_v30 = vld [vmem:[#allocation2 + $0x100] sm:$0xff]  ;;  %v79_v35 = vld [vmem:[#allocation2 + $0x108] sm:$0xff]  ;;  %v7805_v37 = vcombine.low %v70_v22, %v74_v23  ;;  %v7807_v38 = vcombine.low %v71_v24, %v75_v25 }
  0x2f   :  { %3221 = vmatpush1.bf16.msra.mxu0 %v7789_v18  ;;  %3385 = vmatpush1.bf16.msra.mxu1 %v7791_v19  ;;  %v82_v31 = vld [vmem:[#allocation2 + $0x120] sm:$0xff]  ;;  %v83_v36 = vld [vmem:[#allocation2 + $0x128] sm:$0xff] }
  0x30   :  { %3222 = vmatprep.subr.bf16.mxu0 %v7798_v20  ;;  %3386 = vmatprep.subr.bf16.mxu1 %v7800_v21  ;;  %v7814_v39 = vcombine.high %v78_v30, %v82_v31  ;;  %v7816_v40 = vcombine.high %v79_v35, %v83_v36  ;;  %v86_v41 = vld [vmem:[#allocation2 + $0x140] sm:$0xff]  ;;  %v87_v45 = vld [vmem:[#allocation2 + $0x148] sm:$0xff]  ;;  %v7813_v47 = vcombine.low %v78_v30, %v82_v31 }
  0x31   :  { %v90_v42 = vld [vmem:[#allocation2 + $0x160] sm:$0xff]  ;;  %v91_v46 = vld [vmem:[#allocation2 + $0x168] sm:$0xff]  ;;  %v7815_v48 = vcombine.low %v79_v35, %v83_v36 }
  0x32   :  { %v7822_v49 = vcombine.high %v86_v41, %v90_v42  ;;  %v7824_v50 = vcombine.high %v87_v45, %v91_v46  ;;  %v94_v51 = vld [vmem:[#allocation2 + $0x180] sm:$0xff]  ;;  %v95_v54 = vld [vmem:[#allocation2 + $0x188] sm:$0xff]  ;;  %v7821_v56 = vcombine.low %v86_v41, %v90_v42  ;;  %v7823_v57 = vcombine.low %v87_v45, %v91_v46 }
  0x33   :  { %3223 = vmatpush1.bf16.msra.mxu0 %v7797_v26  ;;  %3387 = vmatpush1.bf16.msra.mxu1 %v7799_v27  ;;  %v98_v52 = vld [vmem:[#allocation2 + $0x1a0] sm:$0xff]  ;;  %v99_v55 = vld [vmem:[#allocation2 + $0x1a8] sm:$0xff] }
  0x34   :  { %3224 = vmatprep.subr.bf16.mxu0 %v7806_v28  ;;  %3388 = vmatprep.subr.bf16.mxu1 %v7808_v29  ;;  %v7830_v58 = vcombine.high %v94_v51, %v98_v52  ;;  %v9040_v59 = vld [vmem:[%s9270_s0] sm:$0xff]  ;;  %v7832_v60 = vcombine.high %v95_v54, %v99_v55  ;;  %v103_v0 = vld [vmem:[#allocation2 + $0x1c8] sm:$0xff]  ;;  %v7829_v2 = vcombine.low %v94_v51, %v98_v52 }
  0x35   :  { %v102_v61 = vld [vmem:[#allocation2 + $0x1c0] sm:$0xff]  ;;  %v9044_v63 = vrot.slane %v9040_v59, %v9035_v53  ;;  %v107_v1 = vld [vmem:[#allocation2 + $0x1e8] sm:$0xff]  ;;  %v7831_v4 = vcombine.low %v95_v54, %v99_v55 }
  0x36   :  { %v106_v62 = vld [vmem:[#allocation2 + $0x1e0] sm:$0xff]  ;;  %v7840_v6 = vcombine.high %v103_v0, %v107_v1  ;;  %v111_v10 = vld [vmem:[#allocation2 + $0x208] sm:$0xff]  ;;  %v7839_v13 = vcombine.low %v103_v0, %v107_v1 }
  0x37   :  { %3225 = vmatpush1.bf16.msra.mxu0 %v7805_v37  ;;  %3389 = vmatpush1.bf16.msra.mxu1 %v7807_v38  ;;  %v616_v3 = vcombine.high %v9044_v63, %v9044_v63  ;;  %v7838_v5 = vcombine.high %v102_v61, %v106_v62  ;;  %v110_v7 = vld [vmem:[#allocation2 + $0x200] sm:$0xff]  ;;  %v115_v11 = vld [vmem:[#allocation2 + $0x228] sm:$0xff]  ;;  %v7837_v12 = vcombine.low %v102_v61, %v106_v62 }
  0x38   :  { %3226 = vmatprep.subr.bf16.mxu0 %v7814_v39  ;;  %3390 = vmatprep.subr.bf16.mxu1 %v7816_v40  ;;  %v114_v8 = vld [vmem:[#allocation2 + $0x220] sm:$0xff]  ;;  %v7848_v15 = vcombine.high %v111_v10, %v115_v11  ;;  %v119_v18 = vld [vmem:[#allocation2 + $0x248] sm:$0xff]  ;;  %v7847_v21 = vcombine.low %v111_v10, %v115_v11 }
  0x39   :  { %v9049_v9 = vrot.slane %v616_v3, %v9035_v53  ;;  %v7846_v14 = vcombine.high %v110_v7, %v114_v8  ;;  %v118_v16 = vld [vmem:[#allocation2 + $0x240] sm:$0xff]  ;;  %v123_v19 = vld [vmem:[#allocation2 + $0x268] sm:$0xff]  ;;  %v7845_v20 = vcombine.low %v110_v7, %v114_v8 }
  0x3a   :  { %v122_v17 = vld [vmem:[#allocation2 + $0x260] sm:$0xff]  ;;  %v7856_v23 = vcombine.high %v119_v18, %v123_v19  ;;  %v127_v26 = vld [vmem:[#allocation2 + $0x288] sm:$0xff]  ;;  %v7855_v29 = vcombine.low %v119_v18, %v123_v19 }
  0x3b   :  { %3227 = vmatpush1.bf16.msra.mxu0 %v7813_v47  ;;  %3391 = vmatpush1.bf16.msra.mxu1 %v7815_v48  ;;  %v7854_v22 = vcombine.high %v118_v16, %v122_v17  ;;  %v126_v24 = vld [vmem:[#allocation2 + $0x280] sm:$0xff]  ;;  %v131_v27 = vld [vmem:[#allocation2 + $0x2a8] sm:$0xff]  ;;  %v7853_v28 = vcombine.low %v118_v16, %v122_v17 }
  0x3c   :  { %3228 = vmatprep.subr.bf16.mxu0 %v7822_v49  ;;  %3392 = vmatprep.subr.bf16.mxu1 %v7824_v50  ;;  %v130_v25 = vld [vmem:[#allocation2 + $0x2a0] sm:$0xff]  ;;  %v7864_v31 = vcombine.high %v127_v26, %v131_v27  ;;  %v135_v34 = vld [vmem:[#allocation2 + $0x2c8] sm:$0xff]  ;;  %v7863_v37 = vcombine.low %v127_v26, %v131_v27 }
  0x3d   :  { %3250 = vmatprep.mubr.bf16.mxu0 %v9049_v9  ;;  %3414 = vmatprep.mubr.bf16.mxu1 %v9049_v9  ;;  %v7862_v30 = vcombine.high %v126_v24, %v130_v25  ;;  %v134_v32 = vld [vmem:[#allocation2 + $0x2c0] sm:$0xff]  ;;  %v139_v35 = vld [vmem:[#allocation2 + $0x2e8] sm:$0xff]  ;;  %v7861_v36 = vcombine.low %v126_v24, %v130_v25 }
  0x3e   :  { %v138_v33 = vld [vmem:[#allocation2 + $0x2e0] sm:$0xff]  ;;  %v7872_v39 = vcombine.high %v135_v34, %v139_v35  ;;  %v143_v42 = vld [vmem:[#allocation2 + $0x308] sm:$0xff]  ;;  %v7871_v46 = vcombine.low %v135_v34, %v139_v35 }
  0x3f   :  { %3229 = vmatpush1.bf16.msra.mxu0 %v7821_v56  ;;  %3393 = vmatpush1.bf16.msra.mxu1 %v7823_v57  ;;  %v7870_v38 = vcombine.high %v134_v32, %v138_v33  ;;  %v142_v40 = vld [vmem:[#allocation2 + $0x300] sm:$0xff]  ;;  %v147_v44 = vld [vmem:[#allocation2 + $0x328] sm:$0xff]  ;;  %v7869_v45 = vcombine.low %v134_v32, %v138_v33  ;;  %v9059_v32 = vcombine.high %v9049_v9, %v9049_v9 }
  0x40   :  { %3230 = vmatprep.subr.bf16.mxu0 %v7830_v58  ;;  %3394 = vmatprep.subr.bf16.mxu1 %v7832_v60  ;;  %v146_v41 = vld [vmem:[#allocation2 + $0x320] sm:$0xff]  ;;  %v7880_v48 = vcombine.high %v143_v42, %v147_v44  ;;  %v151_v51 = vld [vmem:[#allocation2 + $0x348] sm:$0xff]  ;;  %v7879_v55 = vcombine.low %v143_v42, %v147_v44 }
  0x41   :  { %v7878_v47 = vcombine.high %v142_v40, %v146_v41  ;;  %v150_v49 = vld [vmem:[#allocation2 + $0x340] sm:$0xff]  ;;  %v155_v52 = vld [vmem:[#allocation2 + $0x368] sm:$0xff]  ;;  %v7877_v54 = vcombine.low %v142_v40, %v146_v41 }
  0x42   :  { %v154_v50 = vld [vmem:[#allocation2 + $0x360] sm:$0xff]  ;;  %v7888_v57 = vcombine.high %v151_v51, %v155_v52  ;;  %v159_v61 = vld [vmem:[#allocation2 + $0x388] sm:$0xff]  ;;  %v7887_v1 = vcombine.low %v151_v51, %v155_v52 }
  0x43   :  { %3231 = vmatpush1.bf16.msra.mxu0 %v7829_v2  ;;  %3395 = vmatpush1.bf16.msra.mxu1 %v7831_v4  ;;  %v7886_v56 = vcombine.high %v150_v49, %v154_v50  ;;  %v158_v58 = vld [vmem:[#allocation2 + $0x380] sm:$0xff]  ;;  %v163_v62 = vld [vmem:[#allocation2 + $0x3a8] sm:$0xff]  ;;  %v7885_v0 = vcombine.low %v150_v49, %v154_v50 }
  0x44   :  { %3232 = vmatprep.subr.bf16.mxu0 %v7838_v5  ;;  %3396 = vmatprep.subr.bf16.mxu1 %v7840_v6  ;;  %v162_v60 = vld [vmem:[#allocation2 + $0x3a0] sm:$0xff]  ;;  %v7896_v3 = vcombine.high %v159_v61, %v163_v62  ;;  %v167_v6 = vld [vmem:[#allocation2 + $0x3c8] sm:$0xff]  ;;  %v7895_v10 = vcombine.low %v159_v61, %v163_v62 }
  0x45   :  { %v7894_v2 = vcombine.high %v158_v58, %v162_v60  ;;  %v166_v4 = vld [vmem:[#allocation2 + $0x3c0] sm:$0xff]  ;;  %v171_v7 = vld [vmem:[#allocation2 + $0x3e8] sm:$0xff]  ;;  %v7893_v8 = vcombine.low %v158_v58, %v162_v60 }
  0x46   :  { %v170_v5 = vld [vmem:[#allocation2 + $0x3e0] sm:$0xff]  ;;  %v179_v16 = vld [vmem:[#allocation2 + $0x428] sm:$0xff]  ;;  %v7903_v18 = vcombine.low %v167_v6, %v171_v7 }
  0x47   :  { %3233 = vmatpush1.bf16.msra.mxu0 %v7837_v12  ;;  %3397 = vmatpush1.bf16.msra.mxu1 %v7839_v13  ;;  %v7902_v11 = vcombine.high %v166_v4, %v170_v5  ;;  %v7904_v12 = vcombine.high %v167_v6, %v171_v7  ;;  %v174_v13 = vld [vmem:[#allocation2 + $0x400] sm:$0xff]  ;;  %v7901_v17 = vcombine.low %v166_v4, %v170_v5  ;;  %v183_v24 = vld [vmem:[#allocation2 + $0x448] sm:$0xff] }
  0x48   :  { %3234 = vmatprep.subr.bf16.mxu0 %v7846_v14  ;;  %3398 = vmatprep.subr.bf16.mxu1 %v7848_v15  ;;  %v178_v14 = vld [vmem:[#allocation2 + $0x420] sm:$0xff]  ;;  %v175_v15 = vld [vmem:[#allocation2 + $0x408] sm:$0xff] }
  0x49   :  { %v7910_v19 = vcombine.high %v174_v13, %v178_v14  ;;  %v187_v25 = vld [vmem:[#allocation2 + $0x468] sm:$0xff]  ;;  %v7909_v26 = vcombine.low %v174_v13, %v178_v14  ;;  %v7911_v27 = vcombine.low %v175_v15, %v179_v16 }
  0x4a   :  { %v195_v33 = vld [vmem:[#allocation2 + $0x4a8] sm:$0xff]  ;;  %v7919_v35 = vcombine.low %v183_v24, %v187_v25 }
  0x4b   :  { %3235 = vmatpush1.bf16.msra.mxu0 %v7845_v20  ;;  %3399 = vmatpush1.bf16.msra.mxu1 %v7847_v21  ;;  %v7912_v20 = vcombine.high %v175_v15, %v179_v16  ;;  %v182_v21 = vld [vmem:[#allocation2 + $0x440] sm:$0xff]  ;;  %v199_v40 = vld [vmem:[#allocation2 + $0x4c8] sm:$0xff] }
  0x4c   :  { %3236 = vmatprep.subr.bf16.mxu0 %v7854_v22  ;;  %3400 = vmatprep.subr.bf16.mxu1 %v7856_v23  ;;  %v186_v22 = vld [vmem:[#allocation2 + $0x460] sm:$0xff]  ;;  %v9055_v23 = vrot.slane %v9044_v63, %v9035_v53  ;;  %v191_v63 = vld [vmem:[#allocation2 + $0x488] sm:$0xff] }
  0x4d   :  { %v7917_v34 = vcombine.low %v182_v21, %v186_v22  ;;  %v203_v41 = vld [vmem:[#allocation2 + $0x4e8] sm:$0xff]  ;;  %v7927_v44 = vcombine.low %v191_v63, %v195_v33 }
  0x4e   :  { %v207_v49 = vld [vmem:[#allocation2 + $0x508] sm:$0xff]  ;;  %v7935_v52 = vcombine.low %v199_v40, %v203_v41 }
  0x4f   :  { %3237 = vmatpush1.bf16.msra.mxu0 %v7853_v28  ;;  %3401 = vmatpush1.bf16.msra.mxu1 %v7855_v29  ;;  %v7918_v28 = vcombine.high %v182_v21, %v186_v22  ;;  %v7920_v29 = vcombine.high %v183_v24, %v187_v25  ;;  %v211_v50 = vld [vmem:[#allocation2 + $0x528] sm:$0xff] }
  0x50   :  { %3238 = vmatprep.subr.bf16.mxu0 %v7862_v30  ;;  %3402 = vmatprep.subr.bf16.mxu1 %v7864_v31  ;;  %v190_v30 = vld [vmem:[#allocation2 + $0x480] sm:$0xff]  ;;  %v215_v58 = vld [vmem:[#allocation2 + $0x548] sm:$0xff]  ;;  %v7943_v62 = vcombine.low %v207_v49, %v211_v50 }
  0x51   :  { %v194_v31 = vld [vmem:[#allocation2 + $0x4a0] sm:$0xff]  ;;  %v219_v60 = vld [vmem:[#allocation2 + $0x568] sm:$0xff] }
  0x52   :  { %v7925_v42 = vcombine.low %v190_v30, %v194_v31  ;;  %v223_v4 = vld [vmem:[#allocation2 + $0x588] sm:$0xff]  ;;  %v7951_v7 = vcombine.low %v215_v58, %v219_v60 }
  0x53   :  { %3239 = vmatpush1.bf16.msra.mxu0 %v7861_v36  ;;  %3403 = vmatpush1.bf16.msra.mxu1 %v7863_v37  ;;  %v7926_v36 = vcombine.high %v190_v30, %v194_v31  ;;  %v7928_v37 = vcombine.high %v191_v63, %v195_v33  ;;  %v227_v5 = vld [vmem:[#allocation2 + $0x5a8] sm:$0xff] }
  0x54   :  { %3240 = vmatprep.subr.bf16.mxu0 %v7870_v38  ;;  %3404 = vmatprep.subr.bf16.mxu1 %v7872_v39  ;;  %v198_v38 = vld [vmem:[#allocation2 + $0x4c0] sm:$0xff]  ;;  %v231_v13 = vld [vmem:[#allocation2 + $0x5c8] sm:$0xff]  ;;  %v7959_v16 = vcombine.low %v223_v4, %v227_v5 }
  0x55   :  { %v202_v39 = vld [vmem:[#allocation2 + $0x4e0] sm:$0xff]  ;;  %v235_v14 = vld [vmem:[#allocation2 + $0x5e8] sm:$0xff] }
  0x56   :  { %v7933_v51 = vcombine.low %v198_v38, %v202_v39  ;;  %v239_v21 = vld [vmem:[#allocation2 + $0x608] sm:$0xff]  ;;  %v7967_v25 = vcombine.low %v231_v13, %v235_v14 }
  0x57   :  { %3241 = vmatpush1.bf16.msra.mxu0 %v7869_v45  ;;  %3405 = vmatpush1.bf16.msra.mxu1 %v7871_v46  ;;  %v7934_v45 = vcombine.high %v198_v38, %v202_v39  ;;  %v7936_v46 = vcombine.high %v199_v40, %v203_v41  ;;  %v243_v22 = vld [vmem:[#allocation2 + $0x628] sm:$0xff] }
  0x58   :  { %3242 = vmatprep.subr.bf16.mxu0 %v7878_v47  ;;  %3406 = vmatprep.subr.bf16.mxu1 %v7880_v48  ;;  %v206_v47 = vld [vmem:[#allocation2 + $0x500] sm:$0xff]  ;;  %v247_v30 = vld [vmem:[#allocation2 + $0x648] sm:$0xff]  ;;  %v7975_v33 = vcombine.low %v239_v21, %v243_v22 }
  0x59   :  { %v210_v48 = vld [vmem:[#allocation2 + $0x520] sm:$0xff]  ;;  %v251_v31 = vld [vmem:[#allocation2 + $0x668] sm:$0xff] }
  0x5a   :  { %v7941_v61 = vcombine.low %v206_v47, %v210_v48  ;;  %v255_v38 = vld [vmem:[#allocation2 + $0x688] sm:$0xff]  ;;  %v7983_v41 = vcombine.low %v247_v30, %v251_v31 }
  0x5b   :  { %3243 = vmatpush1.bf16.msra.mxu0 %v7877_v54  ;;  %3407 = vmatpush1.bf16.msra.mxu1 %v7879_v55  ;;  %v7942_v54 = vcombine.high %v206_v47, %v210_v48  ;;  %v7944_v55 = vcombine.high %v207_v49, %v211_v50  ;;  %v259_v39 = vld [vmem:[#allocation2 + $0x6a8] sm:$0xff] }
  0x5c   :  { %3244 = vmatprep.subr.bf16.mxu0 %v7886_v56  ;;  %3408 = vmatprep.subr.bf16.mxu1 %v7888_v57  ;;  %v214_v56 = vld [vmem:[#allocation2 + $0x540] sm:$0xff]  ;;  %v263_v47 = vld [vmem:[#allocation2 + $0x6c8] sm:$0xff]  ;;  %v7991_v50 = vcombine.low %v255_v38, %v259_v39 }
  0x5d   :  { %v218_v57 = vld [vmem:[#allocation2 + $0x560] sm:$0xff]  ;;  %v267_v48 = vld [vmem:[#allocation2 + $0x6e8] sm:$0xff] }
  0x5e   :  { %v7949_v6 = vcombine.low %v214_v56, %v218_v57 }
  0x5f   :  { %3245 = vmatpush1.bf16.msra.mxu0 %v7885_v0  ;;  %3409 = vmatpush1.bf16.msra.mxu1 %v7887_v1  ;;  %v7950_v0 = vcombine.high %v214_v56, %v218_v57  ;;  %v7952_v1 = vcombine.high %v215_v58, %v219_v60  ;;  %v271_v56 = vld [vmem:[#allocation2 + $0x708] sm:$0xff]  ;;  %v7999_v60 = vcombine.low %v263_v47, %v267_v48 }
  0x60   :  { %3246 = vmatprep.subr.bf16.mxu0 %v7894_v2  ;;  %3410 = vmatprep.subr.bf16.mxu1 %v7896_v3  ;;  %v222_v2 = vld [vmem:[#allocation2 + $0x580] sm:$0xff]  ;;  %v275_v57 = vld [vmem:[#allocation2 + $0x728] sm:$0xff] }
  0x61   :  { %v226_v3 = vld [vmem:[#allocation2 + $0x5a0] sm:$0xff] }
  0x62   :  { %v7957_v15 = vcombine.low %v222_v2, %v226_v3 }
  0x63   :  { %3247 = vmatpush1.bf16.msra.mxu0 %v7893_v8  ;;  %3411 = vmatpush1.bf16.msra.mxu1 %v7895_v10  ;;  %v7958_v8 = vcombine.high %v222_v2, %v226_v3  ;;  %v7960_v10 = vcombine.high %v223_v4, %v227_v5  ;;  %v279_v2 = vld [vmem:[#allocation2 + $0x748] sm:$0xff]  ;;  %v8007_v5 = vcombine.low %v271_v56, %v275_v57 }
  0x64   :  { %3248 = vmatprep.subr.bf16.mxu0 %v7902_v11  ;;  %3412 = vmatprep.subr.bf16.mxu1 %v7904_v12  ;;  %v230_v11 = vld [vmem:[#allocation2 + $0x5c0] sm:$0xff]  ;;  %v283_v3 = vld [vmem:[#allocation2 + $0x768] sm:$0xff] }
  0x65   :  { %v234_v12 = vld [vmem:[#allocation2 + $0x5e0] sm:$0xff] }
  0x66   :  { %v7965_v24 = vcombine.low %v230_v11, %v234_v12 }
  0x67   :  { %3249 = vmatpush1.bf16.msra.mxu0 %v7901_v17  ;;  %3413 = vmatpush1.bf16.msra.mxu1 %v7903_v18  ;;  %v7966_v17 = vcombine.high %v230_v11, %v234_v12  ;;  %v7968_v18 = vcombine.high %v231_v13, %v235_v14  ;;  %v287_v11 = vld [vmem:[#allocation2 + $0x788] sm:$0xff]  ;;  %v8015_v14 = vcombine.low %v279_v2, %v283_v3 }
  0x68   :  { %3259 = vmatprep.subr.bf16.mxu0 %v7910_v19  ;;  %3423 = vmatprep.subr.bf16.mxu1 %v7912_v20  ;;  %v238_v19 = vld [vmem:[#allocation2 + $0x600] sm:$0xff]  ;;  %v291_v12 = vld [vmem:[#allocation2 + $0x7a8] sm:$0xff] }
  0x69   :  { %v242_v20 = vld [vmem:[#allocation2 + $0x620] sm:$0xff] }
  0x6a   :  { %3251 = vmatmul.mubr.bf16.vlgmr.msra.gmra.mrb[0].mxu0 %v9055_v23  ;;  %3415 = vmatmul.mubr.bf16.vlgmr.msra.gmra.mrb[0].mxu1 %v9055_v23  ;;  %v7973_v63 = vcombine.low %v238_v19, %v242_v20 }
  0x6b   :  { %3260 = vmatpush1.bf16.msra.mxu0 %v7909_v26  ;;  %3424 = vmatpush1.bf16.msra.mxu1 %v7911_v27  ;;  %v7974_v26 = vcombine.high %v238_v19, %v242_v20  ;;  %v7976_v27 = vcombine.high %v239_v21, %v243_v22  ;;  %v601_v19 = vcombine.high %v9040_v59, %v9040_v59  ;;  %v295_v20 = vld [vmem:[#allocation2 + $0x7c8] sm:$0xff] }
  0x6c   :  { %3261 = vmatprep.subr.bf16.mxu0 %v7918_v28  ;;  %3425 = vmatprep.subr.bf16.mxu1 %v7920_v29  ;;  %v246_v28 = vld [vmem:[#allocation2 + $0x640] sm:$0xff]  ;;  %v299_v21 = vld [vmem:[#allocation2 + $0x7e8] sm:$0xff] }
  0x6d   :  { %3291 = vmatprep.mubr.bf16.mxu0 %v9059_v32  ;;  %3455 = vmatprep.mubr.bf16.mxu1 %v9059_v32  ;;  %v250_v29 = vld [vmem:[#allocation2 + $0x660] sm:$0xff]  ;;  %v8031_v59 = vcombine.low %v295_v20, %v299_v21 }
  0x6e   :  { %v7981_v40 = vcombine.low %v246_v28, %v250_v29 }
  0x6f   :  { %3262 = vmatpush1.bf16.msra.mxu0 %v7917_v34  ;;  %3426 = vmatpush1.bf16.msra.mxu1 %v7919_v35  ;;  %v7982_v34 = vcombine.high %v246_v28, %v250_v29  ;;  %v7984_v35 = vcombine.high %v247_v30, %v251_v31  ;;  %v306_v28 = vld [vmem:[#allocation2 + $0x820] sm:$0xff]  ;;  %v9068_v29 = vrot.slane %v601_v19, %v9035_v53  ;;  %v303_v30 = vld [vmem:[#allocation2 + $0x808] sm:$0xff] }
  0x70   :  { %3263 = vmatprep.subr.bf16.mxu0 %v7926_v36  ;;  %3427 = vmatprep.subr.bf16.mxu1 %v7928_v37  ;;  %v254_v36 = vld [vmem:[#allocation2 + $0x680] sm:$0xff]  ;;  %v307_v31 = vld [vmem:[#allocation2 + $0x828] sm:$0xff] }
  0x71   :  { %v258_v37 = vld [vmem:[#allocation2 + $0x6a0] sm:$0xff] }
  0x72   :  { %v7989_v49 = vcombine.low %v254_v36, %v258_v37  ;;  %v350_v19 = vld [vmem:[#allocation2 + $0x980] sm:$0xff] }
  0x73   :  { %3264 = vmatpush1.bf16.msra.mxu0 %v7925_v42  ;;  %3428 = vmatpush1.bf16.msra.mxu1 %v7927_v44  ;;  %v7990_v42 = vcombine.high %v254_v36, %v258_v37  ;;  %v7992_v44 = vcombine.high %v255_v38, %v259_v39  ;;  %v314_v36 = vld [vmem:[#allocation2 + $0x860] sm:$0xff]  ;;  %v617_v37 = vcombine.high %v9068_v29, %v9068_v29  ;;  %v311_v39 = vld [vmem:[#allocation2 + $0x848] sm:$0xff] }
  0x74   :  { %3265 = vmatprep.subr.bf16.mxu0 %v7934_v45  ;;  %3429 = vmatprep.subr.bf16.mxu1 %v7936_v46  ;;  %v262_v45 = vld [vmem:[#allocation2 + $0x6c0] sm:$0xff]  ;;  %v9074_v38 = vcombine.high %v9055_v23, %v9055_v23 }
  0x75   :  { %v266_v46 = vld [vmem:[#allocation2 + $0x6e0] sm:$0xff] }
  0x76   :  { %v7997_v58 = vcombine.low %v262_v45, %v266_v46 }
  0x77   :  { %3266 = vmatpush1.bf16.msra.mxu0 %v7933_v51  ;;  %3430 = vmatpush1.bf16.msra.mxu1 %v7935_v52  ;;  %v7998_v51 = vcombine.high %v262_v45, %v266_v46  ;;  %v8000_v52 = vcombine.high %v263_v47, %v267_v48  ;;  %v318_v46 = vld [vmem:[#allocation2 + $0x880] sm:$0xff]  ;;  %v9077_v48 = vrot.slane %v617_v37, %v9035_v53 }
  0x78   :  { %3267 = vmatprep.subr.bf16.mxu0 %v7942_v54  ;;  %3431 = vmatprep.subr.bf16.mxu1 %v7944_v55  ;;  %v270_v54 = vld [vmem:[#allocation2 + $0x700] sm:$0xff] }
  0x79   :  { %v274_v55 = vld [vmem:[#allocation2 + $0x720] sm:$0xff] }
  0x7a   :  { %v8005_v4 = vcombine.low %v270_v54, %v274_v55  ;;  %v322_v47 = vld [vmem:[#allocation2 + $0x8a0] sm:$0xff] }
  0x7b   :  { %3268 = vmatpush1.bf16.msra.mxu0 %v7941_v61  ;;  %3432 = vmatpush1.bf16.msra.mxu1 %v7943_v62  ;;  %v8006_v61 = vcombine.high %v270_v54, %v274_v55  ;;  %v8008_v62 = vcombine.high %v271_v56, %v275_v57  ;;  %v8054_v54 = vcombine.high %v318_v46, %v322_v47  ;;  %v326_v56 = vld [vmem:[#allocation2 + $0x8c0] sm:$0xff] }
  0x7c   :  { %3269 = vmatprep.subr.bf16.mxu0 %v7950_v0  ;;  %3433 = vmatprep.subr.bf16.mxu1 %v7952_v1  ;;  %v278_v0 = vld [vmem:[#allocation2 + $0x740] sm:$0xff] }
  0x7d   :  { %v282_v1 = vld [vmem:[#allocation2 + $0x760] sm:$0xff] }
  0x7e   :  { %v8013_v13 = vcombine.low %v278_v0, %v282_v1  ;;  %v330_v57 = vld [vmem:[#allocation2 + $0x8e0] sm:$0xff] }
  0x7f   :  { %3270 = vmatpush1.bf16.msra.mxu0 %v7949_v6  ;;  %3434 = vmatpush1.bf16.msra.mxu1 %v7951_v7  ;;  %v8014_v6 = vcombine.high %v278_v0, %v282_v1  ;;  %v8016_v7 = vcombine.high %v279_v2, %v283_v3  ;;  %v8062_v0 = vcombine.high %v326_v56, %v330_v57  ;;  %v334_v2 = vld [vmem:[#allocation2 + $0x900] sm:$0xff] }
  0x80   :  { %3271 = vmatprep.subr.bf16.mxu0 %v7958_v8  ;;  %3435 = vmatprep.subr.bf16.mxu1 %v7960_v10  ;;  %v286_v8 = vld [vmem:[#allocation2 + $0x780] sm:$0xff] }
  0x81   :  { %v290_v10 = vld [vmem:[#allocation2 + $0x7a0] sm:$0xff] }
  0x82   :  { %v8021_v22 = vcombine.low %v286_v8, %v290_v10  ;;  %v338_v3 = vld [vmem:[#allocation2 + $0x920] sm:$0xff] }
  0x83   :  { %3272 = vmatpush1.bf16.msra.mxu0 %v7957_v15  ;;  %3436 = vmatpush1.bf16.msra.mxu1 %v7959_v16  ;;  %v8022_v15 = vcombine.high %v286_v8, %v290_v10  ;;  %v8024_v16 = vcombine.high %v287_v11, %v291_v12  ;;  %v8070_v8 = vcombine.high %v334_v2, %v338_v3  ;;  %v370_v37 = vld [vmem:[#allocation2 + $0xa20] sm:$0xff] }
  0x84   :  { %3273 = vmatprep.subr.bf16.mxu0 %v7966_v17  ;;  %3437 = vmatprep.subr.bf16.mxu1 %v7968_v18  ;;  %v294_v17 = vld [vmem:[#allocation2 + $0x7c0] sm:$0xff] }
  0x85   :  { %v298_v18 = vld [vmem:[#allocation2 + $0x7e0] sm:$0xff] }
  0x87   :  { %3274 = vmatpush1.bf16.msra.mxu0 %v7965_v24  ;;  %3438 = vmatpush1.bf16.msra.mxu1 %v7967_v25  ;;  %v8023_v24 = vcombine.low %v287_v11, %v291_v12  ;;  %v8030_v25 = vcombine.high %v294_v17, %v298_v18  ;;  %v342_v11 = vld [vmem:[#allocation2 + $0x940] sm:$0xff] }
  0x88   :  { %3275 = vmatprep.subr.bf16.mxu0 %v7974_v26  ;;  %3439 = vmatprep.subr.bf16.mxu1 %v7976_v27  ;;  %v8032_v26 = vcombine.high %v295_v20, %v299_v21  ;;  %v302_v27 = vld [vmem:[#allocation2 + $0x800] sm:$0xff]  ;;  %v351_v21 = vld [vmem:[#allocation2 + $0x988] sm:$0xff] }
  0x89   :  { %v346_v12 = vld [vmem:[#allocation2 + $0x960] sm:$0xff] }
  0x8a   :  { %v354_v20 = vld [vmem:[#allocation2 + $0x9a0] sm:$0xff] }
  0x8b   :  { %3276 = vmatpush1.bf16.msra.mxu0 %v7973_v63  ;;  %3440 = vmatpush1.bf16.msra.mxu1 %v7975_v33  ;;  %v8029_v63 = vcombine.low %v294_v17, %v298_v18  ;;  %v8038_v33 = vcombine.high %v302_v27, %v306_v28  ;;  %v8078_v17 = vcombine.high %v342_v11, %v346_v12 }
  0x8c   :  { %3277 = vmatprep.subr.bf16.mxu0 %v7982_v34  ;;  %3441 = vmatprep.subr.bf16.mxu1 %v7984_v35  ;;  %v8040_v34 = vcombine.high %v303_v30, %v307_v31  ;;  %v310_v35 = vld [vmem:[#allocation2 + $0x840] sm:$0xff] }
  0x8f   :  { %3278 = vmatpush1.bf16.msra.mxu0 %v7981_v40  ;;  %3442 = vmatpush1.bf16.msra.mxu1 %v7983_v41  ;;  %v315_v40 = vld [vmem:[#allocation2 + $0x868] sm:$0xff]  ;;  %v8037_v41 = vcombine.low %v302_v27, %v306_v28  ;;  %v358_v28 = vld [vmem:[#allocation2 + $0x9c0] sm:$0xff] }
  0x90   :  { %3279 = vmatprep.subr.bf16.mxu0 %v7990_v42  ;;  %3443 = vmatprep.subr.bf16.mxu1 %v7992_v44  ;;  %v8039_v42 = vcombine.low %v303_v30, %v307_v31  ;;  %v8046_v44 = vcombine.high %v310_v35, %v314_v36  ;;  %v8048_v45 = vcombine.high %v311_v39, %v315_v40  ;;  %v362_v30 = vld [vmem:[#allocation2 + $0x9e0] sm:$0xff]  ;;  %v359_v31 = vld [vmem:[#allocation2 + $0x9c8] sm:$0xff] }
  0x93   :  { %3280 = vmatpush1.bf16.msra.mxu0 %v7989_v49  ;;  %3444 = vmatpush1.bf16.msra.mxu1 %v7991_v50  ;;  %v319_v49 = vld [vmem:[#allocation2 + $0x888] sm:$0xff] }
  0x94   :  { %3281 = vmatprep.subr.bf16.mxu0 %v7998_v51  ;;  %3445 = vmatprep.subr.bf16.mxu1 %v8000_v52  ;;  %v323_v50 = vld [vmem:[#allocation2 + $0x8a8] sm:$0xff]  ;;  %v8045_v51 = vcombine.low %v310_v35, %v314_v36  ;;  %v8047_v52 = vcombine.low %v311_v39, %v315_v40  ;;  %v366_v36 = vld [vmem:[#allocation2 + $0xa00] sm:$0xff] }
  0x95   :  { %v8056_v55 = vcombine.high %v319_v49, %v323_v50  ;;  %v367_v39 = vld [vmem:[#allocation2 + $0xa08] sm:$0xff] }
  0x96   :  { %v371_v40 = vld [vmem:[#allocation2 + $0xa28] sm:$0xff] }
  0x97   :  { %3282 = vmatpush1.bf16.msra.mxu0 %v7997_v58  ;;  %3446 = vmatpush1.bf16.msra.mxu1 %v7999_v60  ;;  %v327_v58 = vld [vmem:[#allocation2 + $0x8c8] sm:$0xff] }
  0x98   :  { %3283 = vmatprep.subr.bf16.mxu0 %v8006_v61  ;;  %3447 = vmatprep.subr.bf16.mxu1 %v8008_v62  ;;  %v331_v60 = vld [vmem:[#allocation2 + $0x8e8] sm:$0xff]  ;;  %v8053_v61 = vcombine.low %v318_v46, %v322_v47  ;;  %v8055_v62 = vcombine.low %v319_v49, %v323_v50  ;;  %v374_v46 = vld [vmem:[#allocation2 + $0xa40] sm:$0xff] }
  0x99   :  { %v8064_v1 = vcombine.high %v327_v58, %v331_v60  ;;  %v378_v47 = vld [vmem:[#allocation2 + $0xa60] sm:$0xff]  ;;  %v375_v49 = vld [vmem:[#allocation2 + $0xa48] sm:$0xff] }
  0x9a   :  { %v379_v50 = vld [vmem:[#allocation2 + $0xa68] sm:$0xff] }
  0x9b   :  { %3284 = vmatpush1.bf16.msra.mxu0 %v8005_v4  ;;  %3448 = vmatpush1.bf16.msra.mxu1 %v8007_v5  ;;  %v335_v4 = vld [vmem:[#allocation2 + $0x908] sm:$0xff] }
  0x9c   :  { %3285 = vmatprep.subr.bf16.mxu0 %v8014_v6  ;;  %3449 = vmatprep.subr.bf16.mxu1 %v8016_v7  ;;  %v339_v5 = vld [vmem:[#allocation2 + $0x928] sm:$0xff]  ;;  %v8061_v6 = vcombine.low %v326_v56, %v330_v57  ;;  %v8063_v7 = vcombine.low %v327_v58, %v331_v60  ;;  %v382_v56 = vld [vmem:[#allocation2 + $0xa80] sm:$0xff] }
  0x9d   :  { %v8072_v10 = vcombine.high %v335_v4, %v339_v5  ;;  %v386_v57 = vld [vmem:[#allocation2 + $0xaa0] sm:$0xff]  ;;  %v383_v58 = vld [vmem:[#allocation2 + $0xa88] sm:$0xff] }
  0x9e   :  { %v387_v60 = vld [vmem:[#allocation2 + $0xaa8] sm:$0xff] }
  0x9f   :  { %3286 = vmatpush1.bf16.msra.mxu0 %v8013_v13  ;;  %3450 = vmatpush1.bf16.msra.mxu1 %v8015_v14  ;;  %v343_v13 = vld [vmem:[#allocation2 + $0x948] sm:$0xff] }
  0xa0   :  { %3287 = vmatprep.subr.bf16.mxu0 %v8022_v15  ;;  %3451 = vmatprep.subr.bf16.mxu1 %v8024_v16  ;;  %v347_v14 = vld [vmem:[#allocation2 + $0x968] sm:$0xff]  ;;  %v8069_v15 = vcombine.low %v334_v2, %v338_v3  ;;  %v8071_v16 = vcombine.low %v335_v4, %v339_v5  ;;  %v390_v2 = vld [vmem:[#allocation2 + $0xac0] sm:$0xff] }
  0xa1   :  { %v8080_v18 = vcombine.high %v343_v13, %v347_v14  ;;  %v394_v3 = vld [vmem:[#allocation2 + $0xae0] sm:$0xff]  ;;  %v391_v4 = vld [vmem:[#allocation2 + $0xac8] sm:$0xff] }
  0xa2   :  { %v395_v5 = vld [vmem:[#allocation2 + $0xae8] sm:$0xff] }
  0xa3   :  { %3288 = vmatpush1.bf16.msra.mxu0 %v8021_v22  ;;  %3452 = vmatpush1.bf16.msra.mxu1 %v8023_v24  ;;  %v355_v22 = vld [vmem:[#allocation2 + $0x9a8] sm:$0xff]  ;;  %v8077_v24 = vcombine.low %v342_v11, %v346_v12  ;;  %v398_v11 = vld [vmem:[#allocation2 + $0xb00] sm:$0xff] }
  0xa4   :  { %3289 = vmatprep.subr.bf16.mxu0 %v8030_v25  ;;  %3453 = vmatprep.subr.bf16.mxu1 %v8032_v26  ;;  %v8079_v25 = vcombine.low %v343_v13, %v347_v14  ;;  %v8086_v26 = vcombine.high %v350_v19, %v354_v20  ;;  %v8088_v27 = vcombine.high %v351_v21, %v355_v22  ;;  %v402_v12 = vld [vmem:[#allocation2 + $0xb20] sm:$0xff]  ;;  %v399_v13 = vld [vmem:[#allocation2 + $0xb08] sm:$0xff] }
  0xa5   :  { %v403_v14 = vld [vmem:[#allocation2 + $0xb28] sm:$0xff] }
  0xa7   :  { %3290 = vmatpush1.bf16.msra.mxu0 %v8029_v63  ;;  %3454 = vmatpush1.bf16.msra.mxu1 %v8031_v59  ;;  %v363_v63 = vld [vmem:[#allocation2 + $0x9e8] sm:$0xff]  ;;  %v8085_v59 = vcombine.low %v350_v19, %v354_v20  ;;  %v406_v19 = vld [vmem:[#allocation2 + $0xb40] sm:$0xff] }
  0xa8   :  { %3300 = vmatprep.subr.bf16.mxu0 %v8038_v33  ;;  %3464 = vmatprep.subr.bf16.mxu1 %v8040_v34  ;;  %v8087_v33 = vcombine.low %v351_v21, %v355_v22  ;;  %v8094_v34 = vcombine.high %v358_v28, %v362_v30  ;;  %v8096_v35 = vcombine.high %v359_v31, %v363_v63  ;;  %v410_v20 = vld [vmem:[#allocation2 + $0xb60] sm:$0xff]  ;;  %v407_v21 = vld [vmem:[#allocation2 + $0xb48] sm:$0xff] }
  0xa9   :  { %v411_v22 = vld [vmem:[#allocation2 + $0xb68] sm:$0xff] }
  0xaa   :  { %3292 = vmatmul.mubr.bf16.vlgmr.msra.gmra.mrb[0].mxu0 %v9074_v38  ;;  %3456 = vmatmul.mubr.bf16.vlgmr.msra.gmra.mrb[0].mxu1 %v9074_v38 }
  0xab   :  { %3301 = vmatpush1.bf16.msra.mxu0 %v8037_v41  ;;  %3465 = vmatpush1.bf16.msra.mxu1 %v8039_v42  ;;  %v8093_v41 = vcombine.low %v358_v28, %v362_v30  ;;  %v8095_v42 = vcombine.low %v359_v31, %v363_v63  ;;  %v414_v28 = vld [vmem:[#allocation2 + $0xb80] sm:$0xff]  ;;  %v415_v31 = vld [vmem:[#allocation2 + $0xb88] sm:$0xff] }
  0xac   :  { %3302 = vmatprep.subr.bf16.mxu0 %v8046_v44  ;;  %3466 = vmatprep.subr.bf16.mxu1 %v8048_v45  ;;  %v8102_v44 = vcombine.high %v366_v36, %v370_v37  ;;  %v8104_v45 = vcombine.high %v367_v39, %v371_v40  ;;  %v418_v30 = vld [vmem:[#allocation2 + $0xba0] sm:$0xff]  ;;  %v419_v63 = vld [vmem:[#allocation2 + $0xba8] sm:$0xff] }
  0xad   :  { %3332 = vmatprep.mubr.bf16.mxu0 %v9077_v48  ;;  %3496 = vmatprep.mubr.bf16.mxu1 %v9077_v48 }
  0xaf   :  { %3303 = vmatpush1.bf16.msra.mxu0 %v8045_v51  ;;  %3467 = vmatpush1.bf16.msra.mxu1 %v8047_v52  ;;  %v8101_v51 = vcombine.low %v366_v36, %v370_v37  ;;  %v8103_v52 = vcombine.low %v367_v39, %v371_v40  ;;  %v422_v36 = vld [vmem:[#allocation2 + $0xbc0] sm:$0xff]  ;;  %v423_v39 = vld [vmem:[#allocation2 + $0xbc8] sm:$0xff] }
  0xb0   :  { %3304 = vmatprep.subr.bf16.mxu0 %v8054_v54  ;;  %3468 = vmatprep.subr.bf16.mxu1 %v8056_v55  ;;  %v8110_v54 = vcombine.high %v374_v46, %v378_v47  ;;  %v8112_v55 = vcombine.high %v375_v49, %v379_v50  ;;  %v426_v37 = vld [vmem:[#allocation2 + $0xbe0] sm:$0xff]  ;;  %v427_v40 = vld [vmem:[#allocation2 + $0xbe8] sm:$0xff] }
  0xb3   :  { %3305 = vmatpush1.bf16.msra.mxu0 %v8053_v61  ;;  %3469 = vmatpush1.bf16.msra.mxu1 %v8055_v62  ;;  %v8109_v61 = vcombine.low %v374_v46, %v378_v47  ;;  %v8111_v62 = vcombine.low %v375_v49, %v379_v50  ;;  %v430_v46 = vld [vmem:[#allocation2 + $0xc00] sm:$0xff]  ;;  %v431_v49 = vld [vmem:[#allocation2 + $0xc08] sm:$0xff] }
  0xb4   :  { %3306 = vmatprep.subr.bf16.mxu0 %v8062_v0  ;;  %3470 = vmatprep.subr.bf16.mxu1 %v8064_v1  ;;  %v8118_v0 = vcombine.high %v382_v56, %v386_v57  ;;  %v8120_v1 = vcombine.high %v383_v58, %v387_v60  ;;  %v434_v47 = vld [vmem:[#allocation2 + $0xc20] sm:$0xff]  ;;  %v435_v50 = vld [vmem:[#allocation2 + $0xc28] sm:$0xff] }
  0xb7   :  { %3307 = vmatpush1.bf16.msra.mxu0 %v8061_v6  ;;  %3471 = vmatpush1.bf16.msra.mxu1 %v8063_v7  ;;  %v8117_v6 = vcombine.low %v382_v56, %v386_v57  ;;  %v8119_v7 = vcombine.low %v383_v58, %v387_v60  ;;  %v438_v56 = vld [vmem:[#allocation2 + $0xc40] sm:$0xff]  ;;  %v9085_v58 = vrot.slane %v9068_v29, %v9035_v53  ;;  %v439_v60 = vld [vmem:[#allocation2 + $0xc48] sm:$0xff] }
  0xb8   :  { %3308 = vmatprep.subr.bf16.mxu0 %v8070_v8  ;;  %3472 = vmatprep.subr.bf16.mxu1 %v8072_v10  ;;  %v8126_v8 = vcombine.high %v390_v2, %v394_v3  ;;  %v8128_v10 = vcombine.high %v391_v4, %v395_v5  ;;  %v442_v57 = vld [vmem:[#allocation2 + $0xc60] sm:$0xff]  ;;  %v447_v29 = vld [vmem:[#allocation2 + $0xc88] sm:$0xff] }
  0xbb   :  { %3309 = vmatpush1.bf16.msra.mxu0 %v8069_v15  ;;  %3473 = vmatpush1.bf16.msra.mxu1 %v8071_v16  ;;  %v8125_v15 = vcombine.low %v390_v2, %v394_v3  ;;  %v8127_v16 = vcombine.low %v391_v4, %v395_v5  ;;  %v446_v3 = vld [vmem:[#allocation2 + $0xc80] sm:$0xff]  ;;  %v9089_v5 = vcombine.high %v9077_v48, %v9077_v48 }
  0xbc   :  { %3310 = vmatprep.subr.bf16.mxu0 %v8078_v17  ;;  %3474 = vmatprep.subr.bf16.mxu1 %v8080_v18  ;;  %v8134_v17 = vcombine.high %v398_v11, %v402_v12  ;;  %v8136_v18 = vcombine.high %v399_v13, %v403_v14  ;;  %v450_v4 = vld [vmem:[#allocation2 + $0xca0] sm:$0xff] }
  0xbf   :  { %3311 = vmatpush1.bf16.msra.mxu0 %v8077_v24  ;;  %3475 = vmatpush1.bf16.msra.mxu1 %v8079_v25  ;;  %v8133_v24 = vcombine.low %v398_v11, %v402_v12  ;;  %v8135_v25 = vcombine.low %v399_v13, %v403_v14  ;;  %v454_v12 = vld [vmem:[#allocation2 + $0xcc0] sm:$0xff]  ;;  %v455_v14 = vld [vmem:[#allocation2 + $0xcc8] sm:$0xff] }
  0xc0   :  { %3312 = vmatprep.subr.bf16.mxu0 %v8086_v26  ;;  %3476 = vmatprep.subr.bf16.mxu1 %v8088_v27  ;;  %v8142_v26 = vcombine.high %v406_v19, %v410_v20  ;;  %v8144_v27 = vcombine.high %v407_v21, %v411_v22  ;;  %v458_v13 = vld [vmem:[#allocation2 + $0xce0] sm:$0xff] }
  0xc3   :  { %3313 = vmatpush1.bf16.msra.mxu0 %v8085_v59  ;;  %3477 = vmatpush1.bf16.msra.mxu1 %v8087_v33  ;;  %v8141_v59 = vcombine.low %v406_v19, %v410_v20  ;;  %v8143_v33 = vcombine.low %v407_v21, %v411_v22  ;;  %v462_v20 = vld [vmem:[#allocation2 + $0xd00] sm:$0xff]  ;;  %v463_v22 = vld [vmem:[#allocation2 + $0xd08] sm:$0xff] }
  0xc4   :  { %3314 = vmatprep.subr.bf16.mxu0 %v8094_v34  ;;  %3478 = vmatprep.subr.bf16.mxu1 %v8096_v35  ;;  %v8150_v34 = vcombine.high %v414_v28, %v418_v30  ;;  %v8152_v35 = vcombine.high %v415_v31, %v419_v63  ;;  %v466_v21 = vld [vmem:[#allocation2 + $0xd20] sm:$0xff] }
  0xc7   :  { %3315 = vmatpush1.bf16.msra.mxu0 %v8093_v41  ;;  %3479 = vmatpush1.bf16.msra.mxu1 %v8095_v42  ;;  %v8149_v41 = vcombine.low %v414_v28, %v418_v30  ;;  %v8151_v42 = vcombine.low %v415_v31, %v419_v63  ;;  %v470_v30 = vld [vmem:[#allocation2 + $0xd40] sm:$0xff]  ;;  %v471_v63 = vld [vmem:[#allocation2 + $0xd48] sm:$0xff] }
  0xc8   :  { %3316 = vmatprep.subr.bf16.mxu0 %v8102_v44  ;;  %3480 = vmatprep.subr.bf16.mxu1 %v8104_v45  ;;  %v8158_v44 = vcombine.high %v422_v36, %v426_v37  ;;  %v8160_v45 = vcombine.high %v423_v39, %v427_v40  ;;  %v474_v31 = vld [vmem:[#allocation2 + $0xd60] sm:$0xff] }
  0xcb   :  { %3317 = vmatpush1.bf16.msra.mxu0 %v8101_v51  ;;  %3481 = vmatpush1.bf16.msra.mxu1 %v8103_v52  ;;  %v8157_v51 = vcombine.low %v422_v36, %v426_v37  ;;  %v8159_v52 = vcombine.low %v423_v39, %v427_v40  ;;  %v478_v37 = vld [vmem:[#allocation2 + $0xd80] sm:$0xff]  ;;  %v479_v40 = vld [vmem:[#allocation2 + $0xd88] sm:$0xff] }
  0xcc   :  { %3318 = vmatprep.subr.bf16.mxu0 %v8110_v54  ;;  %3482 = vmatprep.subr.bf16.mxu1 %v8112_v55  ;;  %v8166_v54 = vcombine.high %v430_v46, %v434_v47  ;;  %v8168_v55 = vcombine.high %v431_v49, %v435_v50  ;;  %v482_v39 = vld [vmem:[#allocation2 + $0xda0] sm:$0xff] }
  0xcf   :  { %3319 = vmatpush1.bf16.msra.mxu0 %v8109_v61  ;;  %3483 = vmatpush1.bf16.msra.mxu1 %v8111_v62  ;;  %v443_v61 = vld [vmem:[#allocation2 + $0xc68] sm:$0xff]  ;;  %v8165_v62 = vcombine.low %v430_v46, %v434_v47  ;;  %v486_v47 = vld [vmem:[#allocation2 + $0xdc0] sm:$0xff] }
  0xd0   :  { %3320 = vmatprep.subr.bf16.mxu0 %v8118_v0  ;;  %3484 = vmatprep.subr.bf16.mxu1 %v8120_v1  ;;  %v8167_v0 = vcombine.low %v431_v49, %v435_v50  ;;  %v8174_v1 = vcombine.high %v438_v56, %v442_v57  ;;  %v8176_v2 = vcombine.high %v439_v60, %v443_v61  ;;  %v490_v49 = vld [vmem:[#allocation2 + $0xde0] sm:$0xff]  ;;  %v487_v50 = vld [vmem:[#allocation2 + $0xdc8] sm:$0xff] }
  0xd3   :  { %3321 = vmatpush1.bf16.msra.mxu0 %v8117_v6  ;;  %3485 = vmatpush1.bf16.msra.mxu1 %v8119_v7  ;;  %v451_v6 = vld [vmem:[#allocation2 + $0xca8] sm:$0xff]  ;;  %v8173_v7 = vcombine.low %v438_v56, %v442_v57  ;;  %v494_v57 = vld [vmem:[#allocation2 + $0xe00] sm:$0xff] }
  0xd4   :  { %3322 = vmatprep.subr.bf16.mxu0 %v8126_v8  ;;  %3486 = vmatprep.subr.bf16.mxu1 %v8128_v10  ;;  %v8175_v8 = vcombine.low %v439_v60, %v443_v61  ;;  %v8182_v10 = vcombine.high %v446_v3, %v450_v4  ;;  %v8184_v11 = vcombine.high %v447_v29, %v451_v6  ;;  %v498_v60 = vld [vmem:[#allocation2 + $0xe20] sm:$0xff]  ;;  %v495_v61 = vld [vmem:[#allocation2 + $0xe08] sm:$0xff] }
  0xd7   :  { %3323 = vmatpush1.bf16.msra.mxu0 %v8125_v15  ;;  %3487 = vmatpush1.bf16.msra.mxu1 %v8127_v16  ;;  %v459_v15 = vld [vmem:[#allocation2 + $0xce8] sm:$0xff]  ;;  %v8181_v16 = vcombine.low %v446_v3, %v450_v4  ;;  %v502_v4 = vld [vmem:[#allocation2 + $0xe40] sm:$0xff] }
  0xd8   :  { %3324 = vmatprep.subr.bf16.mxu0 %v8134_v17  ;;  %3488 = vmatprep.subr.bf16.mxu1 %v8136_v18  ;;  %v8183_v17 = vcombine.low %v447_v29, %v451_v6  ;;  %v8190_v18 = vcombine.high %v454_v12, %v458_v13  ;;  %v8192_v19 = vcombine.high %v455_v14, %v459_v15  ;;  %v506_v29 = vld [vmem:[#allocation2 + $0xe60] sm:$0xff]  ;;  %v503_v6 = vld [vmem:[#allocation2 + $0xe48] sm:$0xff] }
  0xdb   :  { %3325 = vmatpush1.bf16.msra.mxu0 %v8133_v24  ;;  %3489 = vmatpush1.bf16.msra.mxu1 %v8135_v25  ;;  %v467_v24 = vld [vmem:[#allocation2 + $0xd28] sm:$0xff]  ;;  %v8189_v25 = vcombine.low %v454_v12, %v458_v13  ;;  %v510_v13 = vld [vmem:[#allocation2 + $0xe80] sm:$0xff] }
  0xdc   :  { %3326 = vmatprep.subr.bf16.mxu0 %v8142_v26  ;;  %3490 = vmatprep.subr.bf16.mxu1 %v8144_v27  ;;  %v8191_v26 = vcombine.low %v455_v14, %v459_v15  ;;  %v8198_v27 = vcombine.high %v462_v20, %v466_v21  ;;  %v8200_v28 = vcombine.high %v463_v22, %v467_v24  ;;  %v514_v14 = vld [vmem:[#allocation2 + $0xea0] sm:$0xff]  ;;  %v511_v15 = vld [vmem:[#allocation2 + $0xe88] sm:$0xff] }
  0xdf   :  { %3327 = vmatpush1.bf16.msra.mxu0 %v8141_v59  ;;  %3491 = vmatpush1.bf16.msra.mxu1 %v8143_v33  ;;  %v475_v59 = vld [vmem:[#allocation2 + $0xd68] sm:$0xff]  ;;  %v8197_v33 = vcombine.low %v462_v20, %v466_v21  ;;  %v518_v21 = vld [vmem:[#allocation2 + $0xec0] sm:$0xff] }
  0xe0   :  { %3328 = vmatprep.subr.bf16.mxu0 %v8150_v34  ;;  %3492 = vmatprep.subr.bf16.mxu1 %v8152_v35  ;;  %v8199_v34 = vcombine.low %v463_v22, %v467_v24  ;;  %v8206_v35 = vcombine.high %v470_v30, %v474_v31  ;;  %v8208_v36 = vcombine.high %v471_v63, %v475_v59  ;;  %v522_v22 = vld [vmem:[#allocation2 + $0xee0] sm:$0xff]  ;;  %v519_v24 = vld [vmem:[#allocation2 + $0xec8] sm:$0xff] }
  0xe3   :  { %3329 = vmatpush1.bf16.msra.mxu0 %v8149_v41  ;;  %3493 = vmatpush1.bf16.msra.mxu1 %v8151_v42  ;;  %v483_v41 = vld [vmem:[#allocation2 + $0xda8] sm:$0xff]  ;;  %v8205_v42 = vcombine.low %v470_v30, %v474_v31  ;;  %v526_v31 = vld [vmem:[#allocation2 + $0xf00] sm:$0xff] }
  0xe4   :  { %3330 = vmatprep.subr.bf16.mxu0 %v8158_v44  ;;  %3494 = vmatprep.subr.bf16.mxu1 %v8160_v45  ;;  %v8207_v44 = vcombine.low %v471_v63, %v475_v59  ;;  %v8214_v45 = vcombine.high %v478_v37, %v482_v39  ;;  %v8216_v46 = vcombine.high %v479_v40, %v483_v41  ;;  %v530_v63 = vld [vmem:[#allocation2 + $0xf20] sm:$0xff]  ;;  %v527_v59 = vld [vmem:[#allocation2 + $0xf08] sm:$0xff] }
  0xe7   :  { %3331 = vmatpush1.bf16.msra.mxu0 %v8157_v51  ;;  %3495 = vmatpush1.bf16.msra.mxu1 %v8159_v52  ;;  %v491_v51 = vld [vmem:[#allocation2 + $0xde8] sm:$0xff]  ;;  %v8213_v52 = vcombine.low %v478_v37, %v482_v39  ;;  %v534_v39 = vld [vmem:[#allocation2 + $0xf40] sm:$0xff] }
  0xe8   :  { %3341 = vmatprep.subr.bf16.mxu0 %v8166_v54  ;;  %3505 = vmatprep.subr.bf16.mxu1 %v8168_v55  ;;  %v8215_v54 = vcombine.low %v479_v40, %v483_v41  ;;  %v8222_v55 = vcombine.high %v486_v47, %v490_v49  ;;  %v8224_v56 = vcombine.high %v487_v50, %v491_v51  ;;  %v538_v40 = vld [vmem:[#allocation2 + $0xf60] sm:$0xff]  ;;  %v535_v41 = vld [vmem:[#allocation2 + $0xf48] sm:$0xff] }
  0xea   :  { %3333 = vmatmul.mubr.bf16.vlgmr.msra.gmra.mrb[0].mxu0 %v9085_v58  ;;  %3497 = vmatmul.mubr.bf16.vlgmr.msra.gmra.mrb[0].mxu1 %v9085_v58 }
  0xeb   :  { %3342 = vmatpush1.bf16.msra.mxu0 %v8165_v62  ;;  %3506 = vmatpush1.bf16.msra.mxu1 %v8167_v0  ;;  %v499_v62 = vld [vmem:[#allocation2 + $0xe28] sm:$0xff]  ;;  %v8221_v0 = vcombine.low %v486_v47, %v490_v49  ;;  %v542_v49 = vld [vmem:[#allocation2 + $0xf80] sm:$0xff] }
  0xec   :  { %3343 = vmatprep.subr.bf16.mxu0 %v8174_v1  ;;  %3507 = vmatprep.subr.bf16.mxu1 %v8176_v2  ;;  %v8223_v1 = vcombine.low %v487_v50, %v491_v51  ;;  %v8230_v2 = vcombine.high %v494_v57, %v498_v60  ;;  %v8232_v3 = vcombine.high %v495_v61, %v499_v62  ;;  %v546_v50 = vld [vmem:[#allocation2 + $0xfa0] sm:$0xff]  ;;  %v543_v51 = vld [vmem:[#allocation2 + $0xf88] sm:$0xff] }
  0xed   :  { %3373 = vmatprep.mubr.bf16.mxu0 %v9089_v5  ;;  %3537 = vmatprep.mubr.bf16.mxu1 %v9089_v5 }
  0xef   :  { %3344 = vmatpush1.bf16.msra.mxu0 %v8173_v7  ;;  %3508 = vmatpush1.bf16.msra.mxu1 %v8175_v8  ;;  %v507_v7 = vld [vmem:[#allocation2 + $0xe68] sm:$0xff]  ;;  %v8229_v8 = vcombine.low %v494_v57, %v498_v60  ;;  %v550_v60 = vld [vmem:[#allocation2 + $0xfc0] sm:$0xff] }
  0xf0   :  { %3345 = vmatprep.subr.bf16.mxu0 %v8182_v10  ;;  %3509 = vmatprep.subr.bf16.mxu1 %v8184_v11  ;;  %v8231_v10 = vcombine.low %v495_v61, %v499_v62  ;;  %v8238_v11 = vcombine.high %v502_v4, %v506_v29  ;;  %v8240_v12 = vcombine.high %v503_v6, %v507_v7  ;;  %v554_v61 = vld [vmem:[#allocation2 + $0xfe0] sm:$0xff]  ;;  %v551_v62 = vld [vmem:[#allocation2 + $0xfc8] sm:$0xff] }
  0xf3   :  { %3346 = vmatpush1.bf16.msra.mxu0 %v8181_v16  ;;  %3510 = vmatpush1.bf16.msra.mxu1 %v8183_v17  ;;  %v515_v16 = vld [vmem:[#allocation2 + $0xea8] sm:$0xff]  ;;  %v8237_v17 = vcombine.low %v502_v4, %v506_v29  ;;  %v48_v29 = vld [vmem:[#allocation2 + $0x10] sm:$0xff] }
  0xf4   :  { %3347 = vmatprep.subr.bf16.mxu0 %v8190_v18  ;;  %3511 = vmatprep.subr.bf16.mxu1 %v8192_v19  ;;  %v8239_v18 = vcombine.low %v503_v6, %v507_v7  ;;  %v8246_v19 = vcombine.high %v510_v13, %v514_v14  ;;  %v8248_v20 = vcombine.high %v511_v15, %v515_v16  ;;  %v52_v6 = vld [vmem:[#allocation2 + $0x30] sm:$0xff]  ;;  %v49_v7 = vld [vmem:[#allocation2 + $0x18] sm:$0xff] }
  0xf7   :  { %3348 = vmatpush1.bf16.msra.mxu0 %v8189_v25  ;;  %3512 = vmatpush1.bf16.msra.mxu1 %v8191_v26  ;;  %v523_v25 = vld [vmem:[#allocation2 + $0xee8] sm:$0xff]  ;;  %v8245_v26 = vcombine.low %v510_v13, %v514_v14  ;;  %v56_v14 = vld [vmem:[#allocation2 + $0x50] sm:$0xff] }
  0xf8   :  { %3349 = vmatprep.subr.bf16.mxu0 %v8198_v27  ;;  %3513 = vmatprep.subr.bf16.mxu1 %v8200_v28  ;;  %v8247_v27 = vcombine.low %v511_v15, %v515_v16  ;;  %v8254_v28 = vcombine.high %v518_v21, %v522_v22  ;;  %v8256_v30 = vcombine.high %v519_v24, %v523_v25  ;;  %v60_v15 = vld [vmem:[#allocation2 + $0x70] sm:$0xff] }
  0xf9   :  { %v9097_v16 = vcombine.high %v9085_v58, %v9085_v58 }
  0xfb   :  { %3350 = vmatpush1.bf16.msra.mxu0 %v8197_v33  ;;  %3514 = vmatpush1.bf16.msra.mxu1 %v8199_v34  ;;  %v531_v33 = vld [vmem:[#allocation2 + $0xf28] sm:$0xff]  ;;  %v8253_v34 = vcombine.low %v518_v21, %v522_v22  ;;  %v7794_v21 = vcombine.high %v56_v14, %v60_v15 }
  0xfc   :  { %3351 = vmatprep.subr.bf16.mxu0 %v8206_v35  ;;  %3515 = vmatprep.subr.bf16.mxu1 %v8208_v36  ;;  %v8255_v35 = vcombine.low %v519_v24, %v523_v25  ;;  %v8262_v36 = vcombine.high %v526_v31, %v530_v63  ;;  %v8264_v37 = vcombine.high %v527_v59, %v531_v33  ;;  %v64_v24 = vld [vmem:[#allocation2 + $0x90] sm:$0xff] }
  0xfd   :  { %v68_v25 = vld [vmem:[#allocation2 + $0xb0] sm:$0xff] }
  0xff   :  { %3352 = vmatpush1.bf16.msra.mxu0 %v8205_v42  ;;  %3516 = vmatpush1.bf16.msra.mxu1 %v8207_v44  ;;  %v539_v42 = vld [vmem:[#allocation2 + $0xf68] sm:$0xff]  ;;  %v8261_v44 = vcombine.low %v526_v31, %v530_v63  ;;  %v7802_v31 = vcombine.high %v64_v24, %v68_v25 }
 0x100   :  { %3353 = vmatprep.subr.bf16.mxu0 %v8214_v45  ;;  %3517 = vmatprep.subr.bf16.mxu1 %v8216_v46  ;;  %v8263_v45 = vcombine.low %v527_v59, %v531_v33  ;;  %v8270_v46 = vcombine.high %v534_v39, %v538_v40  ;;  %v8272_v47 = vcombine.high %v535_v41, %v539_v42  ;;  %v72_v59 = vld [vmem:[#allocation2 + $0xd0] sm:$0xff] }
 0x101   :  { %v76_v33 = vld [vmem:[#allocation2 + $0xf0] sm:$0xff] }
 0x103   :  { %3354 = vmatpush1.bf16.msra.mxu0 %v8213_v52  ;;  %3518 = vmatpush1.bf16.msra.mxu1 %v8215_v54  ;;  %v547_v52 = vld [vmem:[#allocation2 + $0xfa8] sm:$0xff]  ;;  %v8269_v54 = vcombine.low %v534_v39, %v538_v40  ;;  %v7810_v39 = vcombine.high %v72_v59, %v76_v33 }
 0x104   :  { %3355 = vmatprep.subr.bf16.mxu0 %v8222_v55  ;;  %3519 = vmatprep.subr.bf16.mxu1 %v8224_v56  ;;  %v8271_v55 = vcombine.low %v535_v41, %v539_v42  ;;  %v8278_v56 = vcombine.high %v542_v49, %v546_v50  ;;  %v8280_v57 = vcombine.high %v543_v51, %v547_v52  ;;  %v80_v41 = vld [vmem:[#allocation2 + $0x110] sm:$0xff] }
 0x105   :  { %v84_v42 = vld [vmem:[#allocation2 + $0x130] sm:$0xff] }
 0x107   :  { %3356 = vmatpush1.bf16.msra.mxu0 %v8221_v0  ;;  %3520 = vmatpush1.bf16.msra.mxu1 %v8223_v1  ;;  %v555_v0 = vld [vmem:[#allocation2 + $0xfe8] sm:$0xff]  ;;  %v8277_v1 = vcombine.low %v542_v49, %v546_v50  ;;  %v7818_v49 = vcombine.high %v80_v41, %v84_v42  ;;  %v88_v50 = vld [vmem:[#allocation2 + $0x150] sm:$0xff] }
 0x108   :  { %3357 = vmatprep.subr.bf16.mxu0 %v8230_v2  ;;  %3521 = vmatprep.subr.bf16.mxu1 %v8232_v3  ;;  %v8279_v2 = vcombine.low %v543_v51, %v547_v52  ;;  %v8286_v3 = vcombine.high %v550_v60, %v554_v61  ;;  %v8288_v4 = vcombine.high %v551_v62, %v555_v0  ;;  %v92_v51 = vld [vmem:[#allocation2 + $0x170] sm:$0xff]  ;;  %v89_v52 = vld [vmem:[#allocation2 + $0x158] sm:$0xff] }
 0x10b   :  { %3358 = vmatpush1.bf16.msra.mxu0 %v8229_v8  ;;  %3522 = vmatpush1.bf16.msra.mxu1 %v8231_v10  ;;  %v53_v8 = vld [vmem:[#allocation2 + $0x38] sm:$0xff]  ;;  %v8285_v10 = vcombine.low %v550_v60, %v554_v61  ;;  %v96_v61 = vld [vmem:[#allocation2 + $0x190] sm:$0xff] }
 0x10c   :  { %3359 = vmatprep.subr.bf16.mxu0 %v8238_v11  ;;  %3523 = vmatprep.subr.bf16.mxu1 %v8240_v12  ;;  %v8287_v11 = vcombine.low %v551_v62, %v555_v0  ;;  %v7786_v12 = vcombine.high %v48_v29, %v52_v6  ;;  %v7788_v13 = vcombine.high %v49_v7, %v53_v8  ;;  %v100_v62 = vld [vmem:[#allocation2 + $0x1b0] sm:$0xff]  ;;  %v97_v0 = vld [vmem:[#allocation2 + $0x198] sm:$0xff] }
 0x10f   :  { %3360 = vmatpush1.bf16.msra.mxu0 %v8237_v17  ;;  %3524 = vmatpush1.bf16.msra.mxu1 %v8239_v18  ;;  %v57_v17 = vld [vmem:[#allocation2 + $0x58] sm:$0xff] }
 0x110   :  { %3361 = vmatprep.subr.bf16.mxu0 %v8246_v19  ;;  %3525 = vmatprep.subr.bf16.mxu1 %v8248_v20  ;;  %v61_v18 = vld [vmem:[#allocation2 + $0x78] sm:$0xff]  ;;  %v7785_v19 = vcombine.low %v48_v29, %v52_v6  ;;  %v7787_v20 = vcombine.low %v49_v7, %v53_v8  ;;  %v104_v6 = vld [vmem:[#allocation2 + $0x1d0] sm:$0xff] }
 0x111   :  { %v7796_v22 = vcombine.high %v57_v17, %v61_v18  ;;  %v108_v7 = vld [vmem:[#allocation2 + $0x1f0] sm:$0xff]  ;;  %v105_v8 = vld [vmem:[#allocation2 + $0x1d8] sm:$0xff] }
 0x113   :  { %3362 = vmatpush1.bf16.msra.mxu0 %v8245_v26  ;;  %3526 = vmatpush1.bf16.msra.mxu1 %v8247_v27  ;;  %v65_v26 = vld [vmem:[#allocation2 + $0x98] sm:$0xff] }
 0x114   :  { %3363 = vmatprep.subr.bf16.mxu0 %v8254_v28  ;;  %3527 = vmatprep.subr.bf16.mxu1 %v8256_v30  ;;  %v69_v27 = vld [vmem:[#allocation2 + $0xb8] sm:$0xff]  ;;  %v7793_v28 = vcombine.low %v56_v14, %v60_v15  ;;  %v7795_v30 = vcombine.low %v57_v17, %v61_v18  ;;  %v112_v15 = vld [vmem:[#allocation2 + $0x210] sm:$0xff] }
 0x115   :  { %v7804_v63 = vcombine.high %v65_v26, %v69_v27  ;;  %v116_v17 = vld [vmem:[#allocation2 + $0x230] sm:$0xff]  ;;  %v113_v18 = vld [vmem:[#allocation2 + $0x218] sm:$0xff] }
 0x117   :  { %3364 = vmatpush1.bf16.msra.mxu0 %v8253_v34  ;;  %3528 = vmatpush1.bf16.msra.mxu1 %v8255_v35  ;;  %v73_v34 = vld [vmem:[#allocation2 + $0xd8] sm:$0xff] }
 0x118   :  { %3365 = vmatprep.subr.bf16.mxu0 %v8262_v36  ;;  %3529 = vmatprep.subr.bf16.mxu1 %v8264_v37  ;;  %v77_v35 = vld [vmem:[#allocation2 + $0xf8] sm:$0xff]  ;;  %v7801_v36 = vcombine.low %v64_v24, %v68_v25  ;;  %v7803_v37 = vcombine.low %v65_v26, %v69_v27  ;;  %v120_v25 = vld [vmem:[#allocation2 + $0x250] sm:$0xff] }
 0x119   :  { %v7812_v40 = vcombine.high %v73_v34, %v77_v35  ;;  %v124_v26 = vld [vmem:[#allocation2 + $0x270] sm:$0xff]  ;;  %v121_v27 = vld [vmem:[#allocation2 + $0x258] sm:$0xff] }
 0x11b   :  { %3366 = vmatpush1.bf16.msra.mxu0 %v8261_v44  ;;  %3530 = vmatpush1.bf16.msra.mxu1 %v8263_v45  ;;  %v81_v44 = vld [vmem:[#allocation2 + $0x118] sm:$0xff] }
 0x11c   :  { %3367 = vmatprep.subr.bf16.mxu0 %v8270_v46  ;;  %3531 = vmatprep.subr.bf16.mxu1 %v8272_v47  ;;  %v85_v45 = vld [vmem:[#allocation2 + $0x138] sm:$0xff]  ;;  %v7809_v46 = vcombine.low %v72_v59, %v76_v33  ;;  %v7811_v47 = vcombine.low %v73_v34, %v77_v35  ;;  %v128_v33 = vld [vmem:[#allocation2 + $0x290] sm:$0xff] }
 0x11d   :  { %v132_v34 = vld [vmem:[#allocation2 + $0x2b0] sm:$0xff]  ;;  %v129_v35 = vld [vmem:[#allocation2 + $0x298] sm:$0xff] }
 0x11f   :  { %3368 = vmatpush1.bf16.msra.mxu0 %v8269_v54  ;;  %3532 = vmatpush1.bf16.msra.mxu1 %v8271_v55  ;;  %v93_v54 = vld [vmem:[#allocation2 + $0x178] sm:$0xff]  ;;  %v7817_v55 = vcombine.low %v80_v41, %v84_v42  ;;  %v136_v42 = vld [vmem:[#allocation2 + $0x2d0] sm:$0xff] }
 0x120   :  { %3369 = vmatprep.subr.bf16.mxu0 %v8278_v56  ;;  %3533 = vmatprep.subr.bf16.mxu1 %v8280_v57  ;;  %v7819_v56 = vcombine.low %v81_v44, %v85_v45  ;;  %v7826_v57 = vcombine.high %v88_v50, %v92_v51  ;;  %v7828_v60 = vcombine.high %v89_v52, %v93_v54 }
 0x123   :  { %3370 = vmatpush1.bf16.msra.mxu0 %v8277_v1  ;;  %3534 = vmatpush1.bf16.msra.mxu1 %v8279_v2  ;;  %v101_v1 = vld [vmem:[#allocation2 + $0x1b8] sm:$0xff]  ;;  %v7825_v2 = vcombine.low %v88_v50, %v92_v51  ;;  %v144_v51 = vld [vmem:[#allocation2 + $0x310] sm:$0xff] }
 0x124   :  { %3371 = vmatprep.subr.bf16.mxu0 %v8286_v3  ;;  %3535 = vmatprep.subr.bf16.mxu1 %v8288_v4  ;;  %v7827_v3 = vcombine.low %v89_v52, %v93_v54  ;;  %v7834_v4 = vcombine.high %v96_v61, %v100_v62  ;;  %v7836_v29 = vcombine.high %v97_v0, %v101_v1  ;;  %v148_v52 = vld [vmem:[#allocation2 + $0x330] sm:$0xff]  ;;  %v145_v54 = vld [vmem:[#allocation2 + $0x318] sm:$0xff] }
 0x127   :  { %3372 = vmatpush1.bf16.msra.mxu0 %v8285_v10  ;;  %3536 = vmatpush1.bf16.msra.mxu1 %v8287_v11  ;;  %v109_v10 = vld [vmem:[#allocation2 + $0x1f8] sm:$0xff]  ;;  %v7833_v11 = vcombine.low %v96_v61, %v100_v62  ;;  %v152_v62 = vld [vmem:[#allocation2 + $0x350] sm:$0xff] }
 0x128   :  { %3546 = vmatprep.subr.bf16.mxu0 %v7786_v12  ;;  %3710 = vmatprep.subr.bf16.mxu1 %v7788_v13  ;;  %v7835_v12 = vcombine.low %v97_v0, %v101_v1  ;;  %v7842_v13 = vcombine.high %v104_v6, %v108_v7  ;;  %v7844_v14 = vcombine.high %v105_v8, %v109_v10  ;;  %v156_v0 = vld [vmem:[#allocation2 + $0x370] sm:$0xff]  ;;  %v153_v1 = vld [vmem:[#allocation2 + $0x358] sm:$0xff] }
 0x12a   :  { %3374 = vmatmul.mubr.bf16.vlgmr.msra.gmra.mrb[0].mxu0 %v9097_v16  ;;  %3538 = vmatmul.mubr.bf16.vlgmr.msra.gmra.mrb[0].mxu1 %v9097_v16 }
 0x12b   :  { %3547 = vmatpush1.bf16.msra.mxu0 %v7785_v19  ;;  %3711 = vmatpush1.bf16.msra.mxu1 %v7787_v20  ;;  %v117_v19 = vld [vmem:[#allocation2 + $0x238] sm:$0xff]  ;;  %v7841_v20 = vcombine.low %v104_v6, %v108_v7  ;;  %v160_v7 = vld [vmem:[#allocation2 + $0x390] sm:$0xff] }
 0x12c   :  { %3548 = vmatprep.subr.bf16.mxu0 %v7794_v21  ;;  %3712 = vmatprep.subr.bf16.mxu1 %v7796_v22  ;;  %v7843_v21 = vcombine.low %v105_v8, %v109_v10  ;;  %v7850_v22 = vcombine.high %v112_v15, %v116_v17  ;;  %v7852_v24 = vcombine.high %v113_v18, %v117_v19  ;;  %v164_v8 = vld [vmem:[#allocation2 + $0x3b0] sm:$0xff]  ;;  %v161_v10 = vld [vmem:[#allocation2 + $0x398] sm:$0xff] }
 0x12d   :  { %3578 = vmatprep.mubr.bf16.mxu0 %v9049_v9  ;;  %3742 = vmatprep.mubr.bf16.mxu1 %v9049_v9  ;;  %v7820_v9 = vcombine.high %v81_v44, %v85_v45  ;;  %v140_v44 = vld [vmem:[#allocation2 + $0x2f0] sm:$0xff]  ;;  %v137_v45 = vld [vmem:[#allocation2 + $0x2d8] sm:$0xff] }
 0x12f   :  { %3549 = vmatpush1.bf16.msra.mxu0 %v7793_v28  ;;  %3713 = vmatpush1.bf16.msra.mxu1 %v7795_v30  ;;  %v125_v28 = vld [vmem:[#allocation2 + $0x278] sm:$0xff]  ;;  %v7849_v30 = vcombine.low %v112_v15, %v116_v17  ;;  %v168_v17 = vld [vmem:[#allocation2 + $0x3d0] sm:$0xff] }
 0x130   :  { %3550 = vmatprep.subr.bf16.mxu0 %v7802_v31  ;;  %3714 = vmatprep.subr.bf16.mxu1 %v7804_v63  ;;  %v7851_v31 = vcombine.low %v113_v18, %v117_v19  ;;  %v7858_v63 = vcombine.high %v120_v25, %v124_v26  ;;  %v7860_v59 = vcombine.high %v121_v27, %v125_v28  ;;  %v172_v18 = vld [vmem:[#allocation2 + $0x3f0] sm:$0xff]  ;;  %v169_v19 = vld [vmem:[#allocation2 + $0x3d8] sm:$0xff] }
 0x133   :  { %3551 = vmatpush1.bf16.msra.mxu0 %v7801_v36  ;;  %3715 = vmatpush1.bf16.msra.mxu1 %v7803_v37  ;;  %v133_v36 = vld [vmem:[#allocation2 + $0x2b8] sm:$0xff]  ;;  %v7857_v37 = vcombine.low %v120_v25, %v124_v26  ;;  %v176_v26 = vld [vmem:[#allocation2 + $0x410] sm:$0xff] }
 0x134   :  { %3552 = vmatprep.subr.bf16.mxu0 %v7810_v39  ;;  %3716 = vmatprep.subr.bf16.mxu1 %v7812_v40  ;;  %v7859_v39 = vcombine.low %v121_v27, %v125_v28  ;;  %v7866_v40 = vcombine.high %v128_v33, %v132_v34  ;;  %v7868_v41 = vcombine.high %v129_v35, %v133_v36  ;;  %v180_v27 = vld [vmem:[#allocation2 + $0x430] sm:$0xff]  ;;  %v177_v28 = vld [vmem:[#allocation2 + $0x418] sm:$0xff] }
 0x137   :  { %3553 = vmatpush1.bf16.msra.mxu0 %v7809_v46  ;;  %3717 = vmatpush1.bf16.msra.mxu1 %v7811_v47  ;;  %v141_v46 = vld [vmem:[#allocation2 + $0x2f8] sm:$0xff]  ;;  %v7865_v47 = vcombine.low %v128_v33, %v132_v34  ;;  %v184_v34 = vld [vmem:[#allocation2 + $0x450] sm:$0xff] }
 0x138   :  { %3554 = vmatprep.subr.bf16.mxu0 %v7818_v49  ;;  %3718 = vmatprep.subr.bf16.mxu1 %v7820_v9  ;;  %v7867_v49 = vcombine.low %v129_v35, %v133_v36  ;;  %v7874_v9 = vcombine.high %v136_v42, %v140_v44  ;;  %v7876_v50 = vcombine.high %v137_v45, %v141_v46  ;;  %v188_v35 = vld [vmem:[#allocation2 + $0x470] sm:$0xff]  ;;  %v185_v36 = vld [vmem:[#allocation2 + $0x458] sm:$0xff] }
 0x13b   :  { %3555 = vmatpush1.bf16.msra.mxu0 %v7817_v55  ;;  %3719 = vmatpush1.bf16.msra.mxu1 %v7819_v56  ;;  %v149_v55 = vld [vmem:[#allocation2 + $0x338] sm:$0xff]  ;;  %v7873_v56 = vcombine.low %v136_v42, %v140_v44  ;;  %v192_v44 = vld [vmem:[#allocation2 + $0x490] sm:$0xff] }
 0x13c   :  { %3556 = vmatprep.subr.bf16.mxu0 %v7826_v57  ;;  %3720 = vmatprep.subr.bf16.mxu1 %v7828_v60  ;;  %v7875_v57 = vcombine.low %v137_v45, %v141_v46  ;;  %v7882_v60 = vcombine.high %v144_v51, %v148_v52  ;;  %v7884_v61 = vcombine.high %v145_v54, %v149_v55  ;;  %v196_v45 = vld [vmem:[#allocation2 + $0x4b0] sm:$0xff]  ;;  %v193_v46 = vld [vmem:[#allocation2 + $0x498] sm:$0xff] }
 0x13f   :  { %3557 = vmatpush1.bf16.msra.mxu0 %v7825_v2  ;;  %3721 = vmatpush1.bf16.msra.mxu1 %v7827_v3  ;;  %v157_v2 = vld [vmem:[#allocation2 + $0x378] sm:$0xff]  ;;  %v7881_v3 = vcombine.low %v144_v51, %v148_v52  ;;  %v200_v52 = vld [vmem:[#allocation2 + $0x4d0] sm:$0xff] }
 0x140   :  { %3558 = vmatprep.subr.bf16.mxu0 %v7834_v4  ;;  %3722 = vmatprep.subr.bf16.mxu1 %v7836_v29  ;;  %v7883_v4 = vcombine.low %v145_v54, %v149_v55  ;;  %v7890_v29 = vcombine.high %v152_v62, %v156_v0  ;;  %v7892_v6 = vcombine.high %v153_v1, %v157_v2  ;;  %v204_v54 = vld [vmem:[#allocation2 + $0x4f0] sm:$0xff]  ;;  %v201_v55 = vld [vmem:[#allocation2 + $0x4d8] sm:$0xff] }
 0x143   :  { %3559 = vmatpush1.bf16.msra.mxu0 %v7833_v11  ;;  %3723 = vmatpush1.bf16.msra.mxu1 %v7835_v12  ;;  %v165_v11 = vld [vmem:[#allocation2 + $0x3b8] sm:$0xff]  ;;  %v7889_v12 = vcombine.low %v152_v62, %v156_v0  ;;  %v208_v62 = vld [vmem:[#allocation2 + $0x510] sm:$0xff] }
 0x144   :  { %3560 = vmatprep.subr.bf16.mxu0 %v7842_v13  ;;  %3724 = vmatprep.subr.bf16.mxu1 %v7844_v14  ;;  %v7891_v13 = vcombine.low %v153_v1, %v157_v2  ;;  %v7898_v14 = vcombine.high %v160_v7, %v164_v8  ;;  %v7900_v15 = vcombine.high %v161_v10, %v165_v11  ;;  %v212_v0 = vld [vmem:[#allocation2 + $0x530] sm:$0xff]  ;;  %v209_v1 = vld [vmem:[#allocation2 + $0x518] sm:$0xff] }
 0x145   :  { %v213_v2 = vld [vmem:[#allocation2 + $0x538] sm:$0xff] }
 0x147   :  { %3561 = vmatpush1.bf16.msra.mxu0 %v7841_v20  ;;  %3725 = vmatpush1.bf16.msra.mxu1 %v7843_v21  ;;  %v173_v20 = vld [vmem:[#allocation2 + $0x3f8] sm:$0xff]  ;;  %v7897_v21 = vcombine.low %v160_v7, %v164_v8  ;;  %v220_v7 = vld [vmem:[#allocation2 + $0x570] sm:$0xff] }
 0x148   :  { %3562 = vmatprep.subr.bf16.mxu0 %v7850_v22  ;;  %3726 = vmatprep.subr.bf16.mxu1 %v7852_v24  ;;  %v7899_v22 = vcombine.low %v161_v10, %v165_v11  ;;  %v7906_v24 = vcombine.high %v168_v17, %v172_v18  ;;  %v7908_v25 = vcombine.high %v169_v19, %v173_v20  ;;  %v217_v8 = vld [vmem:[#allocation2 + $0x558] sm:$0xff] }
 0x149   :  { %v221_v10 = vld [vmem:[#allocation2 + $0x578] sm:$0xff]  ;;  %v7945_v11 = vcombine.low %v208_v62, %v212_v0 }
 0x14b   :  { %3563 = vmatpush1.bf16.msra.mxu0 %v7849_v30  ;;  %3727 = vmatpush1.bf16.msra.mxu1 %v7851_v31  ;;  %v181_v30 = vld [vmem:[#allocation2 + $0x438] sm:$0xff]  ;;  %v7905_v31 = vcombine.low %v168_v17, %v172_v18  ;;  %v228_v17 = vld [vmem:[#allocation2 + $0x5b0] sm:$0xff] }
 0x14c   :  { %3564 = vmatprep.subr.bf16.mxu0 %v7858_v63  ;;  %3728 = vmatprep.subr.bf16.mxu1 %v7860_v59  ;;  %v7907_v63 = vcombine.low %v169_v19, %v173_v20  ;;  %v7914_v59 = vcombine.high %v176_v26, %v180_v27  ;;  %v7916_v33 = vcombine.high %v177_v28, %v181_v30  ;;  %v225_v18 = vld [vmem:[#allocation2 + $0x598] sm:$0xff] }
 0x14d   :  { %v229_v19 = vld [vmem:[#allocation2 + $0x5b8] sm:$0xff] }
 0x14f   :  { %3565 = vmatpush1.bf16.msra.mxu0 %v7857_v37  ;;  %3729 = vmatpush1.bf16.msra.mxu1 %v7859_v39  ;;  %v189_v37 = vld [vmem:[#allocation2 + $0x478] sm:$0xff]  ;;  %v7913_v39 = vcombine.low %v176_v26, %v180_v27  ;;  %v236_v26 = vld [vmem:[#allocation2 + $0x5f0] sm:$0xff] }
 0x150   :  { %3566 = vmatprep.subr.bf16.mxu0 %v7866_v40  ;;  %3730 = vmatprep.subr.bf16.mxu1 %v7868_v41  ;;  %v7915_v40 = vcombine.low %v177_v28, %v181_v30  ;;  %v7922_v41 = vcombine.high %v184_v34, %v188_v35  ;;  %v7924_v42 = vcombine.high %v185_v36, %v189_v37  ;;  %v233_v27 = vld [vmem:[#allocation2 + $0x5d8] sm:$0xff] }
 0x151   :  { %v237_v28 = vld [vmem:[#allocation2 + $0x5f8] sm:$0xff] }
 0x153   :  { %3567 = vmatpush1.bf16.msra.mxu0 %v7865_v47  ;;  %3731 = vmatpush1.bf16.msra.mxu1 %v7867_v49  ;;  %v197_v47 = vld [vmem:[#allocation2 + $0x4b8] sm:$0xff]  ;;  %v7921_v49 = vcombine.low %v184_v34, %v188_v35  ;;  %v244_v34 = vld [vmem:[#allocation2 + $0x630] sm:$0xff] }
 0x154   :  { %3568 = vmatprep.subr.bf16.mxu0 %v7874_v9  ;;  %3732 = vmatprep.subr.bf16.mxu1 %v7876_v50  ;;  %v7923_v9 = vcombine.low %v185_v36, %v189_v37  ;;  %v7930_v50 = vcombine.high %v192_v44, %v196_v45  ;;  %v7932_v51 = vcombine.high %v193_v46, %v197_v47  ;;  %v241_v35 = vld [vmem:[#allocation2 + $0x618] sm:$0xff] }
 0x155   :  { %v245_v36 = vld [vmem:[#allocation2 + $0x638] sm:$0xff] }
 0x157   :  { %3569 = vmatpush1.bf16.msra.mxu0 %v7873_v56  ;;  %3733 = vmatpush1.bf16.msra.mxu1 %v7875_v57  ;;  %v205_v56 = vld [vmem:[#allocation2 + $0x4f8] sm:$0xff]  ;;  %v7929_v57 = vcombine.low %v192_v44, %v196_v45  ;;  %v252_v44 = vld [vmem:[#allocation2 + $0x670] sm:$0xff] }
 0x158   :  { %3570 = vmatprep.subr.bf16.mxu0 %v7882_v60  ;;  %3734 = vmatprep.subr.bf16.mxu1 %v7884_v61  ;;  %v7938_v60 = vcombine.high %v200_v52, %v204_v54  ;;  %v7940_v61 = vcombine.high %v201_v55, %v205_v56  ;;  %v249_v45 = vld [vmem:[#allocation2 + $0x658] sm:$0xff] }
 0x15b   :  { %3571 = vmatpush1.bf16.msra.mxu0 %v7881_v3  ;;  %3735 = vmatpush1.bf16.msra.mxu1 %v7883_v4  ;;  %v7937_v3 = vcombine.low %v200_v52, %v204_v54  ;;  %v7939_v4 = vcombine.low %v201_v55, %v205_v56  ;;  %v260_v52 = vld [vmem:[#allocation2 + $0x6b0] sm:$0xff]  ;;  %v257_v54 = vld [vmem:[#allocation2 + $0x698] sm:$0xff] }
 0x15c   :  { %3572 = vmatprep.subr.bf16.mxu0 %v7890_v29  ;;  %3736 = vmatprep.subr.bf16.mxu1 %v7892_v6  ;;  %v7946_v29 = vcombine.high %v208_v62, %v212_v0  ;;  %v216_v6 = vld [vmem:[#allocation2 + $0x550] sm:$0xff]  ;;  %v261_v55 = vld [vmem:[#allocation2 + $0x6b8] sm:$0xff] }
 0x15d   :  { %v7953_v20 = vcombine.low %v216_v6, %v220_v7  ;;  %v268_v62 = vld [vmem:[#allocation2 + $0x6f0] sm:$0xff]  ;;  %v265_v0 = vld [vmem:[#allocation2 + $0x6d8] sm:$0xff] }
 0x15f   :  { %3573 = vmatpush1.bf16.msra.mxu0 %v7889_v12  ;;  %3737 = vmatpush1.bf16.msra.mxu1 %v7891_v13  ;;  %v7947_v12 = vcombine.low %v209_v1, %v213_v2  ;;  %v7954_v13 = vcombine.high %v216_v6, %v220_v7  ;;  %v276_v6 = vld [vmem:[#allocation2 + $0x730] sm:$0xff]  ;;  %v273_v7 = vld [vmem:[#allocation2 + $0x718] sm:$0xff] }
 0x160   :  { %3574 = vmatprep.subr.bf16.mxu0 %v7898_v14  ;;  %3738 = vmatprep.subr.bf16.mxu1 %v7900_v15  ;;  %v7956_v14 = vcombine.high %v217_v8, %v221_v10  ;;  %v224_v15 = vld [vmem:[#allocation2 + $0x590] sm:$0xff] }
 0x161   :  { %v7961_v30 = vcombine.low %v224_v15, %v228_v17 }
 0x163   :  { %3575 = vmatpush1.bf16.msra.mxu0 %v7897_v21  ;;  %3739 = vmatpush1.bf16.msra.mxu1 %v7899_v22  ;;  %v7955_v21 = vcombine.low %v217_v8, %v221_v10  ;;  %v7962_v22 = vcombine.high %v224_v15, %v228_v17  ;;  %v277_v8 = vld [vmem:[#allocation2 + $0x738] sm:$0xff]  ;;  %v284_v15 = vld [vmem:[#allocation2 + $0x770] sm:$0xff] }
 0x164   :  { %3576 = vmatprep.subr.bf16.mxu0 %v7906_v24  ;;  %3740 = vmatprep.subr.bf16.mxu1 %v7908_v25  ;;  %v7964_v24 = vcombine.high %v225_v18, %v229_v19  ;;  %v232_v25 = vld [vmem:[#allocation2 + $0x5d0] sm:$0xff]  ;;  %v281_v17 = vld [vmem:[#allocation2 + $0x758] sm:$0xff] }
 0x165   :  { %v7969_v37 = vcombine.low %v232_v25, %v236_v26 }
 0x167   :  { %3577 = vmatpush1.bf16.msra.mxu0 %v7905_v31  ;;  %3741 = vmatpush1.bf16.msra.mxu1 %v7907_v63  ;;  %v7963_v31 = vcombine.low %v225_v18, %v229_v19  ;;  %v7970_v63 = vcombine.high %v232_v25, %v236_v26  ;;  %v285_v18 = vld [vmem:[#allocation2 + $0x778] sm:$0xff]  ;;  %v292_v25 = vld [vmem:[#allocation2 + $0x7b0] sm:$0xff] }
 0x168   :  { %3587 = vmatprep.subr.bf16.mxu0 %v7914_v59  ;;  %3751 = vmatprep.subr.bf16.mxu1 %v7916_v33  ;;  %v7972_v59 = vcombine.high %v233_v27, %v237_v28  ;;  %v240_v33 = vld [vmem:[#allocation2 + $0x610] sm:$0xff]  ;;  %v289_v26 = vld [vmem:[#allocation2 + $0x798] sm:$0xff] }
 0x16a   :  { %3579 = vmatmul.mubr.bf16.vlgmr.msra.gmra.mrb[4].mxu0 %v9055_v23  ;;  %3743 = vmatmul.mubr.bf16.vlgmr.msra.gmra.mrb[4].mxu1 %v9055_v23  ;;  %v7931_v23 = vcombine.low %v193_v46, %v197_v47  ;;  %v253_v46 = vld [vmem:[#allocation2 + $0x678] sm:$0xff]  ;;  %v7977_v47 = vcombine.low %v240_v33, %v244_v34 }
 0x16b   :  { %3588 = vmatpush1.bf16.msra.mxu0 %v7913_v39  ;;  %3752 = vmatpush1.bf16.msra.mxu1 %v7915_v40  ;;  %v7971_v39 = vcombine.low %v233_v27, %v237_v28  ;;  %v7978_v40 = vcombine.high %v240_v33, %v244_v34  ;;  %v293_v27 = vld [vmem:[#allocation2 + $0x7b8] sm:$0xff]  ;;  %v300_v33 = vld [vmem:[#allocation2 + $0x7f0] sm:$0xff] }
 0x16c   :  { %3589 = vmatprep.subr.bf16.mxu0 %v7922_v41  ;;  %3753 = vmatprep.subr.bf16.mxu1 %v7924_v42  ;;  %v7980_v41 = vcombine.high %v241_v35, %v245_v36  ;;  %v248_v42 = vld [vmem:[#allocation2 + $0x650] sm:$0xff]  ;;  %v297_v34 = vld [vmem:[#allocation2 + $0x7d8] sm:$0xff] }
 0x16d   :  { %3619 = vmatprep.mubr.bf16.mxu0 %v9059_v32  ;;  %3783 = vmatprep.mubr.bf16.mxu1 %v9059_v32  ;;  %v7948_v32 = vcombine.high %v209_v1, %v213_v2  ;;  %v7985_v56 = vcombine.low %v248_v42, %v252_v44  ;;  %v269_v1 = vld [vmem:[#allocation2 + $0x6f8] sm:$0xff] }
 0x16f   :  { %3590 = vmatpush1.bf16.msra.mxu0 %v7921_v49  ;;  %3754 = vmatpush1.bf16.msra.mxu1 %v7923_v9  ;;  %v7979_v49 = vcombine.low %v241_v35, %v245_v36  ;;  %v7986_v9 = vcombine.high %v248_v42, %v252_v44  ;;  %v301_v35 = vld [vmem:[#allocation2 + $0x7f8] sm:$0xff]  ;;  %v308_v42 = vld [vmem:[#allocation2 + $0x830] sm:$0xff] }
 0x170   :  { %3591 = vmatprep.subr.bf16.mxu0 %v7930_v50  ;;  %3755 = vmatprep.subr.bf16.mxu1 %v7932_v51  ;;  %v7988_v50 = vcombine.high %v249_v45, %v253_v46  ;;  %v256_v51 = vld [vmem:[#allocation2 + $0x690] sm:$0xff]  ;;  %v305_v44 = vld [vmem:[#allocation2 + $0x818] sm:$0xff] }
 0x171   :  { %v7993_v2 = vcombine.low %v256_v51, %v260_v52 }
 0x173   :  { %3592 = vmatpush1.bf16.msra.mxu0 %v7929_v57  ;;  %3756 = vmatpush1.bf16.msra.mxu1 %v7931_v23  ;;  %v7987_v57 = vcombine.low %v249_v45, %v253_v46  ;;  %v7994_v23 = vcombine.high %v256_v51, %v260_v52  ;;  %v309_v45 = vld [vmem:[#allocation2 + $0x838] sm:$0xff]  ;;  %v316_v51 = vld [vmem:[#allocation2 + $0x870] sm:$0xff] }
 0x174   :  { %3593 = vmatprep.subr.bf16.mxu0 %v7938_v60  ;;  %3757 = vmatprep.subr.bf16.mxu1 %v7940_v61  ;;  %v7996_v60 = vcombine.high %v257_v54, %v261_v55  ;;  %v264_v61 = vld [vmem:[#allocation2 + $0x6d0] sm:$0xff]  ;;  %v313_v52 = vld [vmem:[#allocation2 + $0x858] sm:$0xff] }
 0x175   :  { %v8001_v10 = vcombine.low %v264_v61, %v268_v62 }
 0x177   :  { %3594 = vmatpush1.bf16.msra.mxu0 %v7937_v3  ;;  %3758 = vmatpush1.bf16.msra.mxu1 %v7939_v4  ;;  %v7995_v3 = vcombine.low %v257_v54, %v261_v55  ;;  %v8002_v4 = vcombine.high %v264_v61, %v268_v62  ;;  %v317_v54 = vld [vmem:[#allocation2 + $0x878] sm:$0xff]  ;;  %v324_v61 = vld [vmem:[#allocation2 + $0x8b0] sm:$0xff] }
 0x178   :  { %3595 = vmatprep.subr.bf16.mxu0 %v7946_v29  ;;  %3759 = vmatprep.subr.bf16.mxu1 %v7948_v32  ;;  %v8004_v29 = vcombine.high %v265_v0, %v269_v1  ;;  %v272_v32 = vld [vmem:[#allocation2 + $0x710] sm:$0xff]  ;;  %v321_v62 = vld [vmem:[#allocation2 + $0x898] sm:$0xff] }
 0x179   :  { %v8009_v19 = vcombine.low %v272_v32, %v276_v6 }
 0x17b   :  { %3596 = vmatpush1.bf16.msra.mxu0 %v7945_v11  ;;  %3760 = vmatpush1.bf16.msra.mxu1 %v7947_v12  ;;  %v8003_v11 = vcombine.low %v265_v0, %v269_v1  ;;  %v8010_v12 = vcombine.high %v272_v32, %v276_v6  ;;  %v325_v0 = vld [vmem:[#allocation2 + $0x8b8] sm:$0xff]  ;;  %v332_v32 = vld [vmem:[#allocation2 + $0x8f0] sm:$0xff] }
 0x17c   :  { %3597 = vmatprep.subr.bf16.mxu0 %v7954_v13  ;;  %3761 = vmatprep.subr.bf16.mxu1 %v7956_v14  ;;  %v8012_v13 = vcombine.high %v273_v7, %v277_v8  ;;  %v280_v14 = vld [vmem:[#allocation2 + $0x750] sm:$0xff]  ;;  %v329_v6 = vld [vmem:[#allocation2 + $0x8d8] sm:$0xff] }
 0x17d   :  { %v8017_v28 = vcombine.low %v280_v14, %v284_v15 }
 0x17f   :  { %3598 = vmatpush1.bf16.msra.mxu0 %v7953_v20  ;;  %3762 = vmatpush1.bf16.msra.mxu1 %v7955_v21  ;;  %v8011_v20 = vcombine.low %v273_v7, %v277_v8  ;;  %v8018_v21 = vcombine.high %v280_v14, %v284_v15  ;;  %v333_v7 = vld [vmem:[#allocation2 + $0x8f8] sm:$0xff] }
 0x180   :  { %3599 = vmatprep.subr.bf16.mxu0 %v7962_v22  ;;  %3763 = vmatprep.subr.bf16.mxu1 %v7964_v24  ;;  %v8020_v22 = vcombine.high %v281_v17, %v285_v18  ;;  %v288_v24 = vld [vmem:[#allocation2 + $0x790] sm:$0xff]  ;;  %v337_v14 = vld [vmem:[#allocation2 + $0x918] sm:$0xff] }
 0x181   :  { %v8025_v36 = vcombine.low %v288_v24, %v292_v25  ;;  %v341_v15 = vld [vmem:[#allocation2 + $0x938] sm:$0xff] }
 0x183   :  { %3600 = vmatpush1.bf16.msra.mxu0 %v7961_v30  ;;  %3764 = vmatpush1.bf16.msra.mxu1 %v7963_v31  ;;  %v8019_v30 = vcombine.low %v281_v17, %v285_v18  ;;  %v8026_v31 = vcombine.high %v288_v24, %v292_v25  ;;  %v8067_v18 = vcombine.low %v329_v6, %v333_v7  ;;  %v349_v24 = vld [vmem:[#allocation2 + $0x978] sm:$0xff] }
 0x184   :  { %3601 = vmatprep.subr.bf16.mxu0 %v7970_v63  ;;  %3765 = vmatprep.subr.bf16.mxu1 %v7972_v59  ;;  %v8028_v63 = vcombine.high %v289_v26, %v293_v27  ;;  %v296_v59 = vld [vmem:[#allocation2 + $0x7d0] sm:$0xff] }
 0x185   :  { %v8033_v46 = vcombine.low %v296_v59, %v300_v33 }
 0x187   :  { %3602 = vmatpush1.bf16.msra.mxu0 %v7969_v37  ;;  %3766 = vmatpush1.bf16.msra.mxu1 %v7971_v39  ;;  %v8027_v37 = vcombine.low %v289_v26, %v293_v27  ;;  %v8034_v39 = vcombine.high %v296_v59, %v300_v33  ;;  %v8075_v26 = vcombine.low %v337_v14, %v341_v15  ;;  %v357_v59 = vld [vmem:[#allocation2 + $0x9b8] sm:$0xff] }
 0x188   :  { %3603 = vmatprep.subr.bf16.mxu0 %v7978_v40  ;;  %3767 = vmatprep.subr.bf16.mxu1 %v7980_v41  ;;  %v8036_v40 = vcombine.high %v297_v34, %v301_v35  ;;  %v304_v41 = vld [vmem:[#allocation2 + $0x810] sm:$0xff] }
 0x189   :  { %v8041_v55 = vcombine.low %v304_v41, %v308_v42 }
 0x18b   :  { %3604 = vmatpush1.bf16.msra.mxu0 %v7977_v47  ;;  %3768 = vmatpush1.bf16.msra.mxu1 %v7979_v49  ;;  %v8035_v47 = vcombine.low %v297_v34, %v301_v35  ;;  %v8042_v49 = vcombine.high %v304_v41, %v308_v42  ;;  %v365_v41 = vld [vmem:[#allocation2 + $0x9f8] sm:$0xff] }
 0x18c   :  { %3605 = vmatprep.subr.bf16.mxu0 %v7986_v9  ;;  %3769 = vmatprep.subr.bf16.mxu1 %v7988_v50  ;;  %v8044_v9 = vcombine.high %v305_v44, %v309_v45  ;;  %v312_v50 = vld [vmem:[#allocation2 + $0x850] sm:$0xff] }
 0x18d   :  { %v8049_v1 = vcombine.low %v312_v50, %v316_v51 }
 0x18f   :  { %3606 = vmatpush1.bf16.msra.mxu0 %v7985_v56  ;;  %3770 = vmatpush1.bf16.msra.mxu1 %v7987_v57  ;;  %v8043_v56 = vcombine.low %v305_v44, %v309_v45  ;;  %v8050_v57 = vcombine.high %v312_v50, %v316_v51  ;;  %v373_v50 = vld [vmem:[#allocation2 + $0xa38] sm:$0xff] }
 0x190   :  { %3607 = vmatprep.subr.bf16.mxu0 %v7994_v23  ;;  %3771 = vmatprep.subr.bf16.mxu1 %v7996_v60  ;;  %v8052_v23 = vcombine.high %v313_v52, %v317_v54  ;;  %v320_v60 = vld [vmem:[#allocation2 + $0x890] sm:$0xff] }
 0x191   :  { %v8057_v8 = vcombine.low %v320_v60, %v324_v61 }
 0x193   :  { %3608 = vmatpush1.bf16.msra.mxu0 %v7993_v2  ;;  %3772 = vmatpush1.bf16.msra.mxu1 %v7995_v3  ;;  %v8051_v2 = vcombine.low %v313_v52, %v317_v54  ;;  %v8058_v3 = vcombine.high %v320_v60, %v324_v61  ;;  %v381_v60 = vld [vmem:[#allocation2 + $0xa78] sm:$0xff] }
 0x194   :  { %3609 = vmatprep.subr.bf16.mxu0 %v8002_v4  ;;  %3773 = vmatprep.subr.bf16.mxu1 %v8004_v29  ;;  %v8060_v4 = vcombine.high %v321_v62, %v325_v0  ;;  %v328_v29 = vld [vmem:[#allocation2 + $0x8d0] sm:$0xff] }
 0x195   :  { %v8065_v17 = vcombine.low %v328_v29, %v332_v32 }
 0x197   :  { %3610 = vmatpush1.bf16.msra.mxu0 %v8001_v10  ;;  %3774 = vmatpush1.bf16.msra.mxu1 %v8003_v11  ;;  %v8066_v10 = vcombine.high %v328_v29, %v332_v32  ;;  %v8068_v11 = vcombine.high %v329_v6, %v333_v7  ;;  %v389_v29 = vld [vmem:[#allocation2 + $0xab8] sm:$0xff] }
 0x198   :  { %3611 = vmatprep.subr.bf16.mxu0 %v8010_v12  ;;  %3775 = vmatprep.subr.bf16.mxu1 %v8012_v13  ;;  %v336_v12 = vld [vmem:[#allocation2 + $0x910] sm:$0xff] }
 0x199   :  { %v340_v13 = vld [vmem:[#allocation2 + $0x930] sm:$0xff] }
 0x19a   :  { %v8073_v25 = vcombine.low %v336_v12, %v340_v13 }
 0x19b   :  { %3612 = vmatpush1.bf16.msra.mxu0 %v8009_v19  ;;  %3776 = vmatpush1.bf16.msra.mxu1 %v8011_v20  ;;  %v8074_v19 = vcombine.high %v336_v12, %v340_v13  ;;  %v344_v20 = vld [vmem:[#allocation2 + $0x950] sm:$0xff]  ;;  %v397_v12 = vld [vmem:[#allocation2 + $0xaf8] sm:$0xff] }
 0x19c   :  { %3613 = vmatprep.subr.bf16.mxu0 %v8018_v21  ;;  %3777 = vmatprep.subr.bf16.mxu1 %v8020_v22  ;;  %v348_v21 = vld [vmem:[#allocation2 + $0x970] sm:$0xff]  ;;  %v345_v22 = vld [vmem:[#allocation2 + $0x958] sm:$0xff] }
 0x19d   :  { %v8082_v27 = vcombine.high %v344_v20, %v348_v21  ;;  %v8081_v33 = vcombine.low %v344_v20, %v348_v21  ;;  %v8083_v34 = vcombine.low %v345_v22, %v349_v24  ;;  %v405_v20 = vld [vmem:[#allocation2 + $0xb38] sm:$0xff] }
 0x19f   :  { %3614 = vmatpush1.bf16.msra.mxu0 %v8017_v28  ;;  %3778 = vmatpush1.bf16.msra.mxu1 %v8019_v30  ;;  %v8084_v28 = vcombine.high %v345_v22, %v349_v24  ;;  %v352_v30 = vld [vmem:[#allocation2 + $0x990] sm:$0xff] }
 0x1a0   :  { %3615 = vmatprep.subr.bf16.mxu0 %v8026_v31  ;;  %3779 = vmatprep.subr.bf16.mxu1 %v8028_v63  ;;  %v356_v31 = vld [vmem:[#allocation2 + $0x9b0] sm:$0xff]  ;;  %v353_v63 = vld [vmem:[#allocation2 + $0x998] sm:$0xff] }
 0x1a1   :  { %v8090_v35 = vcombine.high %v352_v30, %v356_v31  ;;  %v8089_v42 = vcombine.low %v352_v30, %v356_v31  ;;  %v8091_v44 = vcombine.low %v353_v63, %v357_v59  ;;  %v413_v30 = vld [vmem:[#allocation2 + $0xb78] sm:$0xff] }
 0x1a3   :  { %3616 = vmatpush1.bf16.msra.mxu0 %v8025_v36  ;;  %3780 = vmatpush1.bf16.msra.mxu1 %v8027_v37  ;;  %v8092_v36 = vcombine.high %v353_v63, %v357_v59  ;;  %v360_v37 = vld [vmem:[#allocation2 + $0x9d0] sm:$0xff] }
 0x1a4   :  { %3617 = vmatprep.subr.bf16.mxu0 %v8034_v39  ;;  %3781 = vmatprep.subr.bf16.mxu1 %v8036_v40  ;;  %v364_v39 = vld [vmem:[#allocation2 + $0x9f0] sm:$0xff]  ;;  %v361_v40 = vld [vmem:[#allocation2 + $0x9d8] sm:$0xff] }
 0x1a5   :  { %v8098_v45 = vcombine.high %v360_v37, %v364_v39  ;;  %v8097_v51 = vcombine.low %v360_v37, %v364_v39  ;;  %v8099_v52 = vcombine.low %v361_v40, %v365_v41  ;;  %v421_v37 = vld [vmem:[#allocation2 + $0xbb8] sm:$0xff] }
 0x1a7   :  { %3618 = vmatpush1.bf16.msra.mxu0 %v8033_v46  ;;  %3782 = vmatpush1.bf16.msra.mxu1 %v8035_v47  ;;  %v8100_v46 = vcombine.high %v361_v40, %v365_v41  ;;  %v368_v47 = vld [vmem:[#allocation2 + $0xa10] sm:$0xff] }
 0x1a8   :  { %3628 = vmatprep.subr.bf16.mxu0 %v8042_v49  ;;  %3792 = vmatprep.subr.bf16.mxu1 %v8044_v9  ;;  %v372_v49 = vld [vmem:[#allocation2 + $0xa30] sm:$0xff]  ;;  %v369_v9 = vld [vmem:[#allocation2 + $0xa18] sm:$0xff] }
 0x1a9   :  { %v8106_v54 = vcombine.high %v368_v47, %v372_v49  ;;  %v8105_v61 = vcombine.low %v368_v47, %v372_v49  ;;  %v429_v47 = vld [vmem:[#allocation2 + $0xbf8] sm:$0xff] }
 0x1aa   :  { %3620 = vmatmul.mubr.bf16.vlgmr.msra.gmra.mrb[4].mxu0 %v9074_v38  ;;  %3784 = vmatmul.mubr.bf16.vlgmr.msra.gmra.mrb[4].mxu1 %v9074_v38  ;;  %v8059_v38 = vcombine.low %v321_v62, %v325_v0  ;;  %v8107_v62 = vcombine.low %v369_v9, %v373_v50 }
 0x1ab   :  { %3629 = vmatpush1.bf16.msra.mxu0 %v8041_v55  ;;  %3793 = vmatpush1.bf16.msra.mxu1 %v8043_v56  ;;  %v8108_v55 = vcombine.high %v369_v9, %v373_v50  ;;  %v376_v56 = vld [vmem:[#allocation2 + $0xa50] sm:$0xff] }
 0x1ac   :  { %3630 = vmatprep.subr.bf16.mxu0 %v8050_v57  ;;  %3794 = vmatprep.subr.bf16.mxu1 %v8052_v23  ;;  %v380_v57 = vld [vmem:[#allocation2 + $0xa70] sm:$0xff]  ;;  %v377_v23 = vld [vmem:[#allocation2 + $0xa58] sm:$0xff] }
 0x1ad   :  { %3660 = vmatprep.mubr.bf16.mxu0 %v9077_v48  ;;  %3824 = vmatprep.mubr.bf16.mxu1 %v9077_v48  ;;  %v8076_v48 = vcombine.high %v337_v14, %v341_v15  ;;  %v8114_v0 = vcombine.high %v376_v56, %v380_v57  ;;  %v8113_v32 = vcombine.low %v376_v56, %v380_v57  ;;  %v437_v56 = vld [vmem:[#allocation2 + $0xc38] sm:$0xff] }
 0x1ae   :  { %v8115_v6 = vcombine.low %v377_v23, %v381_v60 }
 0x1af   :  { %3631 = vmatpush1.bf16.msra.mxu0 %v8049_v1  ;;  %3795 = vmatpush1.bf16.msra.mxu1 %v8051_v2  ;;  %v8116_v1 = vcombine.high %v377_v23, %v381_v60  ;;  %v384_v2 = vld [vmem:[#allocation2 + $0xa90] sm:$0xff] }
 0x1b0   :  { %3632 = vmatprep.subr.bf16.mxu0 %v8058_v3  ;;  %3796 = vmatprep.subr.bf16.mxu1 %v8060_v4  ;;  %v388_v3 = vld [vmem:[#allocation2 + $0xab0] sm:$0xff]  ;;  %v385_v4 = vld [vmem:[#allocation2 + $0xa98] sm:$0xff] }
 0x1b1   :  { %v8122_v7 = vcombine.high %v384_v2, %v388_v3  ;;  %v8121_v13 = vcombine.low %v384_v2, %v388_v3  ;;  %v8123_v14 = vcombine.low %v385_v4, %v389_v29  ;;  %v445_v2 = vld [vmem:[#allocation2 + $0xc78] sm:$0xff] }
 0x1b3   :  { %3633 = vmatpush1.bf16.msra.mxu0 %v8057_v8  ;;  %3797 = vmatpush1.bf16.msra.mxu1 %v8059_v38  ;;  %v8124_v8 = vcombine.high %v385_v4, %v389_v29  ;;  %v392_v38 = vld [vmem:[#allocation2 + $0xad0] sm:$0xff] }
 0x1b4   :  { %3634 = vmatprep.subr.bf16.mxu0 %v8066_v10  ;;  %3798 = vmatprep.subr.bf16.mxu1 %v8068_v11  ;;  %v396_v10 = vld [vmem:[#allocation2 + $0xaf0] sm:$0xff]  ;;  %v393_v11 = vld [vmem:[#allocation2 + $0xad8] sm:$0xff] }
 0x1b5   :  { %v8130_v15 = vcombine.high %v392_v38, %v396_v10  ;;  %v8129_v21 = vcombine.low %v392_v38, %v396_v10  ;;  %v8131_v22 = vcombine.low %v393_v11, %v397_v12  ;;  %v453_v38 = vld [vmem:[#allocation2 + $0xcb8] sm:$0xff] }
 0x1b7   :  { %3635 = vmatpush1.bf16.msra.mxu0 %v8065_v17  ;;  %3799 = vmatpush1.bf16.msra.mxu1 %v8067_v18  ;;  %v8132_v17 = vcombine.high %v393_v11, %v397_v12  ;;  %v400_v18 = vld [vmem:[#allocation2 + $0xb10] sm:$0xff] }
 0x1b8   :  { %3636 = vmatprep.subr.bf16.mxu0 %v8074_v19  ;;  %3800 = vmatprep.subr.bf16.mxu1 %v8076_v48  ;;  %v404_v19 = vld [vmem:[#allocation2 + $0xb30] sm:$0xff]  ;;  %v401_v48 = vld [vmem:[#allocation2 + $0xb18] sm:$0xff] }
 0x1b9   :  { %v8138_v24 = vcombine.high %v400_v18, %v404_v19  ;;  %v8137_v31 = vcombine.low %v400_v18, %v404_v19  ;;  %v8139_v63 = vcombine.low %v401_v48, %v405_v20  ;;  %v461_v18 = vld [vmem:[#allocation2 + $0xcf8] sm:$0xff] }
 0x1bb   :  { %3637 = vmatpush1.bf16.msra.mxu0 %v8073_v25  ;;  %3801 = vmatpush1.bf16.msra.mxu1 %v8075_v26  ;;  %v8140_v25 = vcombine.high %v401_v48, %v405_v20  ;;  %v408_v26 = vld [vmem:[#allocation2 + $0xb50] sm:$0xff] }
 0x1bc   :  { %3638 = vmatprep.subr.bf16.mxu0 %v8082_v27  ;;  %3802 = vmatprep.subr.bf16.mxu1 %v8084_v28  ;;  %v412_v27 = vld [vmem:[#allocation2 + $0xb70] sm:$0xff]  ;;  %v409_v28 = vld [vmem:[#allocation2 + $0xb58] sm:$0xff] }
 0x1bd   :  { %v8146_v59 = vcombine.high %v408_v26, %v412_v27  ;;  %v8145_v39 = vcombine.low %v408_v26, %v412_v27  ;;  %v8147_v40 = vcombine.low %v409_v28, %v413_v30 }
 0x1bf   :  { %3639 = vmatpush1.bf16.msra.mxu0 %v8081_v33  ;;  %3803 = vmatpush1.bf16.msra.mxu1 %v8083_v34  ;;  %v8148_v33 = vcombine.high %v409_v28, %v413_v30  ;;  %v416_v34 = vld [vmem:[#allocation2 + $0xb90] sm:$0xff] }
 0x1c0   :  { %3640 = vmatprep.subr.bf16.mxu0 %v8090_v35  ;;  %3804 = vmatprep.subr.bf16.mxu1 %v8092_v36  ;;  %v420_v35 = vld [vmem:[#allocation2 + $0xbb0] sm:$0xff]  ;;  %v417_v36 = vld [vmem:[#allocation2 + $0xb98] sm:$0xff] }
 0x1c1   :  { %v8154_v41 = vcombine.high %v416_v34, %v420_v35  ;;  %v8153_v49 = vcombine.low %v416_v34, %v420_v35  ;;  %v8155_v9 = vcombine.low %v417_v36, %v421_v37  ;;  %v472_v30 = vld [vmem:[#allocation2 + $0xd50] sm:$0xff] }
 0x1c3   :  { %3641 = vmatpush1.bf16.msra.mxu0 %v8089_v42  ;;  %3805 = vmatpush1.bf16.msra.mxu1 %v8091_v44  ;;  %v8156_v42 = vcombine.high %v417_v36, %v421_v37  ;;  %v424_v44 = vld [vmem:[#allocation2 + $0xbd0] sm:$0xff] }
 0x1c4   :  { %3642 = vmatprep.subr.bf16.mxu0 %v8098_v45  ;;  %3806 = vmatprep.subr.bf16.mxu1 %v8100_v46  ;;  %v428_v45 = vld [vmem:[#allocation2 + $0xbf0] sm:$0xff]  ;;  %v425_v46 = vld [vmem:[#allocation2 + $0xbd8] sm:$0xff] }
 0x1c5   :  { %v8162_v50 = vcombine.high %v424_v44, %v428_v45  ;;  %v8161_v57 = vcombine.low %v424_v44, %v428_v45  ;;  %v8163_v23 = vcombine.low %v425_v46, %v429_v47  ;;  %v480_v37 = vld [vmem:[#allocation2 + $0xd90] sm:$0xff] }
 0x1c7   :  { %3643 = vmatpush1.bf16.msra.mxu0 %v8097_v51  ;;  %3807 = vmatpush1.bf16.msra.mxu1 %v8099_v52  ;;  %v8164_v51 = vcombine.high %v425_v46, %v429_v47  ;;  %v432_v52 = vld [vmem:[#allocation2 + $0xc10] sm:$0xff] }
 0x1c8   :  { %3644 = vmatprep.subr.bf16.mxu0 %v8106_v54  ;;  %3808 = vmatprep.subr.bf16.mxu1 %v8108_v55  ;;  %v436_v54 = vld [vmem:[#allocation2 + $0xc30] sm:$0xff]  ;;  %v433_v55 = vld [vmem:[#allocation2 + $0xc18] sm:$0xff] }
 0x1c9   :  { %v8170_v60 = vcombine.high %v432_v52, %v436_v54  ;;  %v8169_v3 = vcombine.low %v432_v52, %v436_v54  ;;  %v8171_v4 = vcombine.low %v433_v55, %v437_v56  ;;  %v489_v52 = vld [vmem:[#allocation2 + $0xdd8] sm:$0xff] }
 0x1ca   :  { %v493_v54 = vld [vmem:[#allocation2 + $0xdf8] sm:$0xff] }
 0x1cb   :  { %3645 = vmatpush1.bf16.msra.mxu0 %v8105_v61  ;;  %3809 = vmatpush1.bf16.msra.mxu1 %v8107_v62  ;;  %v8172_v61 = vcombine.high %v433_v55, %v437_v56  ;;  %v440_v62 = vld [vmem:[#allocation2 + $0xc50] sm:$0xff] }
 0x1cc   :  { %3646 = vmatprep.subr.bf16.mxu0 %v8114_v0  ;;  %3810 = vmatprep.subr.bf16.mxu1 %v8116_v1  ;;  %v444_v0 = vld [vmem:[#allocation2 + $0xc70] sm:$0xff]  ;;  %v441_v1 = vld [vmem:[#allocation2 + $0xc58] sm:$0xff] }
 0x1cd   :  { %v8178_v29 = vcombine.high %v440_v62, %v444_v0  ;;  %v8177_v10 = vcombine.low %v440_v62, %v444_v0  ;;  %v8179_v11 = vcombine.low %v441_v1, %v445_v2 }
 0x1cf   :  { %3647 = vmatpush1.bf16.msra.mxu0 %v8113_v32  ;;  %3811 = vmatpush1.bf16.msra.mxu1 %v8115_v6  ;;  %v8180_v32 = vcombine.high %v441_v1, %v445_v2  ;;  %v448_v6 = vld [vmem:[#allocation2 + $0xc90] sm:$0xff]  ;;  %v8228_v1 = vcombine.high %v489_v52, %v493_v54 }
 0x1d0   :  { %3648 = vmatprep.subr.bf16.mxu0 %v8122_v7  ;;  %3812 = vmatprep.subr.bf16.mxu1 %v8124_v8  ;;  %v452_v7 = vld [vmem:[#allocation2 + $0xcb0] sm:$0xff]  ;;  %v449_v8 = vld [vmem:[#allocation2 + $0xc98] sm:$0xff] }
 0x1d1   :  { %v8186_v12 = vcombine.high %v448_v6, %v452_v7  ;;  %v8185_v19 = vcombine.low %v448_v6, %v452_v7  ;;  %v496_v2 = vld [vmem:[#allocation2 + $0xe10] sm:$0xff]  ;;  %v8227_v6 = vcombine.low %v489_v52, %v493_v54 }
 0x1d2   :  { %v544_v54 = vld [vmem:[#allocation2 + $0xf90] sm:$0xff] }
 0x1d3   :  { %3649 = vmatpush1.bf16.msra.mxu0 %v8121_v13  ;;  %3813 = vmatpush1.bf16.msra.mxu1 %v8123_v14  ;;  %v8188_v13 = vcombine.high %v449_v8, %v453_v38  ;;  %v456_v14 = vld [vmem:[#allocation2 + $0xcd0] sm:$0xff] }
 0x1d4   :  { %3650 = vmatprep.subr.bf16.mxu0 %v8130_v15  ;;  %3814 = vmatprep.subr.bf16.mxu1 %v8132_v17  ;;  %v460_v15 = vld [vmem:[#allocation2 + $0xcf0] sm:$0xff]  ;;  %v457_v17 = vld [vmem:[#allocation2 + $0xcd8] sm:$0xff] }
 0x1d5   :  { %v8194_v48 = vcombine.high %v456_v14, %v460_v15  ;;  %v8196_v20 = vcombine.high %v457_v17, %v461_v18  ;;  %v8193_v26 = vcombine.low %v456_v14, %v460_v15  ;;  %v8195_v27 = vcombine.low %v457_v17, %v461_v18  ;;  %v512_v18 = vld [vmem:[#allocation2 + $0xe90] sm:$0xff] }
 0x1d7   :  { %3651 = vmatpush1.bf16.msra.mxu0 %v8129_v21  ;;  %3815 = vmatpush1.bf16.msra.mxu1 %v8131_v22  ;;  %v464_v21 = vld [vmem:[#allocation2 + $0xd10] sm:$0xff] }
 0x1d8   :  { %3652 = vmatprep.subr.bf16.mxu0 %v8138_v24  ;;  %3816 = vmatprep.subr.bf16.mxu1 %v8140_v25  ;;  %v468_v22 = vld [vmem:[#allocation2 + $0xd30] sm:$0xff]  ;;  %v465_v24 = vld [vmem:[#allocation2 + $0xd18] sm:$0xff] }
 0x1d9   :  { %v469_v25 = vld [vmem:[#allocation2 + $0xd38] sm:$0xff]  ;;  %v8202_v28 = vcombine.high %v464_v21, %v468_v22 }
 0x1da   :  { %v8203_v34 = vcombine.low %v465_v24, %v469_v25 }
 0x1db   :  { %3653 = vmatpush1.bf16.msra.mxu0 %v8137_v31  ;;  %3817 = vmatpush1.bf16.msra.mxu1 %v8139_v63  ;;  %v476_v31 = vld [vmem:[#allocation2 + $0xd70] sm:$0xff]  ;;  %v473_v63 = vld [vmem:[#allocation2 + $0xd58] sm:$0xff] }
 0x1dc   :  { %3654 = vmatprep.subr.bf16.mxu0 %v8146_v59  ;;  %3818 = vmatprep.subr.bf16.mxu1 %v8148_v33  ;;  %v477_v59 = vld [vmem:[#allocation2 + $0xd78] sm:$0xff]  ;;  %v8201_v33 = vcombine.low %v464_v21, %v468_v22  ;;  %v8210_v35 = vcombine.high %v472_v30, %v476_v31 }
 0x1dd   :  { %v8212_v36 = vcombine.high %v473_v63, %v477_v59  ;;  %v8211_v44 = vcombine.low %v473_v63, %v477_v59  ;;  %v528_v59 = vld [vmem:[#allocation2 + $0xf10] sm:$0xff] }
 0x1df   :  { %3655 = vmatpush1.bf16.msra.mxu0 %v8145_v39  ;;  %3819 = vmatpush1.bf16.msra.mxu1 %v8147_v40  ;;  %v484_v39 = vld [vmem:[#allocation2 + $0xdb0] sm:$0xff]  ;;  %v481_v40 = vld [vmem:[#allocation2 + $0xd98] sm:$0xff] }
 0x1e0   :  { %3656 = vmatprep.subr.bf16.mxu0 %v8154_v41  ;;  %3820 = vmatprep.subr.bf16.mxu1 %v8156_v42  ;;  %v485_v41 = vld [vmem:[#allocation2 + $0xdb8] sm:$0xff]  ;;  %v8209_v42 = vcombine.low %v472_v30, %v476_v31  ;;  %v8218_v45 = vcombine.high %v480_v37, %v484_v39 }
 0x1e1   :  { %v8220_v47 = vcombine.high %v481_v40, %v485_v41 }
 0x1e3   :  { %3657 = vmatpush1.bf16.msra.mxu0 %v8153_v49  ;;  %3821 = vmatpush1.bf16.msra.mxu1 %v8155_v9  ;;  %v488_v49 = vld [vmem:[#allocation2 + $0xdd0] sm:$0xff] }
 0x1e4   :  { %3658 = vmatprep.subr.bf16.mxu0 %v8162_v50  ;;  %3822 = vmatprep.subr.bf16.mxu1 %v8164_v51  ;;  %v492_v9 = vld [vmem:[#allocation2 + $0xdf0] sm:$0xff] }
 0x1e5   :  { %v8226_v62 = vcombine.high %v488_v49, %v492_v9 }
 0x1e7   :  { %3659 = vmatpush1.bf16.msra.mxu0 %v8161_v57  ;;  %3823 = vmatpush1.bf16.msra.mxu1 %v8163_v23  ;;  %v8217_v57 = vcombine.low %v480_v37, %v484_v39 }
 0x1e8   :  { %3669 = vmatprep.subr.bf16.mxu0 %v8170_v60  ;;  %3833 = vmatprep.subr.bf16.mxu1 %v8172_v61  ;;  %v8219_v61 = vcombine.low %v481_v40, %v485_v41  ;;  %v536_v41 = vld [vmem:[#allocation2 + $0xf50] sm:$0xff] }
 0x1ea   :  { %3661 = vmatmul.mubr.bf16.vlgmr.msra.gmra.mrb[4].mxu0 %v9085_v58  ;;  %3825 = vmatmul.mubr.bf16.vlgmr.msra.gmra.mrb[4].mxu1 %v9085_v58  ;;  %v8187_v58 = vcombine.low %v449_v8, %v453_v38  ;;  %v504_v38 = vld [vmem:[#allocation2 + $0xe50] sm:$0xff] }
 0x1eb   :  { %3670 = vmatpush1.bf16.msra.mxu0 %v8169_v3  ;;  %3834 = vmatpush1.bf16.msra.mxu1 %v8171_v4  ;;  %v500_v3 = vld [vmem:[#allocation2 + $0xe30] sm:$0xff]  ;;  %v497_v4 = vld [vmem:[#allocation2 + $0xe18] sm:$0xff] }
 0x1ec   :  { %3671 = vmatprep.subr.bf16.mxu0 %v8178_v29  ;;  %3835 = vmatprep.subr.bf16.mxu1 %v8180_v32  ;;  %v501_v29 = vld [vmem:[#allocation2 + $0xe38] sm:$0xff]  ;;  %v8225_v32 = vcombine.low %v488_v49, %v492_v9  ;;  %v8234_v7 = vcombine.high %v496_v2, %v500_v3 }
 0x1ed   :  { %3701 = vmatprep.mubr.bf16.mxu0 %v9089_v5  ;;  %3865 = vmatprep.mubr.bf16.mxu1 %v9089_v5  ;;  %v8204_v5 = vcombine.high %v465_v24, %v469_v25  ;;  %v8236_v8 = vcombine.high %v497_v4, %v501_v29  ;;  %v8235_v14 = vcombine.low %v497_v4, %v501_v29  ;;  %v520_v25 = vld [vmem:[#allocation2 + $0xed0] sm:$0xff]  ;;  %v557_v4 = vld [vmem:[#allocation2 + $0xff8] sm:$0xff]  ;;  %v9126_v29 = vld [vmem:[%s9271_s1] sm:$0xff] }
 0x1ef   :  { %3672 = vmatpush1.bf16.msra.mxu0 %v8177_v10  ;;  %3836 = vmatpush1.bf16.msra.mxu1 %v8179_v11  ;;  %v508_v10 = vld [vmem:[#allocation2 + $0xe70] sm:$0xff]  ;;  %v505_v11 = vld [vmem:[#allocation2 + $0xe58] sm:$0xff] }
 0x1f0   :  { %3673 = vmatprep.subr.bf16.mxu0 %v8186_v12  ;;  %3837 = vmatprep.subr.bf16.mxu1 %v8188_v13  ;;  %v509_v12 = vld [vmem:[#allocation2 + $0xe78] sm:$0xff]  ;;  %v8233_v13 = vcombine.low %v496_v2, %v500_v3  ;;  %v8242_v15 = vcombine.high %v504_v38, %v508_v10  ;;  %v556_v2 = vld [vmem:[#allocation2 + $0xff0] sm:$0xff] }
 0x1f1   :  { %v8244_v17 = vcombine.high %v505_v11, %v509_v12  ;;  %v8243_v21 = vcombine.low %v505_v11, %v509_v12  ;;  %v553_v3 = vld [vmem:[#allocation2 + $0xfd8] sm:$0xff]  ;;  %v9130_v11 = vrot.slane %v9126_v29, %v9035_v53  ;;  %v3885_v12 = vld [vmem:[#allocation2 + $0x1008] sm:$0xff] }
 0x1f3   :  { %3674 = vmatpush1.bf16.msra.mxu0 %v8185_v19  ;;  %3838 = vmatpush1.bf16.msra.mxu1 %v8187_v58  ;;  %v516_v19 = vld [vmem:[#allocation2 + $0xeb0] sm:$0xff]  ;;  %v513_v58 = vld [vmem:[#allocation2 + $0xe98] sm:$0xff] }
 0x1f4   :  { %3675 = vmatprep.subr.bf16.mxu0 %v8194_v48  ;;  %3839 = vmatprep.subr.bf16.mxu1 %v8196_v20  ;;  %v517_v48 = vld [vmem:[#allocation2 + $0xeb8] sm:$0xff]  ;;  %v8241_v20 = vcombine.low %v504_v38, %v508_v10  ;;  %v8250_v22 = vcombine.high %v512_v18, %v516_v19  ;;  %v3884_v38 = vld [vmem:[#allocation2 + $0x1000] sm:$0xff] }
 0x1f5   :  { %v8252_v24 = vcombine.high %v513_v58, %v517_v48  ;;  %v8251_v30 = vcombine.low %v513_v58, %v517_v48  ;;  %v3888_v10 = vld [vmem:[#allocation2 + $0x1020] sm:$0xff]  ;;  %v4455_v48 = vcombine.high %v9130_v11, %v9130_v11 }
 0x1f6   :  { %v3896_v58 = vld [vmem:[#allocation2 + $0x1060] sm:$0xff] }
 0x1f7   :  { %3676 = vmatpush1.bf16.msra.mxu0 %v8193_v26  ;;  %3840 = vmatpush1.bf16.msra.mxu1 %v8195_v27  ;;  %v524_v26 = vld [vmem:[#allocation2 + $0xef0] sm:$0xff]  ;;  %v521_v27 = vld [vmem:[#allocation2 + $0xed8] sm:$0xff] }
 0x1f8   :  { %3677 = vmatprep.subr.bf16.mxu0 %v8202_v28  ;;  %3841 = vmatprep.subr.bf16.mxu1 %v8204_v5  ;;  %v525_v28 = vld [vmem:[#allocation2 + $0xef8] sm:$0xff]  ;;  %v8249_v5 = vcombine.low %v512_v18, %v516_v19  ;;  %v8258_v31 = vcombine.high %v520_v25, %v524_v26  ;;  %v3892_v19 = vld [vmem:[#allocation2 + $0x1040] sm:$0xff] }
 0x1f9   :  { %v8260_v63 = vcombine.high %v521_v27, %v525_v28  ;;  %v8259_v37 = vcombine.low %v521_v27, %v525_v28  ;;  %v3900_v27 = vld [vmem:[#allocation2 + $0x1080] sm:$0xff] }
 0x1fa   :  { %v3904_v28 = vld [vmem:[#allocation2 + $0x10a0] sm:$0xff] }
 0x1fb   :  { %3678 = vmatpush1.bf16.msra.mxu0 %v8201_v33  ;;  %3842 = vmatpush1.bf16.msra.mxu1 %v8203_v34  ;;  %v532_v33 = vld [vmem:[#allocation2 + $0xf30] sm:$0xff]  ;;  %v529_v34 = vld [vmem:[#allocation2 + $0xf18] sm:$0xff] }
 0x1fc   :  { %3679 = vmatprep.subr.bf16.mxu0 %v8210_v35  ;;  %3843 = vmatprep.subr.bf16.mxu1 %v8212_v36  ;;  %v533_v35 = vld [vmem:[#allocation2 + $0xf38] sm:$0xff]  ;;  %v8257_v36 = vcombine.low %v520_v25, %v524_v26  ;;  %v8266_v39 = vcombine.high %v528_v59, %v532_v33  ;;  %v8302_v25 = vcombine.high %v3892_v19, %v3896_v58 }
 0x1fd   :  { %v9115_v46 = vpop.f32.mrb[0].mxu0  ;;  %v9117_v50 = vpop.f32.mrb[0].mxu1  ;;  %v8268_v40 = vcombine.high %v529_v34, %v533_v35  ;;  %v8267_v49 = vcombine.low %v529_v34, %v533_v35  ;;  %v3908_v35 = vld [vmem:[#allocation2 + $0x10c0] sm:$0xff] }
 0x1fe   :  { %v9119_v51 = vpop.f32.mrb[1].mxu0  ;;  %v9121_v55 = vpop.f32.mrb[1].mxu1 }
 0x1ff   :  { %v3379_v56 = vpop.f32.mrb[2].mxu0  ;;  %3680 = vmatpush1.bf16.msra.mxu0 %v8209_v42  ;;  %v3543_v23 = vpop.f32.mrb[2].mxu1  ;;  %3844 = vmatpush1.bf16.msra.mxu1 %v8211_v44  ;;  %v540_v42 = vld [vmem:[#allocation2 + $0xf70] sm:$0xff]  ;;  %v537_v44 = vld [vmem:[#allocation2 + $0xf58] sm:$0xff] }
 0x200   :  { %v3380_v60 = vpop.f32.mrb[3].mxu0  ;;  %3681 = vmatprep.subr.bf16.mxu0 %v8218_v45  ;;  %v3544_v0 = vpop.f32.mrb[3].mxu1  ;;  %3845 = vmatprep.subr.bf16.mxu1 %v8220_v47  ;;  %v541_v45 = vld [vmem:[#allocation2 + $0xf78] sm:$0xff]  ;;  %v8265_v47 = vcombine.low %v528_v59, %v532_v33  ;;  %v8274_v9 = vcombine.high %v536_v41, %v540_v42  ;;  %v548_v56 = vld [vmem:[#allocation2 + $0xfb0] sm:$0xff]  ;;  %v8310_v33 = vcombine.high %v3900_v27, %v3904_v28 }
 0x201   :  { %v8276_v52 = vcombine.high %v537_v44, %v541_v45  ;;  %v549_v23 = vld [vmem:[#allocation2 + $0xfb8] sm:$0xff]  ;;  %v8273_v60 = vcombine.low %v536_v41, %v540_v42 }
 0x203   :  { %3682 = vmatpush1.bf16.msra.mxu0 %v8217_v57  ;;  %3846 = vmatpush1.bf16.msra.mxu1 %v8219_v61  ;;  %v545_v57 = vld [vmem:[#allocation2 + $0xf98] sm:$0xff]  ;;  %v8275_v61 = vcombine.low %v537_v44, %v541_v45  ;;  %v3916_v44 = vld [vmem:[#allocation2 + $0x1100] sm:$0xff] }
 0x204   :  { %3683 = vmatprep.subr.bf16.mxu0 %v8226_v62  ;;  %3847 = vmatprep.subr.bf16.mxu1 %v8228_v1  ;;  %v8282_v62 = vcombine.high %v544_v54, %v548_v56  ;;  %v8284_v0 = vcombine.high %v545_v57, %v549_v23  ;;  %v552_v1 = vld [vmem:[#allocation2 + $0xfd0] sm:$0xff]  ;;  %v3920_v45 = vld [vmem:[#allocation2 + $0x1120] sm:$0xff] }
 0x207   :  { %3684 = vmatpush1.bf16.msra.mxu0 %v8225_v32  ;;  %3848 = vmatpush1.bf16.msra.mxu1 %v8227_v6  ;;  %v8281_v32 = vcombine.low %v544_v54, %v548_v56  ;;  %v8283_v6 = vcombine.low %v545_v57, %v549_v23  ;;  %v8326_v54 = vcombine.high %v3916_v44, %v3920_v45  ;;  %v3924_v57 = vld [vmem:[#allocation2 + $0x1140] sm:$0xff] }
 0x208   :  { %3685 = vmatprep.subr.bf16.mxu0 %v8234_v7  ;;  %3849 = vmatprep.subr.bf16.mxu1 %v8236_v8  ;;  %v8290_v7 = vcombine.high %v552_v1, %v556_v2  ;;  %v8292_v8 = vcombine.high %v553_v3, %v557_v4  ;;  %v3928_v23 = vld [vmem:[#allocation2 + $0x1160] sm:$0xff] }
 0x20b   :  { %3686 = vmatpush1.bf16.msra.mxu0 %v8233_v13  ;;  %3850 = vmatpush1.bf16.msra.mxu1 %v8235_v14  ;;  %v3889_v13 = vld [vmem:[#allocation2 + $0x1028] sm:$0xff]  ;;  %v8289_v14 = vcombine.low %v552_v1, %v556_v2  ;;  %v8334_v1 = vcombine.high %v3924_v57, %v3928_v23 }
 0x20c   :  { %3687 = vmatprep.subr.bf16.mxu0 %v8242_v15  ;;  %3851 = vmatprep.subr.bf16.mxu1 %v8244_v17  ;;  %v8291_v15 = vcombine.low %v553_v3, %v557_v4  ;;  %v8294_v17 = vcombine.high %v3884_v38, %v3888_v10  ;;  %v8296_v18 = vcombine.high %v3885_v12, %v3889_v13  ;;  %v3932_v3 = vld [vmem:[#allocation2 + $0x1180] sm:$0xff] }
 0x20d   :  { %v3936_v4 = vld [vmem:[#allocation2 + $0x11a0] sm:$0xff] }
 0x20f   :  { %3688 = vmatpush1.bf16.msra.mxu0 %v8241_v20  ;;  %3852 = vmatpush1.bf16.msra.mxu1 %v8243_v21  ;;  %v3893_v20 = vld [vmem:[#allocation2 + $0x1048] sm:$0xff] }
 0x210   :  { %3689 = vmatprep.subr.bf16.mxu0 %v8250_v22  ;;  %3853 = vmatprep.subr.bf16.mxu1 %v8252_v24  ;;  %v3897_v21 = vld [vmem:[#allocation2 + $0x1068] sm:$0xff]  ;;  %v8293_v22 = vcombine.low %v3884_v38, %v3888_v10  ;;  %v8295_v24 = vcombine.low %v3885_v12, %v3889_v13  ;;  %v8342_v38 = vcombine.high %v3932_v3, %v3936_v4  ;;  %v3940_v12 = vld [vmem:[#allocation2 + $0x11c0] sm:$0xff] }
 0x211   :  { %v8304_v26 = vcombine.high %v3893_v20, %v3897_v21  ;;  %v8303_v59 = vcombine.low %v3893_v20, %v3897_v21  ;;  %v3944_v13 = vld [vmem:[#allocation2 + $0x11e0] sm:$0xff]  ;;  %v3949_v21 = vld [vmem:[#allocation2 + $0x1208] sm:$0xff] }
 0x212   :  { %v3952_v20 = vld [vmem:[#allocation2 + $0x1220] sm:$0xff] }
 0x213   :  { %3690 = vmatpush1.bf16.msra.mxu0 %v8249_v5  ;;  %3854 = vmatpush1.bf16.msra.mxu1 %v8251_v30  ;;  %v9135_v5 = vrot.slane %v4455_v48, %v9035_v53  ;;  %v3901_v30 = vld [vmem:[#allocation2 + $0x1088] sm:$0xff]  ;;  %v3948_v48 = vld [vmem:[#allocation2 + $0x1200] sm:$0xff] }
 0x214   :  { %3691 = vmatprep.subr.bf16.mxu0 %v8258_v31  ;;  %3855 = vmatprep.subr.bf16.mxu1 %v8260_v63  ;;  %v3905_v31 = vld [vmem:[#allocation2 + $0x10a8] sm:$0xff]  ;;  %v8301_v63 = vcombine.low %v3892_v19, %v3896_v58  ;;  %v8350_v19 = vcombine.high %v3940_v12, %v3944_v13 }
 0x215   :  { %v8312_v34 = vcombine.high %v3901_v30, %v3905_v31 }
 0x217   :  { %3692 = vmatpush1.bf16.msra.mxu0 %v8257_v36  ;;  %3856 = vmatpush1.bf16.msra.mxu1 %v8259_v37  ;;  %v3912_v36 = vld [vmem:[#allocation2 + $0x10e0] sm:$0xff]  ;;  %v3909_v37 = vld [vmem:[#allocation2 + $0x10c8] sm:$0xff] }
 0x218   :  { %3693 = vmatprep.subr.bf16.mxu0 %v8266_v39  ;;  %3857 = vmatprep.subr.bf16.mxu1 %v8268_v40  ;;  %v3913_v39 = vld [vmem:[#allocation2 + $0x10e8] sm:$0xff]  ;;  %v8309_v40 = vcombine.low %v3900_v27, %v3904_v28  ;;  %v8318_v41 = vcombine.high %v3908_v35, %v3912_v36  ;;  %v3956_v28 = vld [vmem:[#allocation2 + $0x1240] sm:$0xff] }
 0x219   :  { %v8320_v42 = vcombine.high %v3909_v37, %v3913_v39 }
 0x21b   :  { %3694 = vmatpush1.bf16.msra.mxu0 %v8265_v47  ;;  %3858 = vmatpush1.bf16.msra.mxu1 %v8267_v49  ;;  %v3917_v47 = vld [vmem:[#allocation2 + $0x1108] sm:$0xff] }
 0x21c   :  { %3695 = vmatprep.subr.bf16.mxu0 %v8274_v9  ;;  %3859 = vmatprep.subr.bf16.mxu1 %v8276_v52  ;;  %v3921_v49 = vld [vmem:[#allocation2 + $0x1128] sm:$0xff]  ;;  %v8317_v9 = vcombine.low %v3908_v35, %v3912_v36  ;;  %v8319_v52 = vcombine.low %v3909_v37, %v3913_v39  ;;  %v3964_v36 = vld [vmem:[#allocation2 + $0x1280] sm:$0xff] }
 0x21d   :  { %v8328_v56 = vcombine.high %v3917_v47, %v3921_v49  ;;  %v3968_v37 = vld [vmem:[#allocation2 + $0x12a0] sm:$0xff]  ;;  %v3965_v39 = vld [vmem:[#allocation2 + $0x1288] sm:$0xff] }
 0x21f   :  { %3696 = vmatpush1.bf16.msra.mxu0 %v8273_v60  ;;  %3860 = vmatpush1.bf16.msra.mxu1 %v8275_v61  ;;  %v3925_v60 = vld [vmem:[#allocation2 + $0x1148] sm:$0xff] }
 0x220   :  { %3697 = vmatprep.subr.bf16.mxu0 %v8282_v62  ;;  %3861 = vmatprep.subr.bf16.mxu1 %v8284_v0  ;;  %v3929_v61 = vld [vmem:[#allocation2 + $0x1168] sm:$0xff]  ;;  %v8325_v62 = vcombine.low %v3916_v44, %v3920_v45  ;;  %v8327_v0 = vcombine.low %v3917_v47, %v3921_v49  ;;  %v3972_v45 = vld [vmem:[#allocation2 + $0x12c0] sm:$0xff] }
 0x221   :  { %v8336_v2 = vcombine.high %v3925_v60, %v3929_v61  ;;  %v3976_v47 = vld [vmem:[#allocation2 + $0x12e0] sm:$0xff]  ;;  %v3973_v49 = vld [vmem:[#allocation2 + $0x12c8] sm:$0xff] }
 0x223   :  { %3698 = vmatpush1.bf16.msra.mxu0 %v8281_v32  ;;  %3862 = vmatpush1.bf16.msra.mxu1 %v8283_v6  ;;  %v3933_v32 = vld [vmem:[#allocation2 + $0x1188] sm:$0xff] }
 0x224   :  { %3699 = vmatprep.subr.bf16.mxu0 %v8290_v7  ;;  %3863 = vmatprep.subr.bf16.mxu1 %v8292_v8  ;;  %v3937_v6 = vld [vmem:[#allocation2 + $0x11a8] sm:$0xff]  ;;  %v8333_v7 = vcombine.low %v3924_v57, %v3928_v23  ;;  %v8335_v8 = vcombine.low %v3925_v60, %v3929_v61  ;;  %v3980_v23 = vld [vmem:[#allocation2 + $0x1300] sm:$0xff] }
 0x225   :  { %v8344_v10 = vcombine.high %v3933_v32, %v3937_v6  ;;  %v3984_v60 = vld [vmem:[#allocation2 + $0x1320] sm:$0xff]  ;;  %v3981_v61 = vld [vmem:[#allocation2 + $0x1308] sm:$0xff] }
 0x227   :  { %3700 = vmatpush1.bf16.msra.mxu0 %v8289_v14  ;;  %3864 = vmatpush1.bf16.msra.mxu1 %v8291_v15  ;;  %v3941_v14 = vld [vmem:[#allocation2 + $0x11c8] sm:$0xff] }
 0x228   :  { %7057 = vmatprep.subr.bf16.mxu0 %v8294_v17  ;;  %7221 = vmatprep.subr.bf16.mxu1 %v8296_v18  ;;  %v3945_v15 = vld [vmem:[#allocation2 + $0x11e8] sm:$0xff]  ;;  %v8341_v17 = vcombine.low %v3932_v3, %v3936_v4  ;;  %v8343_v18 = vcombine.low %v3933_v32, %v3937_v6  ;;  %v3988_v4 = vld [vmem:[#allocation2 + $0x1340] sm:$0xff] }
 0x229   :  { %v8352_v58 = vcombine.high %v3941_v14, %v3945_v15  ;;  %v3992_v32 = vld [vmem:[#allocation2 + $0x1360] sm:$0xff]  ;;  %v3989_v6 = vld [vmem:[#allocation2 + $0x1348] sm:$0xff] }
 0x22a   :  { %3702 = vmatmul.mubr.bf16.vlgmr.msra.gmra.mrb[4].mxu0 %v9097_v16  ;;  %3866 = vmatmul.mubr.bf16.vlgmr.msra.gmra.mrb[4].mxu1 %v9097_v16  ;;  %v8311_v16 = vcombine.low %v3901_v30, %v3905_v31  ;;  %v3960_v30 = vld [vmem:[#allocation2 + $0x1260] sm:$0xff]  ;;  %v3957_v31 = vld [vmem:[#allocation2 + $0x1248] sm:$0xff] }
 0x22b   :  { %7058 = vmatpush1.bf16.msra.mxu0 %v8293_v22  ;;  %7222 = vmatpush1.bf16.msra.mxu1 %v8295_v24  ;;  %v3953_v22 = vld [vmem:[#allocation2 + $0x1228] sm:$0xff]  ;;  %v8349_v24 = vcombine.low %v3940_v12, %v3944_v13  ;;  %v3996_v13 = vld [vmem:[#allocation2 + $0x1380] sm:$0xff] }
 0x22c   :  { %7059 = vmatprep.subr.bf16.mxu0 %v8302_v25  ;;  %7223 = vmatprep.subr.bf16.mxu1 %v8304_v26  ;;  %v8351_v25 = vcombine.low %v3941_v14, %v3945_v15  ;;  %v8358_v26 = vcombine.high %v3948_v48, %v3952_v20  ;;  %v8360_v27 = vcombine.high %v3949_v21, %v3953_v22  ;;  %v4000_v14 = vld [vmem:[#allocation2 + $0x13a0] sm:$0xff]  ;;  %v3997_v15 = vld [vmem:[#allocation2 + $0x1388] sm:$0xff] }
 0x22d   :  { %7089 = vmatprep.mubr.bf16.mxu0 %v9135_v5  ;;  %7253 = vmatprep.mubr.bf16.mxu1 %v9135_v5 }
 0x22f   :  { %7060 = vmatpush1.bf16.msra.mxu0 %v8301_v63  ;;  %7224 = vmatpush1.bf16.msra.mxu1 %v8303_v59  ;;  %v3961_v63 = vld [vmem:[#allocation2 + $0x1268] sm:$0xff]  ;;  %v8357_v59 = vcombine.low %v3948_v48, %v3952_v20  ;;  %v4004_v20 = vld [vmem:[#allocation2 + $0x13c0] sm:$0xff] }
 0x230   :  { %7061 = vmatprep.subr.bf16.mxu0 %v8310_v33  ;;  %7225 = vmatprep.subr.bf16.mxu1 %v8312_v34  ;;  %v8359_v33 = vcombine.low %v3949_v21, %v3953_v22  ;;  %v8366_v34 = vcombine.high %v3956_v28, %v3960_v30  ;;  %v8368_v35 = vcombine.high %v3957_v31, %v3961_v63  ;;  %v4008_v21 = vld [vmem:[#allocation2 + $0x13e0] sm:$0xff]  ;;  %v4005_v22 = vld [vmem:[#allocation2 + $0x13c8] sm:$0xff] }
 0x233   :  { %7062 = vmatpush1.bf16.msra.mxu0 %v8309_v40  ;;  %7226 = vmatpush1.bf16.msra.mxu1 %v8311_v16  ;;  %v3969_v40 = vld [vmem:[#allocation2 + $0x12a8] sm:$0xff]  ;;  %v8365_v16 = vcombine.low %v3956_v28, %v3960_v30  ;;  %v4012_v30 = vld [vmem:[#allocation2 + $0x1400] sm:$0xff] }
 0x234   :  { %7063 = vmatprep.subr.bf16.mxu0 %v8318_v41  ;;  %7227 = vmatprep.subr.bf16.mxu1 %v8320_v42  ;;  %v8367_v41 = vcombine.low %v3957_v31, %v3961_v63  ;;  %v8374_v42 = vcombine.high %v3964_v36, %v3968_v37  ;;  %v8376_v44 = vcombine.high %v3965_v39, %v3969_v40  ;;  %v4016_v31 = vld [vmem:[#allocation2 + $0x1420] sm:$0xff]  ;;  %v4013_v63 = vld [vmem:[#allocation2 + $0x1408] sm:$0xff] }
 0x237   :  { %7064 = vmatpush1.bf16.msra.mxu0 %v8317_v9  ;;  %7228 = vmatpush1.bf16.msra.mxu1 %v8319_v52  ;;  %v3977_v9 = vld [vmem:[#allocation2 + $0x12e8] sm:$0xff]  ;;  %v8373_v52 = vcombine.low %v3964_v36, %v3968_v37  ;;  %v4020_v37 = vld [vmem:[#allocation2 + $0x1440] sm:$0xff] }
 0x238   :  { %7065 = vmatprep.subr.bf16.mxu0 %v8326_v54  ;;  %7229 = vmatprep.subr.bf16.mxu1 %v8328_v56  ;;  %v8375_v54 = vcombine.low %v3965_v39, %v3969_v40  ;;  %v8382_v56 = vcombine.high %v3972_v45, %v3976_v47  ;;  %v8384_v57 = vcombine.high %v3973_v49, %v3977_v9  ;;  %v4024_v39 = vld [vmem:[#allocation2 + $0x1460] sm:$0xff] }
 0x239   :  { %v9143_v40 = vrot.slane %v9130_v11, %v9035_v53  ;;  %v4029_v11 = vld [vmem:[#allocation2 + $0x1488] sm:$0xff] }
 0x23b   :  { %7066 = vmatpush1.bf16.msra.mxu0 %v8325_v62  ;;  %7230 = vmatpush1.bf16.msra.mxu1 %v8327_v0  ;;  %v3985_v62 = vld [vmem:[#allocation2 + $0x1328] sm:$0xff]  ;;  %v8381_v0 = vcombine.low %v3972_v45, %v3976_v47  ;;  %v8430_v45 = vcombine.high %v4020_v37, %v4024_v39 }
 0x23c   :  { %7067 = vmatprep.subr.bf16.mxu0 %v8334_v1  ;;  %7231 = vmatprep.subr.bf16.mxu1 %v8336_v2  ;;  %v8383_v1 = vcombine.low %v3973_v49, %v3977_v9  ;;  %v8390_v2 = vcombine.high %v3980_v23, %v3984_v60  ;;  %v8392_v3 = vcombine.high %v3981_v61, %v3985_v62  ;;  %v4028_v49 = vld [vmem:[#allocation2 + $0x1480] sm:$0xff] }
 0x23d   :  { %v4032_v9 = vld [vmem:[#allocation2 + $0x14a0] sm:$0xff] }
 0x23f   :  { %7068 = vmatpush1.bf16.msra.mxu0 %v8333_v7  ;;  %7232 = vmatpush1.bf16.msra.mxu1 %v8335_v8  ;;  %v3993_v7 = vld [vmem:[#allocation2 + $0x1368] sm:$0xff]  ;;  %v8389_v8 = vcombine.low %v3980_v23, %v3984_v60  ;;  %v8438_v23 = vcombine.high %v4028_v49, %v4032_v9 }
 0x240   :  { %7069 = vmatprep.subr.bf16.mxu0 %v8342_v38  ;;  %7233 = vmatprep.subr.bf16.mxu1 %v8344_v10  ;;  %v8391_v38 = vcombine.low %v3981_v61, %v3985_v62  ;;  %v8398_v10 = vcombine.high %v3988_v4, %v3992_v32  ;;  %v8400_v12 = vcombine.high %v3989_v6, %v3993_v7  ;;  %v4036_v61 = vld [vmem:[#allocation2 + $0x14c0] sm:$0xff] }
 0x241   :  { %v4040_v62 = vld [vmem:[#allocation2 + $0x14e0] sm:$0xff] }
 0x243   :  { %7070 = vmatpush1.bf16.msra.mxu0 %v8341_v17  ;;  %7234 = vmatpush1.bf16.msra.mxu1 %v8343_v18  ;;  %v4001_v17 = vld [vmem:[#allocation2 + $0x13a8] sm:$0xff]  ;;  %v8397_v18 = vcombine.low %v3988_v4, %v3992_v32  ;;  %v8446_v4 = vcombine.high %v4036_v61, %v4040_v62 }
 0x244   :  { %7071 = vmatprep.subr.bf16.mxu0 %v8350_v19  ;;  %7235 = vmatprep.subr.bf16.mxu1 %v8352_v58  ;;  %v8399_v19 = vcombine.low %v3989_v6, %v3993_v7  ;;  %v8406_v58 = vcombine.high %v3996_v13, %v4000_v14  ;;  %v8408_v48 = vcombine.high %v3997_v15, %v4001_v17  ;;  %v4044_v6 = vld [vmem:[#allocation2 + $0x1500] sm:$0xff] }
 0x245   :  { %v4048_v7 = vld [vmem:[#allocation2 + $0x1520] sm:$0xff] }
 0x247   :  { %7072 = vmatpush1.bf16.msra.mxu0 %v8349_v24  ;;  %7236 = vmatpush1.bf16.msra.mxu1 %v8351_v25  ;;  %v4009_v24 = vld [vmem:[#allocation2 + $0x13e8] sm:$0xff]  ;;  %v8405_v25 = vcombine.low %v3996_v13, %v4000_v14  ;;  %v8454_v13 = vcombine.high %v4044_v6, %v4048_v7 }
 0x248   :  { %7073 = vmatprep.subr.bf16.mxu0 %v8358_v26  ;;  %7237 = vmatprep.subr.bf16.mxu1 %v8360_v27  ;;  %v8407_v26 = vcombine.low %v3997_v15, %v4001_v17  ;;  %v8414_v27 = vcombine.high %v4004_v20, %v4008_v21  ;;  %v8416_v28 = vcombine.high %v4005_v22, %v4009_v24  ;;  %v4052_v15 = vld [vmem:[#allocation2 + $0x1540] sm:$0xff] }
 0x249   :  { %v4056_v17 = vld [vmem:[#allocation2 + $0x1560] sm:$0xff] }
 0x24b   :  { %7074 = vmatpush1.bf16.msra.mxu0 %v8357_v59  ;;  %7238 = vmatpush1.bf16.msra.mxu1 %v8359_v33  ;;  %v4017_v59 = vld [vmem:[#allocation2 + $0x1428] sm:$0xff]  ;;  %v8413_v33 = vcombine.low %v4004_v20, %v4008_v21  ;;  %v8462_v20 = vcombine.high %v4052_v15, %v4056_v17 }
 0x24c   :  { %7075 = vmatprep.subr.bf16.mxu0 %v8366_v34  ;;  %7239 = vmatprep.subr.bf16.mxu1 %v8368_v35  ;;  %v8415_v34 = vcombine.low %v4005_v22, %v4009_v24  ;;  %v8422_v35 = vcombine.high %v4012_v30, %v4016_v31  ;;  %v8424_v36 = vcombine.high %v4013_v63, %v4017_v59  ;;  %v4060_v22 = vld [vmem:[#allocation2 + $0x1580] sm:$0xff] }
 0x24d   :  { %v4064_v24 = vld [vmem:[#allocation2 + $0x15a0] sm:$0xff] }
 0x24f   :  { %7076 = vmatpush1.bf16.msra.mxu0 %v8365_v16  ;;  %7240 = vmatpush1.bf16.msra.mxu1 %v8367_v41  ;;  %v4021_v16 = vld [vmem:[#allocation2 + $0x1448] sm:$0xff] }
 0x250   :  { %7077 = vmatprep.subr.bf16.mxu0 %v8374_v42  ;;  %7241 = vmatprep.subr.bf16.mxu1 %v8376_v44  ;;  %v4025_v41 = vld [vmem:[#allocation2 + $0x1468] sm:$0xff]  ;;  %v8421_v42 = vcombine.low %v4012_v30, %v4016_v31  ;;  %v8423_v44 = vcombine.low %v4013_v63, %v4017_v59  ;;  %v8470_v30 = vcombine.high %v4060_v22, %v4064_v24  ;;  %v4068_v63 = vld [vmem:[#allocation2 + $0x15c0] sm:$0xff] }
 0x251   :  { %v8432_v47 = vcombine.high %v4021_v16, %v4025_v41  ;;  %v4072_v59 = vld [vmem:[#allocation2 + $0x15e0] sm:$0xff] }
 0x253   :  { %7078 = vmatpush1.bf16.msra.mxu0 %v8373_v52  ;;  %7242 = vmatpush1.bf16.msra.mxu1 %v8375_v54  ;;  %v9147_v52 = vcombine.high %v9135_v5, %v9135_v5  ;;  %v4033_v54 = vld [vmem:[#allocation2 + $0x14a8] sm:$0xff] }
 0x254   :  { %7079 = vmatprep.subr.bf16.mxu0 %v8382_v56  ;;  %7243 = vmatprep.subr.bf16.mxu1 %v8384_v57  ;;  %v8429_v56 = vcombine.low %v4020_v37, %v4024_v39  ;;  %v8431_v57 = vcombine.low %v4021_v16, %v4025_v41  ;;  %v8440_v60 = vcombine.high %v4029_v11, %v4033_v54  ;;  %v4076_v16 = vld [vmem:[#allocation2 + $0x1600] sm:$0xff] }
 0x255   :  { %v8478_v37 = vcombine.high %v4068_v63, %v4072_v59  ;;  %v4080_v41 = vld [vmem:[#allocation2 + $0x1620] sm:$0xff] }
 0x257   :  { %7080 = vmatpush1.bf16.msra.mxu0 %v8381_v0  ;;  %7244 = vmatpush1.bf16.msra.mxu1 %v8383_v1  ;;  %v4037_v0 = vld [vmem:[#allocation2 + $0x14c8] sm:$0xff] }
 0x258   :  { %7081 = vmatprep.subr.bf16.mxu0 %v8390_v2  ;;  %7245 = vmatprep.subr.bf16.mxu1 %v8392_v3  ;;  %v4041_v1 = vld [vmem:[#allocation2 + $0x14e8] sm:$0xff]  ;;  %v8437_v2 = vcombine.low %v4028_v49, %v4032_v9  ;;  %v8439_v3 = vcombine.low %v4029_v11, %v4033_v54  ;;  %v8486_v49 = vcombine.high %v4076_v16, %v4080_v41  ;;  %v4084_v11 = vld [vmem:[#allocation2 + $0x1640] sm:$0xff] }
 0x259   :  { %v8448_v32 = vcombine.high %v4037_v0, %v4041_v1  ;;  %v4088_v54 = vld [vmem:[#allocation2 + $0x1660] sm:$0xff] }
 0x25b   :  { %7082 = vmatpush1.bf16.msra.mxu0 %v8389_v8  ;;  %7246 = vmatpush1.bf16.msra.mxu1 %v8391_v38  ;;  %v4045_v8 = vld [vmem:[#allocation2 + $0x1508] sm:$0xff] }
 0x25c   :  { %7083 = vmatprep.subr.bf16.mxu0 %v8398_v10  ;;  %7247 = vmatprep.subr.bf16.mxu1 %v8400_v12  ;;  %v4049_v38 = vld [vmem:[#allocation2 + $0x1528] sm:$0xff]  ;;  %v8445_v10 = vcombine.low %v4036_v61, %v4040_v62  ;;  %v8447_v12 = vcombine.low %v4037_v0, %v4041_v1  ;;  %v8494_v61 = vcombine.high %v4084_v11, %v4088_v54  ;;  %v4092_v0 = vld [vmem:[#allocation2 + $0x1680] sm:$0xff] }
 0x25d   :  { %v8456_v14 = vcombine.high %v4045_v8, %v4049_v38  ;;  %v4096_v1 = vld [vmem:[#allocation2 + $0x16a0] sm:$0xff] }
 0x25f   :  { %7084 = vmatpush1.bf16.msra.mxu0 %v8397_v18  ;;  %7248 = vmatpush1.bf16.msra.mxu1 %v8399_v19  ;;  %v4053_v18 = vld [vmem:[#allocation2 + $0x1548] sm:$0xff] }
 0x260   :  { %7085 = vmatprep.subr.bf16.mxu0 %v8406_v58  ;;  %7249 = vmatprep.subr.bf16.mxu1 %v8408_v48  ;;  %v4057_v19 = vld [vmem:[#allocation2 + $0x1568] sm:$0xff]  ;;  %v8453_v58 = vcombine.low %v4044_v6, %v4048_v7  ;;  %v8455_v48 = vcombine.low %v4045_v8, %v4049_v38  ;;  %v8502_v6 = vcombine.high %v4092_v0, %v4096_v1  ;;  %v4100_v8 = vld [vmem:[#allocation2 + $0x16c0] sm:$0xff] }
 0x261   :  { %v8464_v21 = vcombine.high %v4053_v18, %v4057_v19  ;;  %v4104_v38 = vld [vmem:[#allocation2 + $0x16e0] sm:$0xff] }
 0x263   :  { %7086 = vmatpush1.bf16.msra.mxu0 %v8405_v25  ;;  %7250 = vmatpush1.bf16.msra.mxu1 %v8407_v26  ;;  %v4061_v25 = vld [vmem:[#allocation2 + $0x1588] sm:$0xff] }
 0x264   :  { %7087 = vmatprep.subr.bf16.mxu0 %v8414_v27  ;;  %7251 = vmatprep.subr.bf16.mxu1 %v8416_v28  ;;  %v4065_v26 = vld [vmem:[#allocation2 + $0x15a8] sm:$0xff]  ;;  %v8461_v27 = vcombine.low %v4052_v15, %v4056_v17  ;;  %v8463_v28 = vcombine.low %v4053_v18, %v4057_v19  ;;  %v8510_v15 = vcombine.high %v4100_v8, %v4104_v38  ;;  %v4108_v18 = vld [vmem:[#allocation2 + $0x1700] sm:$0xff] }
 0x265   :  { %v8472_v31 = vcombine.high %v4061_v25, %v4065_v26  ;;  %v4112_v19 = vld [vmem:[#allocation2 + $0x1720] sm:$0xff] }
 0x267   :  { %7088 = vmatpush1.bf16.msra.mxu0 %v8413_v33  ;;  %7252 = vmatpush1.bf16.msra.mxu1 %v8415_v34  ;;  %v4069_v33 = vld [vmem:[#allocation2 + $0x15c8] sm:$0xff] }
 0x268   :  { %7098 = vmatprep.subr.bf16.mxu0 %v8422_v35  ;;  %7262 = vmatprep.subr.bf16.mxu1 %v8424_v36  ;;  %v4073_v34 = vld [vmem:[#allocation2 + $0x15e8] sm:$0xff]  ;;  %v8469_v35 = vcombine.low %v4060_v22, %v4064_v24  ;;  %v8471_v36 = vcombine.low %v4061_v25, %v4065_v26  ;;  %v8518_v22 = vcombine.high %v4108_v18, %v4112_v19  ;;  %v4116_v25 = vld [vmem:[#allocation2 + $0x1740] sm:$0xff] }
 0x269   :  { %v8480_v39 = vcombine.high %v4069_v33, %v4073_v34  ;;  %v4120_v26 = vld [vmem:[#allocation2 + $0x1760] sm:$0xff] }
 0x26a   :  { %7090 = vmatmul.mubr.bf16.vlgmr.msra.gmra.mrb[8].mxu0 %v9143_v40  ;;  %7254 = vmatmul.mubr.bf16.vlgmr.msra.gmra.mrb[8].mxu1 %v9143_v40 }
 0x26b   :  { %7099 = vmatpush1.bf16.msra.mxu0 %v8421_v42  ;;  %7263 = vmatpush1.bf16.msra.mxu1 %v8423_v44  ;;  %v4077_v42 = vld [vmem:[#allocation2 + $0x1608] sm:$0xff] }
 0x26c   :  { %7100 = vmatprep.subr.bf16.mxu0 %v8430_v45  ;;  %7264 = vmatprep.subr.bf16.mxu1 %v8432_v47  ;;  %v4081_v44 = vld [vmem:[#allocation2 + $0x1628] sm:$0xff]  ;;  %v8477_v45 = vcombine.low %v4068_v63, %v4072_v59  ;;  %v8479_v47 = vcombine.low %v4069_v33, %v4073_v34  ;;  %v8526_v63 = vcombine.high %v4116_v25, %v4120_v26  ;;  %v4124_v33 = vld [vmem:[#allocation2 + $0x1780] sm:$0xff] }
 0x26d   :  { %7130 = vmatprep.mubr.bf16.mxu0 %v9147_v52  ;;  %7294 = vmatprep.mubr.bf16.mxu1 %v9147_v52  ;;  %v8488_v9 = vcombine.high %v4077_v42, %v4081_v44  ;;  %v4128_v34 = vld [vmem:[#allocation2 + $0x17a0] sm:$0xff] }
 0x26f   :  { %7101 = vmatpush1.bf16.msra.mxu0 %v8429_v56  ;;  %7265 = vmatpush1.bf16.msra.mxu1 %v8431_v57  ;;  %v4085_v56 = vld [vmem:[#allocation2 + $0x1648] sm:$0xff] }
 0x270   :  { %7102 = vmatprep.subr.bf16.mxu0 %v8438_v23  ;;  %7266 = vmatprep.subr.bf16.mxu1 %v8440_v60  ;;  %v4089_v57 = vld [vmem:[#allocation2 + $0x1668] sm:$0xff]  ;;  %v8485_v23 = vcombine.low %v4076_v16, %v4080_v41  ;;  %v8487_v60 = vcombine.low %v4077_v42, %v4081_v44  ;;  %v8534_v16 = vcombine.high %v4124_v33, %v4128_v34  ;;  %v4132_v42 = vld [vmem:[#allocation2 + $0x17c0] sm:$0xff] }
 0x271   :  { %v8496_v62 = vcombine.high %v4085_v56, %v4089_v57  ;;  %v4136_v44 = vld [vmem:[#allocation2 + $0x17e0] sm:$0xff] }
 0x273   :  { %7103 = vmatpush1.bf16.msra.mxu0 %v8437_v2  ;;  %7267 = vmatpush1.bf16.msra.mxu1 %v8439_v3  ;;  %v4093_v2 = vld [vmem:[#allocation2 + $0x1688] sm:$0xff] }
 0x274   :  { %7104 = vmatprep.subr.bf16.mxu0 %v8446_v4  ;;  %7268 = vmatprep.subr.bf16.mxu1 %v8448_v32  ;;  %v4097_v3 = vld [vmem:[#allocation2 + $0x16a8] sm:$0xff]  ;;  %v8493_v4 = vcombine.low %v4084_v11, %v4088_v54  ;;  %v8495_v32 = vcombine.low %v4085_v56, %v4089_v57  ;;  %v8542_v54 = vcombine.high %v4132_v42, %v4136_v44  ;;  %v4140_v57 = vld [vmem:[#allocation2 + $0x1800] sm:$0xff] }
 0x275   :  { %v8504_v7 = vcombine.high %v4093_v2, %v4097_v3 }
 0x277   :  { %7105 = vmatpush1.bf16.msra.mxu0 %v8445_v10  ;;  %7269 = vmatpush1.bf16.msra.mxu1 %v8447_v12  ;;  %v4101_v10 = vld [vmem:[#allocation2 + $0x16c8] sm:$0xff] }
 0x278   :  { %7106 = vmatprep.subr.bf16.mxu0 %v8454_v13  ;;  %7270 = vmatprep.subr.bf16.mxu1 %v8456_v14  ;;  %v4105_v12 = vld [vmem:[#allocation2 + $0x16e8] sm:$0xff]  ;;  %v8501_v13 = vcombine.low %v4092_v0, %v4096_v1  ;;  %v8503_v14 = vcombine.low %v4093_v2, %v4097_v3  ;;  %v8541_v0 = vcombine.low %v4132_v42, %v4136_v44  ;;  %v4148_v3 = vld [vmem:[#allocation2 + $0x1840] sm:$0xff] }
 0x279   :  { %v8512_v17 = vcombine.high %v4101_v10, %v4105_v12  ;;  %v4181_v42 = vld [vmem:[#allocation2 + $0x1948] sm:$0xff] }
 0x27a   :  { %v4185_v44 = vld [vmem:[#allocation2 + $0x1968] sm:$0xff] }
 0x27b   :  { %7107 = vmatpush1.bf16.msra.mxu0 %v8453_v58  ;;  %7271 = vmatpush1.bf16.msra.mxu1 %v8455_v48  ;;  %v4109_v58 = vld [vmem:[#allocation2 + $0x1708] sm:$0xff] }
 0x27c   :  { %7108 = vmatprep.subr.bf16.mxu0 %v8462_v20  ;;  %7272 = vmatprep.subr.bf16.mxu1 %v8464_v21  ;;  %v4113_v48 = vld [vmem:[#allocation2 + $0x1728] sm:$0xff]  ;;  %v8509_v20 = vcombine.low %v4100_v8, %v4104_v38  ;;  %v8511_v21 = vcombine.low %v4101_v10, %v4105_v12 }
 0x27d   :  { %v8520_v24 = vcombine.high %v4109_v58, %v4113_v48  ;;  %v4153_v8 = vld [vmem:[#allocation2 + $0x1868] sm:$0xff] }
 0x27f   :  { %7109 = vmatpush1.bf16.msra.mxu0 %v8461_v27  ;;  %7273 = vmatpush1.bf16.msra.mxu1 %v8463_v28  ;;  %v4117_v27 = vld [vmem:[#allocation2 + $0x1748] sm:$0xff] }
 0x280   :  { %7110 = vmatprep.subr.bf16.mxu0 %v8470_v30  ;;  %7274 = vmatprep.subr.bf16.mxu1 %v8472_v31  ;;  %v4121_v28 = vld [vmem:[#allocation2 + $0x1768] sm:$0xff]  ;;  %v8517_v30 = vcombine.low %v4108_v18, %v4112_v19  ;;  %v8519_v31 = vcombine.low %v4109_v58, %v4113_v48 }
 0x281   :  { %v8528_v59 = vcombine.high %v4117_v27, %v4121_v28  ;;  %v4157_v18 = vld [vmem:[#allocation2 + $0x1888] sm:$0xff] }
 0x282   :  { %v4161_v19 = vld [vmem:[#allocation2 + $0x18a8] sm:$0xff] }
 0x283   :  { %7111 = vmatpush1.bf16.msra.mxu0 %v8469_v35  ;;  %7275 = vmatpush1.bf16.msra.mxu1 %v8471_v36  ;;  %v4125_v35 = vld [vmem:[#allocation2 + $0x1788] sm:$0xff] }
 0x284   :  { %7112 = vmatprep.subr.bf16.mxu0 %v8478_v37  ;;  %7276 = vmatprep.subr.bf16.mxu1 %v8480_v39  ;;  %v4129_v36 = vld [vmem:[#allocation2 + $0x17a8] sm:$0xff]  ;;  %v8525_v37 = vcombine.low %v4116_v25, %v4120_v26  ;;  %v8527_v39 = vcombine.low %v4117_v27, %v4121_v28  ;;  %v8567_v28 = vcombine.low %v4157_v18, %v4161_v19 }
 0x285   :  { %v8536_v41 = vcombine.high %v4125_v35, %v4129_v36  ;;  %v8535_v11 = vcombine.low %v4125_v35, %v4129_v36  ;;  %v4165_v25 = vld [vmem:[#allocation2 + $0x18c8] sm:$0xff] }
 0x286   :  { %v4169_v26 = vld [vmem:[#allocation2 + $0x18e8] sm:$0xff] }
 0x287   :  { %7113 = vmatpush1.bf16.msra.mxu0 %v8477_v45  ;;  %7277 = vmatpush1.bf16.msra.mxu1 %v8479_v47  ;;  %v4440_v45 = vcombine.high %v9126_v29, %v9126_v29  ;;  %v4133_v47 = vld [vmem:[#allocation2 + $0x17c8] sm:$0xff]  ;;  %v8575_v36 = vcombine.low %v4165_v25, %v4169_v26 }
 0x288   :  { %7114 = vmatprep.subr.bf16.mxu0 %v8486_v49  ;;  %7278 = vmatprep.subr.bf16.mxu1 %v8488_v9  ;;  %v4137_v49 = vld [vmem:[#allocation2 + $0x17e8] sm:$0xff]  ;;  %v8533_v9 = vcombine.low %v4124_v33, %v4128_v34 }
 0x289   :  { %v8544_v56 = vcombine.high %v4133_v47, %v4137_v49  ;;  %v8543_v29 = vcombine.low %v4133_v47, %v4137_v49  ;;  %v4173_v33 = vld [vmem:[#allocation2 + $0x1908] sm:$0xff] }
 0x28a   :  { %v4177_v34 = vld [vmem:[#allocation2 + $0x1928] sm:$0xff] }
 0x28b   :  { %7115 = vmatpush1.bf16.msra.mxu0 %v8485_v23  ;;  %7279 = vmatpush1.bf16.msra.mxu1 %v8487_v60  ;;  %v4144_v23 = vld [vmem:[#allocation2 + $0x1820] sm:$0xff]  ;;  %v9156_v60 = vrot.slane %v4440_v45, %v9035_v53  ;;  %v8583_v47 = vcombine.low %v4173_v33, %v4177_v34 }
 0x28c   :  { %7116 = vmatprep.subr.bf16.mxu0 %v8494_v61  ;;  %7280 = vmatprep.subr.bf16.mxu1 %v8496_v62  ;;  %v4141_v61 = vld [vmem:[#allocation2 + $0x1808] sm:$0xff]  ;;  %v8550_v1 = vcombine.high %v4140_v57, %v4144_v23  ;;  %v8549_v38 = vcombine.low %v4140_v57, %v4144_v23 }
 0x28d   :  { %v4145_v62 = vld [vmem:[#allocation2 + $0x1828] sm:$0xff] }
 0x28e   :  { %v8552_v2 = vcombine.high %v4141_v61, %v4145_v62  ;;  %v8551_v10 = vcombine.low %v4141_v61, %v4145_v62  ;;  %v4193_v57 = vld [vmem:[#allocation2 + $0x19a8] sm:$0xff]  ;;  %v8591_v61 = vcombine.low %v4181_v42, %v4185_v44 }
 0x28f   :  { %7117 = vmatpush1.bf16.msra.mxu0 %v8493_v4  ;;  %7281 = vmatpush1.bf16.msra.mxu1 %v8495_v32  ;;  %v4152_v4 = vld [vmem:[#allocation2 + $0x1860] sm:$0xff]  ;;  %v4456_v32 = vcombine.high %v9156_v60, %v9156_v60 }
 0x290   :  { %7118 = vmatprep.subr.bf16.mxu0 %v8502_v6  ;;  %7282 = vmatprep.subr.bf16.mxu1 %v8504_v7  ;;  %v9162_v6 = vcombine.high %v9143_v40, %v9143_v40  ;;  %v4149_v7 = vld [vmem:[#allocation2 + $0x1848] sm:$0xff]  ;;  %v8558_v12 = vcombine.high %v4148_v3, %v4152_v4  ;;  %v8557_v58 = vcombine.low %v4148_v3, %v4152_v4 }
 0x291   :  { %v8559_v48 = vcombine.low %v4149_v7, %v4153_v8  ;;  %v4201_v3 = vld [vmem:[#allocation2 + $0x19e8] sm:$0xff] }
 0x293   :  { %7119 = vmatpush1.bf16.msra.mxu0 %v8501_v13  ;;  %7283 = vmatpush1.bf16.msra.mxu1 %v8503_v14  ;;  %v8560_v13 = vcombine.high %v4149_v7, %v4153_v8  ;;  %v4156_v14 = vld [vmem:[#allocation2 + $0x1880] sm:$0xff] }
 0x294   :  { %7120 = vmatprep.subr.bf16.mxu0 %v8510_v15  ;;  %7284 = vmatprep.subr.bf16.mxu1 %v8512_v17  ;;  %v4160_v15 = vld [vmem:[#allocation2 + $0x18a0] sm:$0xff]  ;;  %v9165_v17 = vrot.slane %v4456_v32, %v9035_v53 }
 0x295   :  { %v8565_v27 = vcombine.low %v4156_v14, %v4160_v15 }
 0x297   :  { %7121 = vmatpush1.bf16.msra.mxu0 %v8509_v20  ;;  %7285 = vmatpush1.bf16.msra.mxu1 %v8511_v21  ;;  %v8566_v20 = vcombine.high %v4156_v14, %v4160_v15  ;;  %v8568_v21 = vcombine.high %v4157_v18, %v4161_v19 }
 0x298   :  { %7122 = vmatprep.subr.bf16.mxu0 %v8518_v22  ;;  %7286 = vmatprep.subr.bf16.mxu1 %v8520_v24  ;;  %v4164_v22 = vld [vmem:[#allocation2 + $0x18c0] sm:$0xff] }
 0x299   :  { %v4168_v24 = vld [vmem:[#allocation2 + $0x18e0] sm:$0xff] }
 0x29a   :  { %v8573_v35 = vcombine.low %v4164_v22, %v4168_v24 }
 0x29b   :  { %7123 = vmatpush1.bf16.msra.mxu0 %v8517_v30  ;;  %7287 = vmatpush1.bf16.msra.mxu1 %v8519_v31  ;;  %v8574_v30 = vcombine.high %v4164_v22, %v4168_v24  ;;  %v8576_v31 = vcombine.high %v4165_v25, %v4169_v26 }
 0x29c   :  { %7124 = vmatprep.subr.bf16.mxu0 %v8526_v63  ;;  %7288 = vmatprep.subr.bf16.mxu1 %v8528_v59  ;;  %v4172_v63 = vld [vmem:[#allocation2 + $0x1900] sm:$0xff] }
 0x29d   :  { %v4176_v59 = vld [vmem:[#allocation2 + $0x1920] sm:$0xff] }
 0x29e   :  { %v8581_v45 = vcombine.low %v4172_v63, %v4176_v59 }
 0x29f   :  { %7125 = vmatpush1.bf16.msra.mxu0 %v8525_v37  ;;  %7289 = vmatpush1.bf16.msra.mxu1 %v8527_v39  ;;  %v8582_v37 = vcombine.high %v4172_v63, %v4176_v59  ;;  %v8584_v39 = vcombine.high %v4173_v33, %v4177_v34 }
 0x2a0   :  { %7126 = vmatprep.subr.bf16.mxu0 %v8534_v16  ;;  %7290 = vmatprep.subr.bf16.mxu1 %v8536_v41  ;;  %v4180_v16 = vld [vmem:[#allocation2 + $0x1940] sm:$0xff] }
 0x2a1   :  { %v4184_v41 = vld [vmem:[#allocation2 + $0x1960] sm:$0xff] }
 0x2a2   :  { %v8590_v49 = vcombine.high %v4180_v16, %v4184_v41  ;;  %v8589_v23 = vcombine.low %v4180_v16, %v4184_v41 }
 0x2a3   :  { %7127 = vmatpush1.bf16.msra.mxu0 %v8533_v9  ;;  %7291 = vmatpush1.bf16.msra.mxu1 %v8535_v11  ;;  %v8592_v9 = vcombine.high %v4181_v42, %v4185_v44  ;;  %v4188_v11 = vld [vmem:[#allocation2 + $0x1980] sm:$0xff] }
 0x2a4   :  { %7128 = vmatprep.subr.bf16.mxu0 %v8542_v54  ;;  %7292 = vmatprep.subr.bf16.mxu1 %v8544_v56  ;;  %v4192_v54 = vld [vmem:[#allocation2 + $0x19a0] sm:$0xff]  ;;  %v4189_v56 = vld [vmem:[#allocation2 + $0x1988] sm:$0xff] }
 0x2a5   :  { %v8598_v62 = vcombine.high %v4188_v11, %v4192_v54  ;;  %v8597_v4 = vcombine.low %v4188_v11, %v4192_v54  ;;  %v8599_v32 = vcombine.low %v4189_v56, %v4193_v57 }
 0x2a7   :  { %7129 = vmatpush1.bf16.msra.mxu0 %v8541_v0  ;;  %7293 = vmatpush1.bf16.msra.mxu1 %v8543_v29  ;;  %v8600_v0 = vcombine.high %v4189_v56, %v4193_v57  ;;  %v4196_v29 = vld [vmem:[#allocation2 + $0x19c0] sm:$0xff] }
 0x2a8   :  { %7139 = vmatprep.subr.bf16.mxu0 %v8550_v1  ;;  %7303 = vmatprep.subr.bf16.mxu1 %v8552_v2  ;;  %v4200_v1 = vld [vmem:[#allocation2 + $0x19e0] sm:$0xff]  ;;  %v4197_v2 = vld [vmem:[#allocation2 + $0x19c8] sm:$0xff] }
 0x2a9   :  { %v8606_v7 = vcombine.high %v4196_v29, %v4200_v1  ;;  %v8608_v8 = vcombine.high %v4197_v2, %v4201_v3  ;;  %v8605_v14 = vcombine.low %v4196_v29, %v4200_v1  ;;  %v8607_v15 = vcombine.low %v4197_v2, %v4201_v3 }
 0x2aa   :  { %7131 = vmatmul.mubr.bf16.vlgmr.msra.gmra.mrb[8].mxu0 %v9162_v6  ;;  %7295 = vmatmul.mubr.bf16.vlgmr.msra.gmra.mrb[8].mxu1 %v9162_v6 }
 0x2ab   :  { %7140 = vmatpush1.bf16.msra.mxu0 %v8549_v38  ;;  %7304 = vmatpush1.bf16.msra.mxu1 %v8551_v10  ;;  %v4204_v38 = vld [vmem:[#allocation2 + $0x1a00] sm:$0xff] }
 0x2ac   :  { %7141 = vmatprep.subr.bf16.mxu0 %v8558_v12  ;;  %7305 = vmatprep.subr.bf16.mxu1 %v8560_v13  ;;  %v4208_v10 = vld [vmem:[#allocation2 + $0x1a20] sm:$0xff]  ;;  %v4205_v12 = vld [vmem:[#allocation2 + $0x1a08] sm:$0xff] }
 0x2ad   :  { %7171 = vmatprep.mubr.bf16.mxu0 %v9165_v17  ;;  %7335 = vmatprep.mubr.bf16.mxu1 %v9165_v17  ;;  %v4209_v13 = vld [vmem:[#allocation2 + $0x1a28] sm:$0xff]  ;;  %v8614_v18 = vcombine.high %v4204_v38, %v4208_v10  ;;  %v8613_v22 = vcombine.low %v4204_v38, %v4208_v10 }
 0x2ae   :  { %v8616_v19 = vcombine.high %v4205_v12, %v4209_v13  ;;  %v8615_v24 = vcombine.low %v4205_v12, %v4209_v13 }
 0x2af   :  { %7142 = vmatpush1.bf16.msra.mxu0 %v8557_v58  ;;  %7306 = vmatpush1.bf16.msra.mxu1 %v8559_v48  ;;  %v4212_v58 = vld [vmem:[#allocation2 + $0x1a40] sm:$0xff] }
 0x2b0   :  { %7143 = vmatprep.subr.bf16.mxu0 %v8566_v20  ;;  %7307 = vmatprep.subr.bf16.mxu1 %v8568_v21  ;;  %v4216_v48 = vld [vmem:[#allocation2 + $0x1a60] sm:$0xff]  ;;  %v4213_v20 = vld [vmem:[#allocation2 + $0x1a48] sm:$0xff] }
 0x2b1   :  { %v4217_v21 = vld [vmem:[#allocation2 + $0x1a68] sm:$0xff]  ;;  %v8622_v25 = vcombine.high %v4212_v58, %v4216_v48  ;;  %v8621_v63 = vcombine.low %v4212_v58, %v4216_v48 }
 0x2b2   :  { %v8624_v26 = vcombine.high %v4213_v20, %v4217_v21  ;;  %v8623_v59 = vcombine.low %v4213_v20, %v4217_v21 }
 0x2b3   :  { %7144 = vmatpush1.bf16.msra.mxu0 %v8565_v27  ;;  %7308 = vmatpush1.bf16.msra.mxu1 %v8567_v28  ;;  %v4220_v27 = vld [vmem:[#allocation2 + $0x1a80] sm:$0xff] }
 0x2b4   :  { %7145 = vmatprep.subr.bf16.mxu0 %v8574_v30  ;;  %7309 = vmatprep.subr.bf16.mxu1 %v8576_v31  ;;  %v4224_v28 = vld [vmem:[#allocation2 + $0x1aa0] sm:$0xff]  ;;  %v4221_v30 = vld [vmem:[#allocation2 + $0x1a88] sm:$0xff] }
 0x2b5   :  { %v4225_v31 = vld [vmem:[#allocation2 + $0x1aa8] sm:$0xff]  ;;  %v8630_v33 = vcombine.high %v4220_v27, %v4224_v28  ;;  %v8629_v16 = vcombine.low %v4220_v27, %v4224_v28 }
 0x2b6   :  { %v8632_v34 = vcombine.high %v4221_v30, %v4225_v31  ;;  %v8631_v41 = vcombine.low %v4221_v30, %v4225_v31 }
 0x2b7   :  { %7146 = vmatpush1.bf16.msra.mxu0 %v8573_v35  ;;  %7310 = vmatpush1.bf16.msra.mxu1 %v8575_v36  ;;  %v4228_v35 = vld [vmem:[#allocation2 + $0x1ac0] sm:$0xff] }
 0x2b8   :  { %7147 = vmatprep.subr.bf16.mxu0 %v8582_v37  ;;  %7311 = vmatprep.subr.bf16.mxu1 %v8584_v39  ;;  %v4232_v36 = vld [vmem:[#allocation2 + $0x1ae0] sm:$0xff]  ;;  %v4229_v37 = vld [vmem:[#allocation2 + $0x1ac8] sm:$0xff] }
 0x2b9   :  { %v4233_v39 = vld [vmem:[#allocation2 + $0x1ae8] sm:$0xff]  ;;  %v8638_v42 = vcombine.high %v4228_v35, %v4232_v36  ;;  %v8637_v11 = vcombine.low %v4228_v35, %v4232_v36 }
 0x2ba   :  { %v8640_v44 = vcombine.high %v4229_v37, %v4233_v39  ;;  %v8639_v54 = vcombine.low %v4229_v37, %v4233_v39  ;;  %v4281_v35 = vld [vmem:[#allocation2 + $0x1c68] sm:$0xff] }
 0x2bb   :  { %7148 = vmatpush1.bf16.msra.mxu0 %v8581_v45  ;;  %7312 = vmatpush1.bf16.msra.mxu1 %v8583_v47  ;;  %v4236_v45 = vld [vmem:[#allocation2 + $0x1b00] sm:$0xff] }
 0x2bc   :  { %7149 = vmatprep.subr.bf16.mxu0 %v8590_v49  ;;  %7313 = vmatprep.subr.bf16.mxu1 %v8592_v9  ;;  %v4240_v47 = vld [vmem:[#allocation2 + $0x1b20] sm:$0xff]  ;;  %v4237_v49 = vld [vmem:[#allocation2 + $0x1b08] sm:$0xff] }
 0x2bd   :  { %v4241_v9 = vld [vmem:[#allocation2 + $0x1b28] sm:$0xff]  ;;  %v8646_v56 = vcombine.high %v4236_v45, %v4240_v47  ;;  %v8645_v29 = vcombine.low %v4236_v45, %v4240_v47 }
 0x2be   :  { %v8648_v57 = vcombine.high %v4237_v49, %v4241_v9  ;;  %v8647_v1 = vcombine.low %v4237_v49, %v4241_v9 }
 0x2bf   :  { %7150 = vmatpush1.bf16.msra.mxu0 %v8589_v23  ;;  %7314 = vmatpush1.bf16.msra.mxu1 %v8591_v61  ;;  %v4244_v23 = vld [vmem:[#allocation2 + $0x1b40] sm:$0xff] }
 0x2c0   :  { %7151 = vmatprep.subr.bf16.mxu0 %v8598_v62  ;;  %7315 = vmatprep.subr.bf16.mxu1 %v8600_v0  ;;  %v4248_v61 = vld [vmem:[#allocation2 + $0x1b60] sm:$0xff]  ;;  %v4245_v62 = vld [vmem:[#allocation2 + $0x1b48] sm:$0xff] }
 0x2c1   :  { %v4249_v0 = vld [vmem:[#allocation2 + $0x1b68] sm:$0xff]  ;;  %v8654_v2 = vcombine.high %v4244_v23, %v4248_v61  ;;  %v8653_v38 = vcombine.low %v4244_v23, %v4248_v61 }
 0x2c2   :  { %v8656_v3 = vcombine.high %v4245_v62, %v4249_v0  ;;  %v8655_v10 = vcombine.low %v4245_v62, %v4249_v0 }
 0x2c3   :  { %7152 = vmatpush1.bf16.msra.mxu0 %v8597_v4  ;;  %7316 = vmatpush1.bf16.msra.mxu1 %v8599_v32  ;;  %v4252_v4 = vld [vmem:[#allocation2 + $0x1b80] sm:$0xff] }
 0x2c4   :  { %7153 = vmatprep.subr.bf16.mxu0 %v8606_v7  ;;  %7317 = vmatprep.subr.bf16.mxu1 %v8608_v8  ;;  %v4256_v32 = vld [vmem:[#allocation2 + $0x1ba0] sm:$0xff]  ;;  %v4253_v7 = vld [vmem:[#allocation2 + $0x1b88] sm:$0xff] }
 0x2c5   :  { %v4257_v8 = vld [vmem:[#allocation2 + $0x1ba8] sm:$0xff]  ;;  %v8662_v12 = vcombine.high %v4252_v4, %v4256_v32  ;;  %v8661_v58 = vcombine.low %v4252_v4, %v4256_v32 }
 0x2c6   :  { %v8664_v13 = vcombine.high %v4253_v7, %v4257_v8  ;;  %v8663_v48 = vcombine.low %v4253_v7, %v4257_v8 }
 0x2c7   :  { %7154 = vmatpush1.bf16.msra.mxu0 %v8605_v14  ;;  %7318 = vmatpush1.bf16.msra.mxu1 %v8607_v15  ;;  %v4260_v14 = vld [vmem:[#allocation2 + $0x1bc0] sm:$0xff] }
 0x2c8   :  { %7155 = vmatprep.subr.bf16.mxu0 %v8614_v18  ;;  %7319 = vmatprep.subr.bf16.mxu1 %v8616_v19  ;;  %v4264_v15 = vld [vmem:[#allocation2 + $0x1be0] sm:$0xff]  ;;  %v4261_v18 = vld [vmem:[#allocation2 + $0x1bc8] sm:$0xff] }
 0x2c9   :  { %v4265_v19 = vld [vmem:[#allocation2 + $0x1be8] sm:$0xff]  ;;  %v8670_v20 = vcombine.high %v4260_v14, %v4264_v15  ;;  %v8669_v27 = vcombine.low %v4260_v14, %v4264_v15 }
 0x2ca   :  { %v8672_v21 = vcombine.high %v4261_v18, %v4265_v19  ;;  %v8671_v28 = vcombine.low %v4261_v18, %v4265_v19 }
 0x2cb   :  { %7156 = vmatpush1.bf16.msra.mxu0 %v8613_v22  ;;  %7320 = vmatpush1.bf16.msra.mxu1 %v8615_v24  ;;  %v4268_v22 = vld [vmem:[#allocation2 + $0x1c00] sm:$0xff] }
 0x2cc   :  { %7157 = vmatprep.subr.bf16.mxu0 %v8622_v25  ;;  %7321 = vmatprep.subr.bf16.mxu1 %v8624_v26  ;;  %v4272_v24 = vld [vmem:[#allocation2 + $0x1c20] sm:$0xff]  ;;  %v4269_v25 = vld [vmem:[#allocation2 + $0x1c08] sm:$0xff] }
 0x2cd   :  { %v4273_v26 = vld [vmem:[#allocation2 + $0x1c28] sm:$0xff]  ;;  %v8678_v30 = vcombine.high %v4268_v22, %v4272_v24  ;;  %v8677_v36 = vcombine.low %v4268_v22, %v4272_v24 }
 0x2ce   :  { %v8680_v31 = vcombine.high %v4269_v25, %v4273_v26  ;;  %v8679_v37 = vcombine.low %v4269_v25, %v4273_v26 }
 0x2cf   :  { %7158 = vmatpush1.bf16.msra.mxu0 %v8621_v63  ;;  %7322 = vmatpush1.bf16.msra.mxu1 %v8623_v59  ;;  %v4276_v63 = vld [vmem:[#allocation2 + $0x1c40] sm:$0xff] }
 0x2d0   :  { %7159 = vmatprep.subr.bf16.mxu0 %v8630_v33  ;;  %7323 = vmatprep.subr.bf16.mxu1 %v8632_v34  ;;  %v4280_v59 = vld [vmem:[#allocation2 + $0x1c60] sm:$0xff]  ;;  %v9173_v33 = vrot.slane %v9156_v60, %v9035_v53  ;;  %v4277_v34 = vld [vmem:[#allocation2 + $0x1c48] sm:$0xff] }
 0x2d1   :  { %v8686_v39 = vcombine.high %v4276_v63, %v4280_v59  ;;  %v4285_v53 = vld [vmem:[#allocation2 + $0x1c88] sm:$0xff]  ;;  %v8685_v45 = vcombine.low %v4276_v63, %v4280_v59  ;;  %v8687_v47 = vcombine.low %v4277_v34, %v4281_v35 }
 0x2d2   :  { %v4289_v60 = vld [vmem:[#allocation2 + $0x1ca8] sm:$0xff] }
 0x2d3   :  { %7160 = vmatpush1.bf16.msra.mxu0 %v8629_v16  ;;  %7324 = vmatpush1.bf16.msra.mxu1 %v8631_v41  ;;  %v8688_v16 = vcombine.high %v4277_v34, %v4281_v35  ;;  %v4284_v41 = vld [vmem:[#allocation2 + $0x1c80] sm:$0xff]  ;;  %v8696_v9 = vcombine.high %v4285_v53, %v4289_v60  ;;  %v8695_v61 = vcombine.low %v4285_v53, %v4289_v60  ;;  %v4325_v59 = vld [vmem:[#allocation2 + $0x1dc8] sm:$0xff] }
 0x2d4   :  { %7161 = vmatprep.subr.bf16.mxu0 %v8638_v42  ;;  %7325 = vmatprep.subr.bf16.mxu1 %v8640_v44  ;;  %v4288_v42 = vld [vmem:[#allocation2 + $0x1ca0] sm:$0xff]  ;;  %v9177_v44 = vcombine.high %v9165_v17, %v9165_v17  ;;  %v4329_v34 = vld [vmem:[#allocation2 + $0x1de8] sm:$0xff] }
 0x2d5   :  { %v8694_v49 = vcombine.high %v4284_v41, %v4288_v42  ;;  %v8693_v23 = vcombine.low %v4284_v41, %v4288_v42  ;;  %v8736_v60 = vcombine.high %v4325_v59, %v4329_v34 }
 0x2d7   :  { %7162 = vmatpush1.bf16.msra.mxu0 %v8637_v11  ;;  %7326 = vmatpush1.bf16.msra.mxu1 %v8639_v54  ;;  %v4292_v11 = vld [vmem:[#allocation2 + $0x1cc0] sm:$0xff] }
 0x2d8   :  { %7163 = vmatprep.subr.bf16.mxu0 %v8646_v56  ;;  %7327 = vmatprep.subr.bf16.mxu1 %v8648_v57  ;;  %v4296_v54 = vld [vmem:[#allocation2 + $0x1ce0] sm:$0xff]  ;;  %v4293_v56 = vld [vmem:[#allocation2 + $0x1cc8] sm:$0xff] }
 0x2d9   :  { %v4297_v57 = vld [vmem:[#allocation2 + $0x1ce8] sm:$0xff]  ;;  %v8702_v62 = vcombine.high %v4292_v11, %v4296_v54  ;;  %v8701_v4 = vcombine.low %v4292_v11, %v4296_v54  ;;  %v8735_v54 = vcombine.low %v4325_v59, %v4329_v34 }
 0x2da   :  { %v8704_v0 = vcombine.high %v4293_v56, %v4297_v57  ;;  %v8703_v32 = vcombine.low %v4293_v56, %v4297_v57 }
 0x2db   :  { %7164 = vmatpush1.bf16.msra.mxu0 %v8645_v29  ;;  %7328 = vmatpush1.bf16.msra.mxu1 %v8647_v1  ;;  %v4300_v29 = vld [vmem:[#allocation2 + $0x1d00] sm:$0xff] }
 0x2dc   :  { %7165 = vmatprep.subr.bf16.mxu0 %v8654_v2  ;;  %7329 = vmatprep.subr.bf16.mxu1 %v8656_v3  ;;  %v4304_v1 = vld [vmem:[#allocation2 + $0x1d20] sm:$0xff]  ;;  %v4301_v2 = vld [vmem:[#allocation2 + $0x1d08] sm:$0xff] }
 0x2dd   :  { %v4305_v3 = vld [vmem:[#allocation2 + $0x1d28] sm:$0xff]  ;;  %v8710_v7 = vcombine.high %v4300_v29, %v4304_v1  ;;  %v8709_v14 = vcombine.low %v4300_v29, %v4304_v1 }
 0x2de   :  { %v8712_v8 = vcombine.high %v4301_v2, %v4305_v3  ;;  %v8711_v15 = vcombine.low %v4301_v2, %v4305_v3 }
 0x2df   :  { %7166 = vmatpush1.bf16.msra.mxu0 %v8653_v38  ;;  %7330 = vmatpush1.bf16.msra.mxu1 %v8655_v10  ;;  %v4308_v38 = vld [vmem:[#allocation2 + $0x1d40] sm:$0xff] }
 0x2e0   :  { %7167 = vmatprep.subr.bf16.mxu0 %v8662_v12  ;;  %7331 = vmatprep.subr.bf16.mxu1 %v8664_v13  ;;  %v4312_v10 = vld [vmem:[#allocation2 + $0x1d60] sm:$0xff]  ;;  %v4309_v12 = vld [vmem:[#allocation2 + $0x1d48] sm:$0xff] }
 0x2e1   :  { %v4313_v13 = vld [vmem:[#allocation2 + $0x1d68] sm:$0xff]  ;;  %v8718_v18 = vcombine.high %v4308_v38, %v4312_v10  ;;  %v8717_v22 = vcombine.low %v4308_v38, %v4312_v10 }
 0x2e2   :  { %v8720_v19 = vcombine.high %v4309_v12, %v4313_v13  ;;  %v8719_v24 = vcombine.low %v4309_v12, %v4313_v13 }
 0x2e3   :  { %7168 = vmatpush1.bf16.msra.mxu0 %v8661_v58  ;;  %7332 = vmatpush1.bf16.msra.mxu1 %v8663_v48  ;;  %v4316_v58 = vld [vmem:[#allocation2 + $0x1d80] sm:$0xff] }
 0x2e4   :  { %7169 = vmatprep.subr.bf16.mxu0 %v8670_v20  ;;  %7333 = vmatprep.subr.bf16.mxu1 %v8672_v21  ;;  %v4320_v48 = vld [vmem:[#allocation2 + $0x1da0] sm:$0xff]  ;;  %v4317_v20 = vld [vmem:[#allocation2 + $0x1d88] sm:$0xff] }
 0x2e5   :  { %v4321_v21 = vld [vmem:[#allocation2 + $0x1da8] sm:$0xff]  ;;  %v8726_v25 = vcombine.high %v4316_v58, %v4320_v48 }
 0x2e6   :  { %v8727_v41 = vcombine.low %v4317_v20, %v4321_v21 }
 0x2e7   :  { %7170 = vmatpush1.bf16.msra.mxu0 %v8669_v27  ;;  %7334 = vmatpush1.bf16.msra.mxu1 %v8671_v28  ;;  %v8728_v27 = vcombine.high %v4317_v20, %v4321_v21  ;;  %v4324_v28 = vld [vmem:[#allocation2 + $0x1dc0] sm:$0xff] }
 0x2e8   :  { %7180 = vmatprep.subr.bf16.mxu0 %v8678_v30  ;;  %7344 = vmatprep.subr.bf16.mxu1 %v8680_v31  ;;  %v4328_v30 = vld [vmem:[#allocation2 + $0x1de0] sm:$0xff] }
 0x2e9   :  { %v8734_v42 = vcombine.high %v4324_v28, %v4328_v30  ;;  %v8733_v11 = vcombine.low %v4324_v28, %v4328_v30 }
 0x2ea   :  { %7172 = vmatmul.mubr.bf16.vlgmr.msra.gmra.mrb[8].mxu0 %v9173_v33  ;;  %7336 = vmatmul.mubr.bf16.vlgmr.msra.gmra.mrb[8].mxu1 %v9173_v33 }
 0x2eb   :  { %7181 = vmatpush1.bf16.msra.mxu0 %v8677_v36  ;;  %7345 = vmatpush1.bf16.msra.mxu1 %v8679_v37  ;;  %v8725_v37 = vcombine.low %v4316_v58, %v4320_v48 }
 0x2ec   :  { %7182 = vmatprep.subr.bf16.mxu0 %v8686_v39  ;;  %7346 = vmatprep.subr.bf16.mxu1 %v8688_v16 }
 0x2ed   :  { %7212 = vmatprep.mubr.bf16.mxu0 %v9177_v44  ;;  %7376 = vmatprep.mubr.bf16.mxu1 %v9177_v44 }
 0x2ef   :  { %7183 = vmatpush1.bf16.msra.mxu0 %v8685_v45  ;;  %7347 = vmatpush1.bf16.msra.mxu1 %v8687_v47  ;;  %v4332_v45 = vld [vmem:[#allocation2 + $0x1e00] sm:$0xff] }
 0x2f0   :  { %7184 = vmatprep.subr.bf16.mxu0 %v8694_v49  ;;  %7348 = vmatprep.subr.bf16.mxu1 %v8696_v9  ;;  %v4336_v47 = vld [vmem:[#allocation2 + $0x1e20] sm:$0xff]  ;;  %v4333_v49 = vld [vmem:[#allocation2 + $0x1e08] sm:$0xff] }
 0x2f1   :  { %v4337_v9 = vld [vmem:[#allocation2 + $0x1e28] sm:$0xff]  ;;  %v8742_v56 = vcombine.high %v4332_v45, %v4336_v47  ;;  %v8741_v29 = vcombine.low %v4332_v45, %v4336_v47  ;;  %v4380_v45 = vld [vmem:[#allocation2 + $0x1f80] sm:$0xff] }
 0x2f2   :  { %v8744_v57 = vcombine.high %v4333_v49, %v4337_v9  ;;  %v8743_v1 = vcombine.low %v4333_v49, %v4337_v9  ;;  %v4384_v47 = vld [vmem:[#allocation2 + $0x1fa0] sm:$0xff]  ;;  %v4381_v49 = vld [vmem:[#allocation2 + $0x1f88] sm:$0xff] }
 0x2f3   :  { %7185 = vmatpush1.bf16.msra.mxu0 %v8693_v23  ;;  %7349 = vmatpush1.bf16.msra.mxu1 %v8695_v61  ;;  %v4340_v23 = vld [vmem:[#allocation2 + $0x1e40] sm:$0xff]  ;;  %v4385_v9 = vld [vmem:[#allocation2 + $0x1fa8] sm:$0xff] }
 0x2f4   :  { %7186 = vmatprep.subr.bf16.mxu0 %v8702_v62  ;;  %7350 = vmatprep.subr.bf16.mxu1 %v8704_v0  ;;  %v4344_v61 = vld [vmem:[#allocation2 + $0x1e60] sm:$0xff]  ;;  %v4341_v62 = vld [vmem:[#allocation2 + $0x1e48] sm:$0xff] }
 0x2f5   :  { %v4345_v0 = vld [vmem:[#allocation2 + $0x1e68] sm:$0xff]  ;;  %v8750_v2 = vcombine.high %v4340_v23, %v4344_v61  ;;  %v8749_v38 = vcombine.low %v4340_v23, %v4344_v61  ;;  %v4388_v23 = vld [vmem:[#allocation2 + $0x1fc0] sm:$0xff] }
 0x2f6   :  { %v8752_v3 = vcombine.high %v4341_v62, %v4345_v0  ;;  %v8751_v10 = vcombine.low %v4341_v62, %v4345_v0  ;;  %v4392_v61 = vld [vmem:[#allocation2 + $0x1fe0] sm:$0xff]  ;;  %v4389_v62 = vld [vmem:[#allocation2 + $0x1fc8] sm:$0xff] }
 0x2f7   :  { %7187 = vmatpush1.bf16.msra.mxu0 %v8701_v4  ;;  %7351 = vmatpush1.bf16.msra.mxu1 %v8703_v32  ;;  %v4348_v4 = vld [vmem:[#allocation2 + $0x1e80] sm:$0xff]  ;;  %v4393_v0 = vld [vmem:[#allocation2 + $0x1fe8] sm:$0xff] }
 0x2f8   :  { %7188 = vmatprep.subr.bf16.mxu0 %v8710_v7  ;;  %7352 = vmatprep.subr.bf16.mxu1 %v8712_v8  ;;  %v4352_v32 = vld [vmem:[#allocation2 + $0x1ea0] sm:$0xff]  ;;  %v4349_v7 = vld [vmem:[#allocation2 + $0x1e88] sm:$0xff] }
 0x2f9   :  { %v4353_v8 = vld [vmem:[#allocation2 + $0x1ea8] sm:$0xff]  ;;  %v8758_v12 = vcombine.high %v4348_v4, %v4352_v32  ;;  %v8757_v58 = vcombine.low %v4348_v4, %v4352_v32  ;;  %v3886_v4 = vld [vmem:[#allocation2 + $0x1010] sm:$0xff] }
 0x2fa   :  { %v8760_v13 = vcombine.high %v4349_v7, %v4353_v8  ;;  %v8759_v48 = vcombine.low %v4349_v7, %v4353_v8  ;;  %v3890_v32 = vld [vmem:[#allocation2 + $0x1030] sm:$0xff]  ;;  %v3887_v7 = vld [vmem:[#allocation2 + $0x1018] sm:$0xff] }
 0x2fb   :  { %7189 = vmatpush1.bf16.msra.mxu0 %v8709_v14  ;;  %7353 = vmatpush1.bf16.msra.mxu1 %v8711_v15  ;;  %v4356_v14 = vld [vmem:[#allocation2 + $0x1ec0] sm:$0xff]  ;;  %v3891_v8 = vld [vmem:[#allocation2 + $0x1038] sm:$0xff] }
 0x2fc   :  { %7190 = vmatprep.subr.bf16.mxu0 %v8718_v18  ;;  %7354 = vmatprep.subr.bf16.mxu1 %v8720_v19  ;;  %v4360_v15 = vld [vmem:[#allocation2 + $0x1ee0] sm:$0xff]  ;;  %v4357_v18 = vld [vmem:[#allocation2 + $0x1ec8] sm:$0xff] }
 0x2fd   :  { %v9183_v26 = vpop.f32.mrb[4].mxu0  ;;  %v9185_v31 = vpop.f32.mrb[4].mxu1  ;;  %v4361_v19 = vld [vmem:[#allocation2 + $0x1ee8] sm:$0xff]  ;;  %v8766_v20 = vcombine.high %v4356_v14, %v4360_v15  ;;  %v8765_v28 = vcombine.low %v4356_v14, %v4360_v15  ;;  %v3894_v14 = vld [vmem:[#allocation2 + $0x1050] sm:$0xff] }
 0x2fe   :  { %v9187_v63 = vpop.f32.mrb[5].mxu0  ;;  %v9189_v35 = vpop.f32.mrb[5].mxu1  ;;  %v8768_v21 = vcombine.high %v4357_v18, %v4361_v19  ;;  %v8767_v30 = vcombine.low %v4357_v18, %v4361_v19  ;;  %v3898_v15 = vld [vmem:[#allocation2 + $0x1070] sm:$0xff]  ;;  %v9193_v18 = vcombine.high %v9173_v33, %v9173_v33  ;;  %v3895_v19 = vld [vmem:[#allocation2 + $0x1058] sm:$0xff] }
 0x2ff   :  { %v3707_v36 = vpop.f32.mrb[6].mxu0  ;;  %7191 = vmatpush1.bf16.msra.mxu0 %v8717_v22  ;;  %v3871_v39 = vpop.f32.mrb[6].mxu1  ;;  %7355 = vmatpush1.bf16.msra.mxu1 %v8719_v24  ;;  %v4364_v22 = vld [vmem:[#allocation2 + $0x1f00] sm:$0xff] }
 0x300   :  { %v3708_v16 = vpop.f32.mrb[7].mxu0  ;;  %7192 = vmatprep.subr.bf16.mxu0 %v8726_v25  ;;  %v3872_v53 = vpop.f32.mrb[7].mxu1  ;;  %7356 = vmatprep.subr.bf16.mxu1 %v8728_v27  ;;  %v4368_v24 = vld [vmem:[#allocation2 + $0x1f20] sm:$0xff]  ;;  %v4365_v25 = vld [vmem:[#allocation2 + $0x1f08] sm:$0xff] }
 0x301   :  { %v4369_v27 = vld [vmem:[#allocation2 + $0x1f28] sm:$0xff]  ;;  %v8774_v59 = vcombine.high %v4364_v22, %v4368_v24  ;;  %v4372_v36 = vld [vmem:[#allocation2 + $0x1f40] sm:$0xff] }
 0x302   :  { %v8776_v34 = vcombine.high %v4365_v25, %v4369_v27  ;;  %v4373_v39 = vld [vmem:[#allocation2 + $0x1f48] sm:$0xff] }
 0x303   :  { %7193 = vmatpush1.bf16.msra.mxu0 %v8725_v37  ;;  %7357 = vmatpush1.bf16.msra.mxu1 %v8727_v41  ;;  %v4376_v37 = vld [vmem:[#allocation2 + $0x1f60] sm:$0xff]  ;;  %v4377_v16 = vld [vmem:[#allocation2 + $0x1f68] sm:$0xff]  ;;  %v8773_v41 = vcombine.low %v4364_v22, %v4368_v24  ;;  %v3902_v24 = vld [vmem:[#allocation2 + $0x1090] sm:$0xff] }
 0x304   :  { %7194 = vmatprep.subr.bf16.mxu0 %v8734_v42  ;;  %7358 = vmatprep.subr.bf16.mxu1 %v8736_v60  ;;  %v8775_v42 = vcombine.low %v4365_v25, %v4369_v27  ;;  %v8782_v53 = vcombine.high %v4372_v36, %v4376_v37  ;;  %v8784_v60 = vcombine.high %v4373_v39, %v4377_v16  ;;  %v3906_v25 = vld [vmem:[#allocation2 + $0x10b0] sm:$0xff]  ;;  %v3903_v27 = vld [vmem:[#allocation2 + $0x1098] sm:$0xff] }
 0x307   :  { %7195 = vmatpush1.bf16.msra.mxu0 %v8733_v11  ;;  %7359 = vmatpush1.bf16.msra.mxu1 %v8735_v54  ;;  %v8781_v11 = vcombine.low %v4372_v36, %v4376_v37  ;;  %v8783_v54 = vcombine.low %v4373_v39, %v4377_v16  ;;  %v3910_v37 = vld [vmem:[#allocation2 + $0x10d0] sm:$0xff]  ;;  %v3911_v16 = vld [vmem:[#allocation2 + $0x10d8] sm:$0xff] }
 0x308   :  { %7196 = vmatprep.subr.bf16.mxu0 %v8742_v56  ;;  %7360 = vmatprep.subr.bf16.mxu1 %v8744_v57  ;;  %v8790_v56 = vcombine.high %v4380_v45, %v4384_v47  ;;  %v8792_v57 = vcombine.high %v4381_v49, %v4385_v9  ;;  %v3914_v39 = vld [vmem:[#allocation2 + $0x10f0] sm:$0xff] }
 0x30b   :  { %7197 = vmatpush1.bf16.msra.mxu0 %v8741_v29  ;;  %7361 = vmatpush1.bf16.msra.mxu1 %v8743_v1  ;;  %v8789_v29 = vcombine.low %v4380_v45, %v4384_v47  ;;  %v8791_v1 = vcombine.low %v4381_v49, %v4385_v9  ;;  %v3918_v47 = vld [vmem:[#allocation2 + $0x1110] sm:$0xff]  ;;  %v3919_v9 = vld [vmem:[#allocation2 + $0x1118] sm:$0xff] }
 0x30c   :  { %7198 = vmatprep.subr.bf16.mxu0 %v8750_v2  ;;  %7362 = vmatprep.subr.bf16.mxu1 %v8752_v3  ;;  %v8798_v2 = vcombine.high %v4388_v23, %v4392_v61  ;;  %v8800_v3 = vcombine.high %v4389_v62, %v4393_v0  ;;  %v3922_v49 = vld [vmem:[#allocation2 + $0x1130] sm:$0xff] }
 0x30f   :  { %7199 = vmatpush1.bf16.msra.mxu0 %v8749_v38  ;;  %7363 = vmatpush1.bf16.msra.mxu1 %v8751_v10  ;;  %v8797_v38 = vcombine.low %v4388_v23, %v4392_v61  ;;  %v8799_v10 = vcombine.low %v4389_v62, %v4393_v0  ;;  %v3926_v23 = vld [vmem:[#allocation2 + $0x1150] sm:$0xff]  ;;  %v3927_v62 = vld [vmem:[#allocation2 + $0x1158] sm:$0xff] }
 0x310   :  { %7200 = vmatprep.subr.bf16.mxu0 %v8758_v12  ;;  %7364 = vmatprep.subr.bf16.mxu1 %v8760_v13  ;;  %v8298_v12 = vcombine.high %v3886_v4, %v3890_v32  ;;  %v8300_v13 = vcombine.high %v3887_v7, %v3891_v8  ;;  %v3930_v61 = vld [vmem:[#allocation2 + $0x1170] sm:$0xff]  ;;  %v3931_v0 = vld [vmem:[#allocation2 + $0x1178] sm:$0xff] }
 0x313   :  { %7201 = vmatpush1.bf16.msra.mxu0 %v8757_v58  ;;  %7365 = vmatpush1.bf16.msra.mxu1 %v8759_v48  ;;  %v3899_v58 = vld [vmem:[#allocation2 + $0x1078] sm:$0xff]  ;;  %v8297_v48 = vcombine.low %v3886_v4, %v3890_v32  ;;  %v3934_v4 = vld [vmem:[#allocation2 + $0x1190] sm:$0xff] }
 0x314   :  { %7202 = vmatprep.subr.bf16.mxu0 %v8766_v20  ;;  %7366 = vmatprep.subr.bf16.mxu1 %v8768_v21  ;;  %v8299_v20 = vcombine.low %v3887_v7, %v3891_v8  ;;  %v8306_v21 = vcombine.high %v3894_v14, %v3898_v15  ;;  %v8308_v22 = vcombine.high %v3895_v19, %v3899_v58  ;;  %v3938_v32 = vld [vmem:[#allocation2 + $0x11b0] sm:$0xff]  ;;  %v3935_v7 = vld [vmem:[#allocation2 + $0x1198] sm:$0xff] }
 0x315   :  { %v3939_v8 = vld [vmem:[#allocation2 + $0x11b8] sm:$0xff] }
 0x317   :  { %7203 = vmatpush1.bf16.msra.mxu0 %v8765_v28  ;;  %7367 = vmatpush1.bf16.msra.mxu1 %v8767_v30  ;;  %v3907_v28 = vld [vmem:[#allocation2 + $0x10b8] sm:$0xff]  ;;  %v8305_v30 = vcombine.low %v3894_v14, %v3898_v15  ;;  %v3942_v14 = vld [vmem:[#allocation2 + $0x11d0] sm:$0xff] }
 0x318   :  { %7204 = vmatprep.subr.bf16.mxu0 %v8774_v59  ;;  %7368 = vmatprep.subr.bf16.mxu1 %v8776_v34  ;;  %v8307_v59 = vcombine.low %v3895_v19, %v3899_v58  ;;  %v8314_v34 = vcombine.high %v3902_v24, %v3906_v25  ;;  %v8316_v36 = vcombine.high %v3903_v27, %v3907_v28  ;;  %v3946_v15 = vld [vmem:[#allocation2 + $0x11f0] sm:$0xff]  ;;  %v3943_v19 = vld [vmem:[#allocation2 + $0x11d8] sm:$0xff] }
 0x319   :  { %v3947_v58 = vld [vmem:[#allocation2 + $0x11f8] sm:$0xff] }
 0x31b   :  { %7205 = vmatpush1.bf16.msra.mxu0 %v8773_v41  ;;  %7369 = vmatpush1.bf16.msra.mxu1 %v8775_v42  ;;  %v3915_v41 = vld [vmem:[#allocation2 + $0x10f8] sm:$0xff]  ;;  %v8313_v42 = vcombine.low %v3902_v24, %v3906_v25  ;;  %v3950_v24 = vld [vmem:[#allocation2 + $0x1210] sm:$0xff] }
 0x31c   :  { %7206 = vmatprep.subr.bf16.mxu0 %v8782_v53  ;;  %7370 = vmatprep.subr.bf16.mxu1 %v8784_v60  ;;  %v8315_v53 = vcombine.low %v3903_v27, %v3907_v28  ;;  %v8322_v60 = vcombine.high %v3910_v37, %v3914_v39  ;;  %v8324_v45 = vcombine.high %v3911_v16, %v3915_v41  ;;  %v3954_v25 = vld [vmem:[#allocation2 + $0x1230] sm:$0xff]  ;;  %v3951_v27 = vld [vmem:[#allocation2 + $0x1218] sm:$0xff] }
 0x31d   :  { %v3955_v28 = vld [vmem:[#allocation2 + $0x1238] sm:$0xff] }
 0x31f   :  { %7207 = vmatpush1.bf16.msra.mxu0 %v8781_v11  ;;  %7371 = vmatpush1.bf16.msra.mxu1 %v8783_v54  ;;  %v3923_v11 = vld [vmem:[#allocation2 + $0x1138] sm:$0xff]  ;;  %v8321_v54 = vcombine.low %v3910_v37, %v3914_v39  ;;  %v3958_v37 = vld [vmem:[#allocation2 + $0x1250] sm:$0xff] }
 0x320   :  { %7208 = vmatprep.subr.bf16.mxu0 %v8790_v56  ;;  %7372 = vmatprep.subr.bf16.mxu1 %v8792_v57  ;;  %v8323_v56 = vcombine.low %v3911_v16, %v3915_v41  ;;  %v8330_v57 = vcombine.high %v3918_v47, %v3922_v49  ;;  %v3962_v39 = vld [vmem:[#allocation2 + $0x1270] sm:$0xff]  ;;  %v3959_v16 = vld [vmem:[#allocation2 + $0x1258] sm:$0xff] }
 0x321   :  { %v3963_v41 = vld [vmem:[#allocation2 + $0x1278] sm:$0xff] }
 0x323   :  { %7209 = vmatpush1.bf16.msra.mxu0 %v8789_v29  ;;  %7373 = vmatpush1.bf16.msra.mxu1 %v8791_v1  ;;  %v8329_v29 = vcombine.low %v3918_v47, %v3922_v49  ;;  %v8331_v1 = vcombine.low %v3919_v9, %v3923_v11  ;;  %v3966_v47 = vld [vmem:[#allocation2 + $0x1290] sm:$0xff] }
 0x324   :  { %7210 = vmatprep.subr.bf16.mxu0 %v8798_v2  ;;  %7374 = vmatprep.subr.bf16.mxu1 %v8800_v3  ;;  %v8338_v2 = vcombine.high %v3926_v23, %v3930_v61  ;;  %v8340_v3 = vcombine.high %v3927_v62, %v3931_v0  ;;  %v3970_v49 = vld [vmem:[#allocation2 + $0x12b0] sm:$0xff] }
 0x327   :  { %7211 = vmatpush1.bf16.msra.mxu0 %v8797_v38  ;;  %7375 = vmatpush1.bf16.msra.mxu1 %v8799_v10  ;;  %v8337_v38 = vcombine.low %v3926_v23, %v3930_v61  ;;  %v8339_v10 = vcombine.low %v3927_v62, %v3931_v0  ;;  %v3974_v23 = vld [vmem:[#allocation2 + $0x12d0] sm:$0xff]  ;;  %v3975_v62 = vld [vmem:[#allocation2 + $0x12d8] sm:$0xff] }
 0x328   :  { %7385 = vmatprep.subr.bf16.mxu0 %v8298_v12  ;;  %7549 = vmatprep.subr.bf16.mxu1 %v8300_v13  ;;  %v8346_v12 = vcombine.high %v3934_v4, %v3938_v32  ;;  %v8348_v13 = vcombine.high %v3935_v7, %v3939_v8  ;;  %v3978_v61 = vld [vmem:[#allocation2 + $0x12f0] sm:$0xff]  ;;  %v3979_v0 = vld [vmem:[#allocation2 + $0x12f8] sm:$0xff] }
 0x32a   :  { %7213 = vmatmul.mubr.bf16.vlgmr.msra.gmra.mrb[8].mxu0 %v9193_v18  ;;  %7377 = vmatmul.mubr.bf16.vlgmr.msra.gmra.mrb[8].mxu1 %v9193_v18 }
 0x32b   :  { %7386 = vmatpush1.bf16.msra.mxu0 %v8297_v48  ;;  %7550 = vmatpush1.bf16.msra.mxu1 %v8299_v20  ;;  %v8345_v48 = vcombine.low %v3934_v4, %v3938_v32  ;;  %v8347_v20 = vcombine.low %v3935_v7, %v3939_v8  ;;  %v3982_v4 = vld [vmem:[#allocation2 + $0x1310] sm:$0xff]  ;;  %v3983_v7 = vld [vmem:[#allocation2 + $0x1318] sm:$0xff] }
 0x32c   :  { %7387 = vmatprep.subr.bf16.mxu0 %v8306_v21  ;;  %7551 = vmatprep.subr.bf16.mxu1 %v8308_v22  ;;  %v8354_v21 = vcombine.high %v3942_v14, %v3946_v15  ;;  %v8356_v22 = vcombine.high %v3943_v19, %v3947_v58  ;;  %v3986_v32 = vld [vmem:[#allocation2 + $0x1330] sm:$0xff]  ;;  %v3987_v8 = vld [vmem:[#allocation2 + $0x1338] sm:$0xff] }
 0x32d   :  { %7417 = vmatprep.mubr.bf16.mxu0 %v9135_v5  ;;  %7581 = vmatprep.mubr.bf16.mxu1 %v9135_v5  ;;  %v8332_v5 = vcombine.high %v3919_v9, %v3923_v11  ;;  %v3967_v9 = vld [vmem:[#allocation2 + $0x1298] sm:$0xff] }
 0x32e   :  { %v3971_v11 = vld [vmem:[#allocation2 + $0x12b8] sm:$0xff] }
 0x32f   :  { %7388 = vmatpush1.bf16.msra.mxu0 %v8305_v30  ;;  %7552 = vmatpush1.bf16.msra.mxu1 %v8307_v59  ;;  %v8353_v30 = vcombine.low %v3942_v14, %v3946_v15  ;;  %v8355_v59 = vcombine.low %v3943_v19, %v3947_v58  ;;  %v3990_v14 = vld [vmem:[#allocation2 + $0x1350] sm:$0xff]  ;;  %v3991_v19 = vld [vmem:[#allocation2 + $0x1358] sm:$0xff] }
 0x330   :  { %7389 = vmatprep.subr.bf16.mxu0 %v8314_v34  ;;  %7553 = vmatprep.subr.bf16.mxu1 %v8316_v36  ;;  %v8362_v34 = vcombine.high %v3950_v24, %v3954_v25  ;;  %v8364_v36 = vcombine.high %v3951_v27, %v3955_v28  ;;  %v3994_v15 = vld [vmem:[#allocation2 + $0x1370] sm:$0xff]  ;;  %v3995_v58 = vld [vmem:[#allocation2 + $0x1378] sm:$0xff] }
 0x333   :  { %7390 = vmatpush1.bf16.msra.mxu0 %v8313_v42  ;;  %7554 = vmatpush1.bf16.msra.mxu1 %v8315_v53  ;;  %v8361_v42 = vcombine.low %v3950_v24, %v3954_v25  ;;  %v8363_v53 = vcombine.low %v3951_v27, %v3955_v28  ;;  %v3998_v24 = vld [vmem:[#allocation2 + $0x1390] sm:$0xff]  ;;  %v3999_v27 = vld [vmem:[#allocation2 + $0x1398] sm:$0xff] }
 0x334   :  { %7391 = vmatprep.subr.bf16.mxu0 %v8322_v60  ;;  %7555 = vmatprep.subr.bf16.mxu1 %v8324_v45  ;;  %v8370_v60 = vcombine.high %v3958_v37, %v3962_v39  ;;  %v8372_v45 = vcombine.high %v3959_v16, %v3963_v41  ;;  %v4002_v25 = vld [vmem:[#allocation2 + $0x13b0] sm:$0xff]  ;;  %v4003_v28 = vld [vmem:[#allocation2 + $0x13b8] sm:$0xff] }
 0x337   :  { %7392 = vmatpush1.bf16.msra.mxu0 %v8321_v54  ;;  %7556 = vmatpush1.bf16.msra.mxu1 %v8323_v56  ;;  %v8369_v54 = vcombine.low %v3958_v37, %v3962_v39  ;;  %v8371_v56 = vcombine.low %v3959_v16, %v3963_v41  ;;  %v4006_v37 = vld [vmem:[#allocation2 + $0x13d0] sm:$0xff]  ;;  %v4007_v16 = vld [vmem:[#allocation2 + $0x13d8] sm:$0xff] }
 0x338   :  { %7393 = vmatprep.subr.bf16.mxu0 %v8330_v57  ;;  %7557 = vmatprep.subr.bf16.mxu1 %v8332_v5  ;;  %v8378_v57 = vcombine.high %v3966_v47, %v3970_v49  ;;  %v8380_v5 = vcombine.high %v3967_v9, %v3971_v11  ;;  %v4010_v39 = vld [vmem:[#allocation2 + $0x13f0] sm:$0xff]  ;;  %v4011_v41 = vld [vmem:[#allocation2 + $0x13f8] sm:$0xff] }
 0x33b   :  { %7394 = vmatpush1.bf16.msra.mxu0 %v8329_v29  ;;  %7558 = vmatpush1.bf16.msra.mxu1 %v8331_v1  ;;  %v8377_v29 = vcombine.low %v3966_v47, %v3970_v49  ;;  %v8379_v1 = vcombine.low %v3967_v9, %v3971_v11  ;;  %v4014_v47 = vld [vmem:[#allocation2 + $0x1410] sm:$0xff]  ;;  %v4015_v9 = vld [vmem:[#allocation2 + $0x1418] sm:$0xff] }
 0x33c   :  { %7395 = vmatprep.subr.bf16.mxu0 %v8338_v2  ;;  %7559 = vmatprep.subr.bf16.mxu1 %v8340_v3  ;;  %v8386_v2 = vcombine.high %v3974_v23, %v3978_v61  ;;  %v8388_v3 = vcombine.high %v3975_v62, %v3979_v0  ;;  %v4018_v49 = vld [vmem:[#allocation2 + $0x1430] sm:$0xff]  ;;  %v4019_v11 = vld [vmem:[#allocation2 + $0x1438] sm:$0xff] }
 0x33f   :  { %7396 = vmatpush1.bf16.msra.mxu0 %v8337_v38  ;;  %7560 = vmatpush1.bf16.msra.mxu1 %v8339_v10  ;;  %v8385_v38 = vcombine.low %v3974_v23, %v3978_v61  ;;  %v8387_v10 = vcombine.low %v3975_v62, %v3979_v0  ;;  %v4022_v23 = vld [vmem:[#allocation2 + $0x1450] sm:$0xff]  ;;  %v4023_v62 = vld [vmem:[#allocation2 + $0x1458] sm:$0xff] }
 0x340   :  { %7397 = vmatprep.subr.bf16.mxu0 %v8346_v12  ;;  %7561 = vmatprep.subr.bf16.mxu1 %v8348_v13  ;;  %v8394_v12 = vcombine.high %v3982_v4, %v3986_v32  ;;  %v8396_v13 = vcombine.high %v3983_v7, %v3987_v8  ;;  %v4026_v61 = vld [vmem:[#allocation2 + $0x1470] sm:$0xff]  ;;  %v4027_v0 = vld [vmem:[#allocation2 + $0x1478] sm:$0xff] }
 0x343   :  { %7398 = vmatpush1.bf16.msra.mxu0 %v8345_v48  ;;  %7562 = vmatpush1.bf16.msra.mxu1 %v8347_v20  ;;  %v8393_v48 = vcombine.low %v3982_v4, %v3986_v32  ;;  %v8395_v20 = vcombine.low %v3983_v7, %v3987_v8  ;;  %v4030_v4 = vld [vmem:[#allocation2 + $0x1490] sm:$0xff]  ;;  %v4031_v7 = vld [vmem:[#allocation2 + $0x1498] sm:$0xff] }
 0x344   :  { %7399 = vmatprep.subr.bf16.mxu0 %v8354_v21  ;;  %7563 = vmatprep.subr.bf16.mxu1 %v8356_v22  ;;  %v8402_v21 = vcombine.high %v3990_v14, %v3994_v15  ;;  %v8404_v22 = vcombine.high %v3991_v19, %v3995_v58  ;;  %v4034_v32 = vld [vmem:[#allocation2 + $0x14b0] sm:$0xff]  ;;  %v4035_v8 = vld [vmem:[#allocation2 + $0x14b8] sm:$0xff] }
 0x347   :  { %7400 = vmatpush1.bf16.msra.mxu0 %v8353_v30  ;;  %7564 = vmatpush1.bf16.msra.mxu1 %v8355_v59  ;;  %v8401_v30 = vcombine.low %v3990_v14, %v3994_v15  ;;  %v8403_v59 = vcombine.low %v3991_v19, %v3995_v58  ;;  %v4038_v14 = vld [vmem:[#allocation2 + $0x14d0] sm:$0xff]  ;;  %v4039_v19 = vld [vmem:[#allocation2 + $0x14d8] sm:$0xff] }
 0x348   :  { %7401 = vmatprep.subr.bf16.mxu0 %v8362_v34  ;;  %7565 = vmatprep.subr.bf16.mxu1 %v8364_v36  ;;  %v8410_v34 = vcombine.high %v3998_v24, %v4002_v25  ;;  %v8412_v36 = vcombine.high %v3999_v27, %v4003_v28  ;;  %v4042_v15 = vld [vmem:[#allocation2 + $0x14f0] sm:$0xff]  ;;  %v4043_v58 = vld [vmem:[#allocation2 + $0x14f8] sm:$0xff] }
 0x34b   :  { %7402 = vmatpush1.bf16.msra.mxu0 %v8361_v42  ;;  %7566 = vmatpush1.bf16.msra.mxu1 %v8363_v53  ;;  %v8409_v42 = vcombine.low %v3998_v24, %v4002_v25  ;;  %v8411_v53 = vcombine.low %v3999_v27, %v4003_v28  ;;  %v4050_v24 = vld [vmem:[#allocation2 + $0x1530] sm:$0xff]  ;;  %v4047_v25 = vld [vmem:[#allocation2 + $0x1518] sm:$0xff]  ;;  %v8449_v28 = vcombine.low %v4038_v14, %v4042_v15 }
 0x34c   :  { %7403 = vmatprep.subr.bf16.mxu0 %v8370_v60  ;;  %7567 = vmatprep.subr.bf16.mxu1 %v8372_v45  ;;  %v8418_v60 = vcombine.high %v4006_v37, %v4010_v39  ;;  %v8420_v45 = vcombine.high %v4007_v16, %v4011_v41  ;;  %v4051_v27 = vld [vmem:[#allocation2 + $0x1538] sm:$0xff] }
 0x34f   :  { %7404 = vmatpush1.bf16.msra.mxu0 %v8369_v54  ;;  %7568 = vmatpush1.bf16.msra.mxu1 %v8371_v56  ;;  %v8417_v54 = vcombine.low %v4006_v37, %v4010_v39  ;;  %v8419_v56 = vcombine.low %v4007_v16, %v4011_v41  ;;  %v4055_v37 = vld [vmem:[#allocation2 + $0x1558] sm:$0xff]  ;;  %v8459_v41 = vcombine.low %v4047_v25, %v4051_v27 }
 0x350   :  { %7405 = vmatprep.subr.bf16.mxu0 %v8378_v57  ;;  %7569 = vmatprep.subr.bf16.mxu1 %v8380_v5  ;;  %v8426_v57 = vcombine.high %v4014_v47, %v4018_v49  ;;  %v8428_v5 = vcombine.high %v4015_v9, %v4019_v11  ;;  %v4059_v39 = vld [vmem:[#allocation2 + $0x1578] sm:$0xff] }
 0x353   :  { %7406 = vmatpush1.bf16.msra.mxu0 %v8377_v29  ;;  %7570 = vmatpush1.bf16.msra.mxu1 %v8379_v1  ;;  %v8425_v29 = vcombine.low %v4014_v47, %v4018_v49  ;;  %v8427_v1 = vcombine.low %v4015_v9, %v4019_v11  ;;  %v4063_v47 = vld [vmem:[#allocation2 + $0x1598] sm:$0xff]  ;;  %v8467_v11 = vcombine.low %v4055_v37, %v4059_v39 }
 0x354   :  { %7407 = vmatprep.subr.bf16.mxu0 %v8386_v2  ;;  %7571 = vmatprep.subr.bf16.mxu1 %v8388_v3  ;;  %v8434_v2 = vcombine.high %v4022_v23, %v4026_v61  ;;  %v8436_v3 = vcombine.high %v4023_v62, %v4027_v0  ;;  %v4067_v49 = vld [vmem:[#allocation2 + $0x15b8] sm:$0xff] }
 0x357   :  { %7408 = vmatpush1.bf16.msra.mxu0 %v8385_v38  ;;  %7572 = vmatpush1.bf16.msra.mxu1 %v8387_v10  ;;  %v8433_v38 = vcombine.low %v4022_v23, %v4026_v61  ;;  %v8435_v10 = vcombine.low %v4023_v62, %v4027_v0  ;;  %v4071_v23 = vld [vmem:[#allocation2 + $0x15d8] sm:$0xff]  ;;  %v8475_v0 = vcombine.low %v4063_v47, %v4067_v49 }
 0x358   :  { %7409 = vmatprep.subr.bf16.mxu0 %v8394_v12  ;;  %7573 = vmatprep.subr.bf16.mxu1 %v8396_v13  ;;  %v8442_v12 = vcombine.high %v4030_v4, %v4034_v32  ;;  %v8444_v13 = vcombine.high %v4031_v7, %v4035_v8  ;;  %v4075_v61 = vld [vmem:[#allocation2 + $0x15f8] sm:$0xff] }
 0x35b   :  { %7410 = vmatpush1.bf16.msra.mxu0 %v8393_v48  ;;  %7574 = vmatpush1.bf16.msra.mxu1 %v8395_v20  ;;  %v8441_v48 = vcombine.low %v4030_v4, %v4034_v32  ;;  %v8450_v20 = vcombine.high %v4038_v14, %v4042_v15  ;;  %v4079_v4 = vld [vmem:[#allocation2 + $0x1618] sm:$0xff] }
 0x35c   :  { %7411 = vmatprep.subr.bf16.mxu0 %v8402_v21  ;;  %7575 = vmatprep.subr.bf16.mxu1 %v8404_v22  ;;  %v8452_v21 = vcombine.high %v4039_v19, %v4043_v58  ;;  %v4046_v22 = vld [vmem:[#allocation2 + $0x1510] sm:$0xff]  ;;  %v4083_v32 = vld [vmem:[#allocation2 + $0x1638] sm:$0xff] }
 0x35d   :  { %v8457_v16 = vcombine.low %v4046_v22, %v4050_v24  ;;  %v4087_v14 = vld [vmem:[#allocation2 + $0x1658] sm:$0xff] }
 0x35e   :  { %v4091_v15 = vld [vmem:[#allocation2 + $0x1678] sm:$0xff] }
 0x35f   :  { %7412 = vmatpush1.bf16.msra.mxu0 %v8401_v30  ;;  %7576 = vmatpush1.bf16.msra.mxu1 %v8403_v59  ;;  %v8451_v30 = vcombine.low %v4039_v19, %v4043_v58  ;;  %v8458_v59 = vcombine.high %v4046_v22, %v4050_v24  ;;  %v8491_v58 = vcombine.low %v4079_v4, %v4083_v32  ;;  %v4095_v22 = vld [vmem:[#allocation2 + $0x1698] sm:$0xff] }
 0x360   :  { %7413 = vmatprep.subr.bf16.mxu0 %v8410_v34  ;;  %7577 = vmatprep.subr.bf16.mxu1 %v8412_v36  ;;  %v4054_v34 = vld [vmem:[#allocation2 + $0x1550] sm:$0xff]  ;;  %v4099_v24 = vld [vmem:[#allocation2 + $0x16b8] sm:$0xff] }
 0x361   :  { %v4058_v36 = vld [vmem:[#allocation2 + $0x1570] sm:$0xff] }
 0x362   :  { %v8465_v9 = vcombine.low %v4054_v34, %v4058_v36 }
 0x363   :  { %7414 = vmatpush1.bf16.msra.mxu0 %v8409_v42  ;;  %7578 = vmatpush1.bf16.msra.mxu1 %v8411_v53  ;;  %v8466_v42 = vcombine.high %v4054_v34, %v4058_v36  ;;  %v8468_v53 = vcombine.high %v4055_v37, %v4059_v39  ;;  %v4103_v34 = vld [vmem:[#allocation2 + $0x16d8] sm:$0xff]  ;;  %v8507_v39 = vcombine.low %v4095_v22, %v4099_v24 }
 0x364   :  { %7415 = vmatprep.subr.bf16.mxu0 %v8418_v60  ;;  %7579 = vmatprep.subr.bf16.mxu1 %v8420_v45  ;;  %v4062_v60 = vld [vmem:[#allocation2 + $0x1590] sm:$0xff]  ;;  %v4107_v36 = vld [vmem:[#allocation2 + $0x16f8] sm:$0xff] }
 0x365   :  { %v4066_v45 = vld [vmem:[#allocation2 + $0x15b0] sm:$0xff] }
 0x366   :  { %v8473_v62 = vcombine.low %v4062_v60, %v4066_v45 }
 0x367   :  { %7416 = vmatpush1.bf16.msra.mxu0 %v8417_v54  ;;  %7580 = vmatpush1.bf16.msra.mxu1 %v8419_v56  ;;  %v8474_v54 = vcombine.high %v4062_v60, %v4066_v45  ;;  %v8476_v56 = vcombine.high %v4063_v47, %v4067_v49  ;;  %v4111_v60 = vld [vmem:[#allocation2 + $0x1718] sm:$0xff]  ;;  %v8515_v49 = vcombine.low %v4103_v34, %v4107_v36 }
 0x368   :  { %7426 = vmatprep.subr.bf16.mxu0 %v8426_v57  ;;  %7590 = vmatprep.subr.bf16.mxu1 %v8428_v5  ;;  %v4070_v57 = vld [vmem:[#allocation2 + $0x15d0] sm:$0xff]  ;;  %v4115_v45 = vld [vmem:[#allocation2 + $0x1738] sm:$0xff] }
 0x369   :  { %v4074_v5 = vld [vmem:[#allocation2 + $0x15f0] sm:$0xff] }
 0x36a   :  { %7418 = vmatmul.mubr.bf16.vlgmr.msra.gmra.mrb[12].mxu0 %v9143_v40  ;;  %7582 = vmatmul.mubr.bf16.vlgmr.msra.gmra.mrb[12].mxu1 %v9143_v40  ;;  %v8443_v40 = vcombine.low %v4031_v7, %v4035_v8  ;;  %v8481_v7 = vcombine.low %v4070_v57, %v4074_v5  ;;  %v8483_v8 = vcombine.low %v4071_v23, %v4075_v61 }
 0x36b   :  { %7427 = vmatpush1.bf16.msra.mxu0 %v8425_v29  ;;  %7591 = vmatpush1.bf16.msra.mxu1 %v8427_v1  ;;  %v8482_v29 = vcombine.high %v4070_v57, %v4074_v5  ;;  %v8484_v1 = vcombine.high %v4071_v23, %v4075_v61  ;;  %v4119_v57 = vld [vmem:[#allocation2 + $0x1758] sm:$0xff]  ;;  %v8523_v61 = vcombine.low %v4111_v60, %v4115_v45 }
 0x36c   :  { %7428 = vmatprep.subr.bf16.mxu0 %v8434_v2  ;;  %7592 = vmatprep.subr.bf16.mxu1 %v8436_v3  ;;  %v4078_v2 = vld [vmem:[#allocation2 + $0x1610] sm:$0xff]  ;;  %v4123_v5 = vld [vmem:[#allocation2 + $0x1778] sm:$0xff] }
 0x36d   :  { %7458 = vmatprep.mubr.bf16.mxu0 %v9147_v52  ;;  %7622 = vmatprep.mubr.bf16.mxu1 %v9147_v52  ;;  %v8460_v52 = vcombine.high %v4047_v25, %v4051_v27  ;;  %v4082_v3 = vld [vmem:[#allocation2 + $0x1630] sm:$0xff]  ;;  %v8499_v27 = vcombine.low %v4087_v14, %v4091_v15 }
 0x36e   :  { %v8489_v19 = vcombine.low %v4078_v2, %v4082_v3 }
 0x36f   :  { %7429 = vmatpush1.bf16.msra.mxu0 %v8433_v38  ;;  %7593 = vmatpush1.bf16.msra.mxu1 %v8435_v10  ;;  %v8490_v38 = vcombine.high %v4078_v2, %v4082_v3  ;;  %v8492_v10 = vcombine.high %v4079_v4, %v4083_v32  ;;  %v4127_v2 = vld [vmem:[#allocation2 + $0x1798] sm:$0xff]  ;;  %v8531_v32 = vcombine.low %v4119_v57, %v4123_v5 }
 0x370   :  { %7430 = vmatprep.subr.bf16.mxu0 %v8442_v12  ;;  %7594 = vmatprep.subr.bf16.mxu1 %v8444_v13  ;;  %v4086_v12 = vld [vmem:[#allocation2 + $0x1650] sm:$0xff]  ;;  %v4131_v3 = vld [vmem:[#allocation2 + $0x17b8] sm:$0xff] }
 0x371   :  { %v4090_v13 = vld [vmem:[#allocation2 + $0x1670] sm:$0xff] }
 0x372   :  { %v8497_v25 = vcombine.low %v4086_v12, %v4090_v13 }
 0x373   :  { %7431 = vmatpush1.bf16.msra.mxu0 %v8441_v48  ;;  %7595 = vmatpush1.bf16.msra.mxu1 %v8443_v40  ;;  %v8498_v48 = vcombine.high %v4086_v12, %v4090_v13  ;;  %v8500_v40 = vcombine.high %v4087_v14, %v4091_v15  ;;  %v4135_v12 = vld [vmem:[#allocation2 + $0x17d8] sm:$0xff]  ;;  %v8539_v15 = vcombine.low %v4127_v2, %v4131_v3 }
 0x374   :  { %7432 = vmatprep.subr.bf16.mxu0 %v8450_v20  ;;  %7596 = vmatprep.subr.bf16.mxu1 %v8452_v21  ;;  %v4094_v20 = vld [vmem:[#allocation2 + $0x1690] sm:$0xff]  ;;  %v4139_v13 = vld [vmem:[#allocation2 + $0x17f8] sm:$0xff] }
 0x375   :  { %v4098_v21 = vld [vmem:[#allocation2 + $0x16b0] sm:$0xff] }
 0x376   :  { %v8505_v37 = vcombine.low %v4094_v20, %v4098_v21 }
 0x377   :  { %7433 = vmatpush1.bf16.msra.mxu0 %v8449_v28  ;;  %7597 = vmatpush1.bf16.msra.mxu1 %v8451_v30  ;;  %v8506_v28 = vcombine.high %v4094_v20, %v4098_v21  ;;  %v8508_v30 = vcombine.high %v4095_v22, %v4099_v24  ;;  %v4143_v20 = vld [vmem:[#allocation2 + $0x1818] sm:$0xff]  ;;  %v8547_v24 = vcombine.low %v4135_v12, %v4139_v13 }
 0x378   :  { %7434 = vmatprep.subr.bf16.mxu0 %v8458_v59  ;;  %7598 = vmatprep.subr.bf16.mxu1 %v8460_v52  ;;  %v4102_v59 = vld [vmem:[#allocation2 + $0x16d0] sm:$0xff]  ;;  %v4147_v21 = vld [vmem:[#allocation2 + $0x1838] sm:$0xff] }
 0x379   :  { %v4106_v52 = vld [vmem:[#allocation2 + $0x16f0] sm:$0xff] }
 0x37a   :  { %v8513_v47 = vcombine.low %v4102_v59, %v4106_v52 }
 0x37b   :  { %7435 = vmatpush1.bf16.msra.mxu0 %v8457_v16  ;;  %7599 = vmatpush1.bf16.msra.mxu1 %v8459_v41  ;;  %v8514_v16 = vcombine.high %v4102_v59, %v4106_v52  ;;  %v8516_v41 = vcombine.high %v4103_v34, %v4107_v36  ;;  %v4151_v59 = vld [vmem:[#allocation2 + $0x1858] sm:$0xff]  ;;  %v8555_v36 = vcombine.low %v4143_v20, %v4147_v21 }
 0x37c   :  { %7436 = vmatprep.subr.bf16.mxu0 %v8466_v42  ;;  %7600 = vmatprep.subr.bf16.mxu1 %v8468_v53  ;;  %v4110_v42 = vld [vmem:[#allocation2 + $0x1710] sm:$0xff]  ;;  %v4155_v52 = vld [vmem:[#allocation2 + $0x1878] sm:$0xff] }
 0x37d   :  { %v4114_v53 = vld [vmem:[#allocation2 + $0x1730] sm:$0xff] }
 0x37e   :  { %v8521_v23 = vcombine.low %v4110_v42, %v4114_v53 }
 0x37f   :  { %7437 = vmatpush1.bf16.msra.mxu0 %v8465_v9  ;;  %7601 = vmatpush1.bf16.msra.mxu1 %v8467_v11  ;;  %v8522_v9 = vcombine.high %v4110_v42, %v4114_v53  ;;  %v8524_v11 = vcombine.high %v4111_v60, %v4115_v45  ;;  %v4159_v42 = vld [vmem:[#allocation2 + $0x1898] sm:$0xff]  ;;  %v8563_v45 = vcombine.low %v4151_v59, %v4155_v52 }
 0x380   :  { %7438 = vmatprep.subr.bf16.mxu0 %v8474_v54  ;;  %7602 = vmatprep.subr.bf16.mxu1 %v8476_v56  ;;  %v4118_v54 = vld [vmem:[#allocation2 + $0x1750] sm:$0xff]  ;;  %v4163_v53 = vld [vmem:[#allocation2 + $0x18b8] sm:$0xff] }
 0x381   :  { %v4122_v56 = vld [vmem:[#allocation2 + $0x1770] sm:$0xff] }
 0x382   :  { %v8529_v4 = vcombine.low %v4118_v54, %v4122_v56 }
 0x383   :  { %7439 = vmatpush1.bf16.msra.mxu0 %v8473_v62  ;;  %7603 = vmatpush1.bf16.msra.mxu1 %v8475_v0  ;;  %v8530_v62 = vcombine.high %v4118_v54, %v4122_v56  ;;  %v8532_v0 = vcombine.high %v4119_v57, %v4123_v5  ;;  %v4167_v54 = vld [vmem:[#allocation2 + $0x18d8] sm:$0xff] }
 0x384   :  { %7440 = vmatprep.subr.bf16.mxu0 %v8482_v29  ;;  %7604 = vmatprep.subr.bf16.mxu1 %v8484_v1  ;;  %v4126_v29 = vld [vmem:[#allocation2 + $0x1790] sm:$0xff]  ;;  %v4171_v56 = vld [vmem:[#allocation2 + $0x18f8] sm:$0xff] }
 0x385   :  { %v4130_v1 = vld [vmem:[#allocation2 + $0x17b0] sm:$0xff] }
 0x386   :  { %v8537_v14 = vcombine.low %v4126_v29, %v4130_v1 }
 0x387   :  { %7441 = vmatpush1.bf16.msra.mxu0 %v8481_v7  ;;  %7605 = vmatpush1.bf16.msra.mxu1 %v8483_v8  ;;  %v8538_v7 = vcombine.high %v4126_v29, %v4130_v1  ;;  %v8540_v8 = vcombine.high %v4127_v2, %v4131_v3  ;;  %v4179_v29 = vld [vmem:[#allocation2 + $0x1938] sm:$0xff]  ;;  %v8579_v2 = vcombine.low %v4167_v54, %v4171_v56 }
 0x388   :  { %7442 = vmatprep.subr.bf16.mxu0 %v8490_v38  ;;  %7606 = vmatprep.subr.bf16.mxu1 %v8492_v10  ;;  %v4134_v38 = vld [vmem:[#allocation2 + $0x17d0] sm:$0xff] }
 0x389   :  { %v4138_v10 = vld [vmem:[#allocation2 + $0x17f0] sm:$0xff] }
 0x38a   :  { %v8545_v22 = vcombine.low %v4134_v38, %v4138_v10 }
 0x38b   :  { %7443 = vmatpush1.bf16.msra.mxu0 %v8489_v19  ;;  %7607 = vmatpush1.bf16.msra.mxu1 %v8491_v58  ;;  %v8546_v19 = vcombine.high %v4134_v38, %v4138_v10  ;;  %v8548_v58 = vcombine.high %v4135_v12, %v4139_v13 }
 0x38c   :  { %7444 = vmatprep.subr.bf16.mxu0 %v8498_v48  ;;  %7608 = vmatprep.subr.bf16.mxu1 %v8500_v40  ;;  %v4142_v48 = vld [vmem:[#allocation2 + $0x1810] sm:$0xff] }
 0x38d   :  { %v4146_v40 = vld [vmem:[#allocation2 + $0x1830] sm:$0xff] }
 0x38e   :  { %v8553_v34 = vcombine.low %v4142_v48, %v4146_v40 }
 0x38f   :  { %7445 = vmatpush1.bf16.msra.mxu0 %v8497_v25  ;;  %7609 = vmatpush1.bf16.msra.mxu1 %v8499_v27  ;;  %v8554_v25 = vcombine.high %v4142_v48, %v4146_v40  ;;  %v8556_v27 = vcombine.high %v4143_v20, %v4147_v21 }
 0x390   :  { %7446 = vmatprep.subr.bf16.mxu0 %v8506_v28  ;;  %7610 = vmatprep.subr.bf16.mxu1 %v8508_v30  ;;  %v4150_v28 = vld [vmem:[#allocation2 + $0x1850] sm:$0xff] }
 0x391   :  { %v4154_v30 = vld [vmem:[#allocation2 + $0x1870] sm:$0xff] }
 0x392   :  { %v8561_v60 = vcombine.low %v4150_v28, %v4154_v30 }
 0x393   :  { %7447 = vmatpush1.bf16.msra.mxu0 %v8505_v37  ;;  %7611 = vmatpush1.bf16.msra.mxu1 %v8507_v39  ;;  %v8562_v37 = vcombine.high %v4150_v28, %v4154_v30  ;;  %v8564_v39 = vcombine.high %v4151_v59, %v4155_v52 }
 0x394   :  { %7448 = vmatprep.subr.bf16.mxu0 %v8514_v16  ;;  %7612 = vmatprep.subr.bf16.mxu1 %v8516_v41  ;;  %v4158_v16 = vld [vmem:[#allocation2 + $0x1890] sm:$0xff] }
 0x395   :  { %v4162_v41 = vld [vmem:[#allocation2 + $0x18b0] sm:$0xff] }
 0x396   :  { %v8569_v57 = vcombine.low %v4158_v16, %v4162_v41 }
 0x397   :  { %7449 = vmatpush1.bf16.msra.mxu0 %v8513_v47  ;;  %7613 = vmatpush1.bf16.msra.mxu1 %v8515_v49  ;;  %v8570_v47 = vcombine.high %v4158_v16, %v4162_v41  ;;  %v8572_v49 = vcombine.high %v4159_v42, %v4163_v53 }
 0x398   :  { %7450 = vmatprep.subr.bf16.mxu0 %v8522_v9  ;;  %7614 = vmatprep.subr.bf16.mxu1 %v8524_v11  ;;  %v4166_v9 = vld [vmem:[#allocation2 + $0x18d0] sm:$0xff] }
 0x399   :  { %v4170_v11 = vld [vmem:[#allocation2 + $0x18f0] sm:$0xff] }
 0x39a   :  { %v8578_v5 = vcombine.high %v4166_v9, %v4170_v11  ;;  %v8577_v1 = vcombine.low %v4166_v9, %v4170_v11 }
 0x39b   :  { %7451 = vmatpush1.bf16.msra.mxu0 %v8521_v23  ;;  %7615 = vmatpush1.bf16.msra.mxu1 %v8523_v61  ;;  %v8580_v23 = vcombine.high %v4167_v54, %v4171_v56  ;;  %v4174_v61 = vld [vmem:[#allocation2 + $0x1910] sm:$0xff] }
 0x39c   :  { %7452 = vmatprep.subr.bf16.mxu0 %v8530_v62  ;;  %7616 = vmatprep.subr.bf16.mxu1 %v8532_v0  ;;  %v4178_v62 = vld [vmem:[#allocation2 + $0x1930] sm:$0xff]  ;;  %v4175_v0 = vld [vmem:[#allocation2 + $0x1918] sm:$0xff] }
 0x39d   :  { %v8586_v3 = vcombine.high %v4174_v61, %v4178_v62  ;;  %v8585_v38 = vcombine.low %v4174_v61, %v4178_v62  ;;  %v8587_v10 = vcombine.low %v4175_v0, %v4179_v29 }
 0x39f   :  { %7453 = vmatpush1.bf16.msra.mxu0 %v8529_v4  ;;  %7617 = vmatpush1.bf16.msra.mxu1 %v8531_v32  ;;  %v4182_v4 = vld [vmem:[#allocation2 + $0x1950] sm:$0xff] }
 0x3a0   :  { %7454 = vmatprep.subr.bf16.mxu0 %v8538_v7  ;;  %7618 = vmatprep.subr.bf16.mxu1 %v8540_v8  ;;  %v4186_v32 = vld [vmem:[#allocation2 + $0x1970] sm:$0xff]  ;;  %v4183_v7 = vld [vmem:[#allocation2 + $0x1958] sm:$0xff] }
 0x3a1   :  { %v4187_v8 = vld [vmem:[#allocation2 + $0x1978] sm:$0xff]  ;;  %v8594_v12 = vcombine.high %v4182_v4, %v4186_v32  ;;  %v8593_v48 = vcombine.low %v4182_v4, %v4186_v32 }
 0x3a2   :  { %v8596_v13 = vcombine.high %v4183_v7, %v4187_v8  ;;  %v8595_v40 = vcombine.low %v4183_v7, %v4187_v8 }
 0x3a3   :  { %7455 = vmatpush1.bf16.msra.mxu0 %v8537_v14  ;;  %7619 = vmatpush1.bf16.msra.mxu1 %v8539_v15  ;;  %v4190_v14 = vld [vmem:[#allocation2 + $0x1990] sm:$0xff] }
 0x3a4   :  { %7456 = vmatprep.subr.bf16.mxu0 %v8546_v19  ;;  %7620 = vmatprep.subr.bf16.mxu1 %v8548_v58  ;;  %v4194_v15 = vld [vmem:[#allocation2 + $0x19b0] sm:$0xff]  ;;  %v4191_v19 = vld [vmem:[#allocation2 + $0x1998] sm:$0xff] }
 0x3a5   :  { %v4195_v58 = vld [vmem:[#allocation2 + $0x19b8] sm:$0xff]  ;;  %v8602_v20 = vcombine.high %v4190_v14, %v4194_v15  ;;  %v8601_v28 = vcombine.low %v4190_v14, %v4194_v15 }
 0x3a6   :  { %v8604_v21 = vcombine.high %v4191_v19, %v4195_v58  ;;  %v8603_v30 = vcombine.low %v4191_v19, %v4195_v58 }
 0x3a7   :  { %7457 = vmatpush1.bf16.msra.mxu0 %v8545_v22  ;;  %7621 = vmatpush1.bf16.msra.mxu1 %v8547_v24  ;;  %v4198_v22 = vld [vmem:[#allocation2 + $0x19d0] sm:$0xff] }
 0x3a8   :  { %7467 = vmatprep.subr.bf16.mxu0 %v8554_v25  ;;  %7631 = vmatprep.subr.bf16.mxu1 %v8556_v27  ;;  %v4202_v24 = vld [vmem:[#allocation2 + $0x19f0] sm:$0xff]  ;;  %v4199_v25 = vld [vmem:[#allocation2 + $0x19d8] sm:$0xff] }
 0x3a9   :  { %v4203_v27 = vld [vmem:[#allocation2 + $0x19f8] sm:$0xff]  ;;  %v8610_v59 = vcombine.high %v4198_v22, %v4202_v24  ;;  %v8609_v16 = vcombine.low %v4198_v22, %v4202_v24 }
 0x3aa   :  { %7459 = vmatmul.mubr.bf16.vlgmr.msra.gmra.mrb[12].mxu0 %v9162_v6  ;;  %7623 = vmatmul.mubr.bf16.vlgmr.msra.gmra.mrb[12].mxu1 %v9162_v6  ;;  %v8571_v6 = vcombine.low %v4159_v42, %v4163_v53  ;;  %v8612_v52 = vcombine.high %v4199_v25, %v4203_v27  ;;  %v8611_v41 = vcombine.low %v4199_v25, %v4203_v27 }
 0x3ab   :  { %7468 = vmatpush1.bf16.msra.mxu0 %v8553_v34  ;;  %7632 = vmatpush1.bf16.msra.mxu1 %v8555_v36  ;;  %v4206_v34 = vld [vmem:[#allocation2 + $0x1a10] sm:$0xff] }
 0x3ac   :  { %7469 = vmatprep.subr.bf16.mxu0 %v8562_v37  ;;  %7633 = vmatprep.subr.bf16.mxu1 %v8564_v39  ;;  %v4210_v36 = vld [vmem:[#allocation2 + $0x1a30] sm:$0xff]  ;;  %v4207_v37 = vld [vmem:[#allocation2 + $0x1a18] sm:$0xff] }
 0x3ad   :  { %7499 = vmatprep.mubr.bf16.mxu0 %v9165_v17  ;;  %7663 = vmatprep.mubr.bf16.mxu1 %v9165_v17  ;;  %v8588_v17 = vcombine.high %v4175_v0, %v4179_v29  ;;  %v4211_v39 = vld [vmem:[#allocation2 + $0x1a38] sm:$0xff]  ;;  %v8618_v42 = vcombine.high %v4206_v34, %v4210_v36  ;;  %v8617_v9 = vcombine.low %v4206_v34, %v4210_v36 }
 0x3ae   :  { %v8620_v53 = vcombine.high %v4207_v37, %v4211_v39  ;;  %v8619_v11 = vcombine.low %v4207_v37, %v4211_v39 }
 0x3af   :  { %7470 = vmatpush1.bf16.msra.mxu0 %v8561_v60  ;;  %7634 = vmatpush1.bf16.msra.mxu1 %v8563_v45  ;;  %v4214_v60 = vld [vmem:[#allocation2 + $0x1a50] sm:$0xff] }
 0x3b0   :  { %7471 = vmatprep.subr.bf16.mxu0 %v8570_v47  ;;  %7635 = vmatprep.subr.bf16.mxu1 %v8572_v49  ;;  %v4218_v45 = vld [vmem:[#allocation2 + $0x1a70] sm:$0xff]  ;;  %v4215_v47 = vld [vmem:[#allocation2 + $0x1a58] sm:$0xff] }
 0x3b1   :  { %v4219_v49 = vld [vmem:[#allocation2 + $0x1a78] sm:$0xff]  ;;  %v8626_v54 = vcombine.high %v4214_v60, %v4218_v45  ;;  %v8625_v61 = vcombine.low %v4214_v60, %v4218_v45 }
 0x3b2   :  { %v8628_v56 = vcombine.high %v4215_v47, %v4219_v49  ;;  %v8627_v62 = vcombine.low %v4215_v47, %v4219_v49 }
 0x3b3   :  { %7472 = vmatpush1.bf16.msra.mxu0 %v8569_v57  ;;  %7636 = vmatpush1.bf16.msra.mxu1 %v8571_v6  ;;  %v4222_v57 = vld [vmem:[#allocation2 + $0x1a90] sm:$0xff] }
 0x3b4   :  { %7473 = vmatprep.subr.bf16.mxu0 %v8578_v5  ;;  %7637 = vmatprep.subr.bf16.mxu1 %v8580_v23  ;;  %v4226_v6 = vld [vmem:[#allocation2 + $0x1ab0] sm:$0xff]  ;;  %v4223_v5 = vld [vmem:[#allocation2 + $0x1a98] sm:$0xff] }
 0x3b5   :  { %v4227_v23 = vld [vmem:[#allocation2 + $0x1ab8] sm:$0xff]  ;;  %v8634_v0 = vcombine.high %v4222_v57, %v4226_v6  ;;  %v8633_v4 = vcombine.low %v4222_v57, %v4226_v6 }
 0x3b6   :  { %v8636_v29 = vcombine.high %v4223_v5, %v4227_v23  ;;  %v8635_v32 = vcombine.low %v4223_v5, %v4227_v23 }
 0x3b7   :  { %7474 = vmatpush1.bf16.msra.mxu0 %v8577_v1  ;;  %7638 = vmatpush1.bf16.msra.mxu1 %v8579_v2  ;;  %v4230_v1 = vld [vmem:[#allocation2 + $0x1ad0] sm:$0xff] }
 0x3b8   :  { %7475 = vmatprep.subr.bf16.mxu0 %v8586_v3  ;;  %7639 = vmatprep.subr.bf16.mxu1 %v8588_v17  ;;  %v4234_v2 = vld [vmem:[#allocation2 + $0x1af0] sm:$0xff]  ;;  %v4231_v3 = vld [vmem:[#allocation2 + $0x1ad8] sm:$0xff] }
 0x3b9   :  { %v4235_v17 = vld [vmem:[#allocation2 + $0x1af8] sm:$0xff]  ;;  %v8642_v7 = vcombine.high %v4230_v1, %v4234_v2  ;;  %v8641_v14 = vcombine.low %v4230_v1, %v4234_v2 }
 0x3ba   :  { %v8644_v8 = vcombine.high %v4231_v3, %v4235_v17  ;;  %v8643_v15 = vcombine.low %v4231_v3, %v4235_v17 }
 0x3bb   :  { %7476 = vmatpush1.bf16.msra.mxu0 %v8585_v38  ;;  %7640 = vmatpush1.bf16.msra.mxu1 %v8587_v10  ;;  %v4238_v38 = vld [vmem:[#allocation2 + $0x1b10] sm:$0xff] }
 0x3bc   :  { %7477 = vmatprep.subr.bf16.mxu0 %v8594_v12  ;;  %7641 = vmatprep.subr.bf16.mxu1 %v8596_v13  ;;  %v4242_v10 = vld [vmem:[#allocation2 + $0x1b30] sm:$0xff]  ;;  %v4239_v12 = vld [vmem:[#allocation2 + $0x1b18] sm:$0xff] }
 0x3bd   :  { %v4243_v13 = vld [vmem:[#allocation2 + $0x1b38] sm:$0xff]  ;;  %v8650_v19 = vcombine.high %v4238_v38, %v4242_v10  ;;  %v8649_v22 = vcombine.low %v4238_v38, %v4242_v10 }
 0x3be   :  { %v8652_v58 = vcombine.high %v4239_v12, %v4243_v13  ;;  %v8651_v24 = vcombine.low %v4239_v12, %v4243_v13 }
 0x3bf   :  { %7478 = vmatpush1.bf16.msra.mxu0 %v8593_v48  ;;  %7642 = vmatpush1.bf16.msra.mxu1 %v8595_v40  ;;  %v4246_v48 = vld [vmem:[#allocation2 + $0x1b50] sm:$0xff] }
 0x3c0   :  { %7479 = vmatprep.subr.bf16.mxu0 %v8602_v20  ;;  %7643 = vmatprep.subr.bf16.mxu1 %v8604_v21  ;;  %v4250_v40 = vld [vmem:[#allocation2 + $0x1b70] sm:$0xff]  ;;  %v4247_v20 = vld [vmem:[#allocation2 + $0x1b58] sm:$0xff] }
 0x3c1   :  { %v4251_v21 = vld [vmem:[#allocation2 + $0x1b78] sm:$0xff]  ;;  %v8658_v25 = vcombine.high %v4246_v48, %v4250_v40  ;;  %v8657_v34 = vcombine.low %v4246_v48, %v4250_v40 }
 0x3c2   :  { %v8660_v27 = vcombine.high %v4247_v20, %v4251_v21  ;;  %v8659_v36 = vcombine.low %v4247_v20, %v4251_v21  ;;  %v4302_v21 = vld [vmem:[#allocation2 + $0x1d10] sm:$0xff] }
 0x3c3   :  { %7480 = vmatpush1.bf16.msra.mxu0 %v8601_v28  ;;  %7644 = vmatpush1.bf16.msra.mxu1 %v8603_v30  ;;  %v4254_v28 = vld [vmem:[#allocation2 + $0x1b90] sm:$0xff] }
 0x3c4   :  { %7481 = vmatprep.subr.bf16.mxu0 %v8610_v59  ;;  %7645 = vmatprep.subr.bf16.mxu1 %v8612_v52  ;;  %v4258_v30 = vld [vmem:[#allocation2 + $0x1bb0] sm:$0xff]  ;;  %v4255_v59 = vld [vmem:[#allocation2 + $0x1b98] sm:$0xff] }
 0x3c5   :  { %v4259_v52 = vld [vmem:[#allocation2 + $0x1bb8] sm:$0xff]  ;;  %v8666_v37 = vcombine.high %v4254_v28, %v4258_v30  ;;  %v8665_v60 = vcombine.low %v4254_v28, %v4258_v30  ;;  %v9213_v30 = vld [vmem:[#allocation4] sm:$0xff] }
 0x3c6   :  { %v8668_v39 = vcombine.high %v4255_v59, %v4259_v52  ;;  %v8667_v45 = vcombine.low %v4255_v59, %v4259_v52  ;;  %v4307_v28 = vld [vmem:[#allocation2 + $0x1d38] sm:$0xff] }
 0x3c7   :  { %7482 = vmatpush1.bf16.msra.mxu0 %v8609_v16  ;;  %7646 = vmatpush1.bf16.msra.mxu1 %v8611_v41  ;;  %v4262_v16 = vld [vmem:[#allocation2 + $0x1bd0] sm:$0xff] }
 0x3c8   :  { %7483 = vmatprep.subr.bf16.mxu0 %v8618_v42  ;;  %7647 = vmatprep.subr.bf16.mxu1 %v8620_v53  ;;  %v4266_v41 = vld [vmem:[#allocation2 + $0x1bf0] sm:$0xff]  ;;  %v4263_v42 = vld [vmem:[#allocation2 + $0x1bd8] sm:$0xff] }
 0x3c9   :  { %v4267_v53 = vld [vmem:[#allocation2 + $0x1bf8] sm:$0xff]  ;;  %v8674_v47 = vcombine.high %v4262_v16, %v4266_v41  ;;  %v8673_v57 = vcombine.low %v4262_v16, %v4266_v41 }
 0x3ca   :  { %v8676_v49 = vcombine.high %v4263_v42, %v4267_v53  ;;  %v8675_v6 = vcombine.low %v4263_v42, %v4267_v53  ;;  %v574_v42 = vsub.s32 3, %v9032_v43  ;;  %v4311_v53 = vld [vmem:[#allocation2 + $0x1d58] sm:$0xff] }
 0x3cb   :  { %7484 = vmatpush1.bf16.msra.mxu0 %v8617_v9  ;;  %7648 = vmatpush1.bf16.msra.mxu1 %v8619_v11  ;;  %v4270_v9 = vld [vmem:[#allocation2 + $0x1c10] sm:$0xff] }
 0x3cc   :  { %7485 = vmatprep.subr.bf16.mxu0 %v8626_v54  ;;  %7649 = vmatprep.subr.bf16.mxu1 %v8628_v56  ;;  %v4274_v11 = vld [vmem:[#allocation2 + $0x1c30] sm:$0xff]  ;;  %v4271_v54 = vld [vmem:[#allocation2 + $0x1c18] sm:$0xff] }
 0x3cd   :  { %v4275_v56 = vld [vmem:[#allocation2 + $0x1c38] sm:$0xff]  ;;  %v8682_v5 = vcombine.high %v4270_v9, %v4274_v11  ;;  %v8681_v1 = vcombine.low %v4270_v9, %v4274_v11 }
 0x3ce   :  { %v8684_v23 = vcombine.high %v4271_v54, %v4275_v56  ;;  %v8683_v2 = vcombine.low %v4271_v54, %v4275_v56  ;;  %v9222_v56 = vld [vmem:[#allocation2 + $0x1d90] sm:$0xff] }
 0x3cf   :  { %7486 = vmatpush1.bf16.msra.mxu0 %v8625_v61  ;;  %7650 = vmatpush1.bf16.msra.mxu1 %v8627_v62  ;;  %v4278_v61 = vld [vmem:[#allocation2 + $0x1c50] sm:$0xff] }
 0x3d0   :  { %7487 = vmatprep.subr.bf16.mxu0 %v8634_v0  ;;  %7651 = vmatprep.subr.bf16.mxu1 %v8636_v29  ;;  %v4282_v62 = vld [vmem:[#allocation2 + $0x1c70] sm:$0xff]  ;;  %v4279_v0 = vld [vmem:[#allocation2 + $0x1c58] sm:$0xff] }
 0x3d1   :  { %v4283_v29 = vld [vmem:[#allocation2 + $0x1c78] sm:$0xff]  ;;  %v8690_v3 = vcombine.high %v4278_v61, %v4282_v62  ;;  %v8689_v38 = vcombine.low %v4278_v61, %v4282_v62 }
 0x3d2   :  { %v8692_v17 = vcombine.high %v4279_v0, %v4283_v29  ;;  %v8691_v10 = vcombine.low %v4279_v0, %v4283_v29  ;;  %v4319_v62 = vld [vmem:[#allocation2 + $0x1d98] sm:$0xff] }
 0x3d3   :  { %7488 = vmatpush1.bf16.msra.mxu0 %v8633_v4  ;;  %7652 = vmatpush1.bf16.msra.mxu1 %v8635_v32  ;;  %v4286_v4 = vld [vmem:[#allocation2 + $0x1c90] sm:$0xff]  ;;  %v4323_v0 = vld [vmem:[#allocation2 + $0x1db8] sm:$0xff] }
 0x3d4   :  { %7489 = vmatprep.subr.bf16.mxu0 %v8642_v7  ;;  %7653 = vmatprep.subr.bf16.mxu1 %v8644_v8  ;;  %v4290_v32 = vld [vmem:[#allocation2 + $0x1cb0] sm:$0xff]  ;;  %v4287_v7 = vld [vmem:[#allocation2 + $0x1c98] sm:$0xff] }
 0x3d5   :  { %v4291_v8 = vld [vmem:[#allocation2 + $0x1cb8] sm:$0xff]  ;;  %v8698_v12 = vcombine.high %v4286_v4, %v4290_v32  ;;  %v8697_v48 = vcombine.low %v4286_v4, %v4290_v32 }
 0x3d6   :  { %v8700_v13 = vcombine.high %v4287_v7, %v4291_v8 }
 0x3d7   :  { %7490 = vmatpush1.bf16.msra.mxu0 %v8641_v14  ;;  %7654 = vmatpush1.bf16.msra.mxu1 %v8643_v15  ;;  %v4294_v14 = vld [vmem:[#allocation2 + $0x1cd0] sm:$0xff] }
 0x3d8   :  { %7491 = vmatprep.subr.bf16.mxu0 %v8650_v19  ;;  %7655 = vmatprep.subr.bf16.mxu1 %v8652_v58  ;;  %v4298_v15 = vld [vmem:[#allocation2 + $0x1cf0] sm:$0xff]  ;;  %v4295_v19 = vld [vmem:[#allocation2 + $0x1cd8] sm:$0xff] }
 0x3d9   :  { %v4299_v58 = vld [vmem:[#allocation2 + $0x1cf8] sm:$0xff]  ;;  %v8706_v40 = vcombine.high %v4294_v14, %v4298_v15 }
 0x3da   :  { %v8708_v20 = vcombine.high %v4295_v19, %v4299_v58  ;;  %v8707_v59 = vcombine.low %v4295_v19, %v4299_v58 }
 0x3db   :  { %7492 = vmatpush1.bf16.msra.mxu0 %v8649_v22  ;;  %7656 = vmatpush1.bf16.msra.mxu1 %v8651_v24  ;;  %v4306_v22 = vld [vmem:[#allocation2 + $0x1d30] sm:$0xff]  ;;  %v562_v24 = vsub.s32 0, %v9032_v43 }
 0x3dc   :  { %7493 = vmatprep.subr.bf16.mxu0 %v8658_v25  ;;  %7657 = vmatprep.subr.bf16.mxu1 %v8660_v27  ;;  %v570_v25 = vsub.s32 2, %v9032_v43  ;;  %v4303_v27 = vld [vmem:[#allocation2 + $0x1d18] sm:$0xff]  ;;  %v8714_v52 = vcombine.high %v4302_v21, %v4306_v22 }
 0x3dd   :  { %v563_v16 = vrot.slane %v9213_v30, %v562_v24 }
 0x3de   :  { %v571_v41 = vrot.slane %v9213_v30, %v570_v25 }
 0x3df   :  { %7494 = vmatpush1.bf16.msra.mxu0 %v8657_v34  ;;  %7658 = vmatpush1.bf16.msra.mxu1 %v8659_v36  ;;  %v566_v34 = vsub.s32 1, %v9032_v43  ;;  %v8716_v36 = vcombine.high %v4303_v27, %v4307_v28 }
 0x3e0   :  { %7495 = vmatprep.subr.bf16.mxu0 %v8666_v37  ;;  %7659 = vmatprep.subr.bf16.mxu1 %v8668_v39  ;;  %v4310_v37 = vld [vmem:[#allocation2 + $0x1d50] sm:$0xff] }
 0x3e1   :  { %v4314_v39 = vld [vmem:[#allocation2 + $0x1d70] sm:$0xff]  ;;  %v567_v11 = vrot.slane %v9213_v30, %v566_v34 }
 0x3e2   :  { %v8722_v9 = vcombine.high %v4310_v37, %v4314_v39 }
 0x3e3   :  { %7496 = vmatpush1.bf16.msra.mxu0 %v8665_v60  ;;  %7660 = vmatpush1.bf16.msra.mxu1 %v8667_v45  ;;  %v4315_v60 = vld [vmem:[#allocation2 + $0x1d78] sm:$0xff]  ;;  %v8713_v45 = vcombine.low %v4302_v21, %v4306_v22  ;;  %v8806_v32 = vadd.f32 %v9119_v51, %v567_v11 }
 0x3e4   :  { %7497 = vmatprep.subr.bf16.mxu0 %v8674_v47  ;;  %7661 = vmatprep.subr.bf16.mxu1 %v8676_v49  ;;  %v9219_v47 = vld [vmem:[#allocation4 + $0x8] sm:$0xff]  ;;  %v8715_v49 = vcombine.low %v4303_v27, %v4307_v28  ;;  %v8724_v54 = vcombine.high %v4311_v53, %v4315_v60 }
 0x3e5   :  { %v4402_v61 = vrot.slane %v9219_v47, %v562_v24  ;;  %v4410_v29 = vrot.slane %v9219_v47, %v570_v25  ;;  %v4414_v4 = vrot.slane %v9219_v47, %v574_v42 }
 0x3e7   :  { %7498 = vmatpush1.bf16.msra.mxu0 %v8673_v57  ;;  %7662 = vmatpush1.bf16.msra.mxu1 %v8675_v6  ;;  %v9224_v57 = vld [vmem:[#allocation2 + $0x1db0] sm:$0xff]  ;;  %v8805_v6 = vadd.f32 %v9115_v46, %v563_v16  ;;  %v8723_v46 = vcombine.low %v4311_v53, %v4315_v60 }
 0x3e8   :  { %7508 = vmatprep.subr.bf16.mxu0 %v8682_v5  ;;  %7672 = vmatprep.subr.bf16.mxu1 %v8684_v23  ;;  %v8807_v5 = vadd.f32 %v9117_v50, %v571_v41  ;;  %v575_v23 = vrot.slane %v9213_v30, %v574_v42  ;;  %v8730_v50 = vcombine.high %v9222_v56, %v9224_v57  ;;  %v4334_v16 = vld [vmem:[#allocation2 + $0x1e10] sm:$0xff] }
 0x3e9   :  { %v8729_v51 = vcombine.low %v9222_v56, %v9224_v57  ;;  %v4338_v41 = vld [vmem:[#allocation2 + $0x1e30] sm:$0xff] }
 0x3ea   :  { %7500 = vmatmul.mubr.bf16.vlgmr.msra.gmra.mrb[12].mxu0 %v9173_v33  ;;  %7664 = vmatmul.mubr.bf16.vlgmr.msra.gmra.mrb[12].mxu1 %v9173_v33  ;;  %v8699_v33 = vcombine.low %v4287_v7, %v4291_v8  ;;  %v8732_v8 = vcombine.high %v4319_v62, %v4323_v0 }
 0x3eb   :  { %7509 = vmatpush1.bf16.msra.mxu0 %v8681_v1  ;;  %7673 = vmatpush1.bf16.msra.mxu1 %v8683_v2  ;;  %v4406_v1 = vrot.slane %v9219_v47, %v566_v34  ;;  %v8982_v2 = vmov 1983009808  }
 0x3ec   :  { %7510 = vmatprep.subr.bf16.mxu0 %v8690_v3  ;;  %7674 = vmatprep.subr.bf16.mxu1 %v8692_v17  ;;  %v7740_v3 = vunpack.c.l.s4 %v8982_v2  ;;  %v8721_v17 = vcombine.low %v4310_v37, %v4314_v39  ;;  %v4347_v2 = vld [vmem:[#allocation2 + $0x1e78] sm:$0xff] }
 0x3ed   :  { %7540 = vmatprep.mubr.bf16.mxu0 %v9177_v44  ;;  %7704 = vmatprep.mubr.bf16.mxu1 %v9177_v44  ;;  %v8705_v44 = vcombine.low %v4294_v14, %v4298_v15  ;;  %v8808_v14 = vadd.f32 %v9121_v55, %v575_v23  ;;  %v8731_v55 = vcombine.low %v4319_v62, %v4323_v0  ;;  %v4342_v62 = vld [vmem:[#allocation2 + $0x1e50] sm:$0xff] }
 0x3ee   :  { %v7741_v21 = vunpack.c.0.s8 %v7740_v3  ;;  %v4346_v0 = vld [vmem:[#allocation2 + $0x1e70] sm:$0xff] }
 0x3ef   :  { %7511 = vmatpush1.bf16.msra.mxu0 %v8689_v38  ;;  %7675 = vmatpush1.bf16.msra.mxu1 %v8691_v10  ;;  %v4326_v38 = vld [vmem:[#allocation2 + $0x1dd0] sm:$0xff]  ;;  %v3877_v42 = vmax.f32 %v8808_v14, 0.0 }
 0x3f0   :  { %7512 = vmatprep.subr.bf16.mxu0 %v8698_v12  ;;  %7676 = vmatprep.subr.bf16.mxu1 %v8700_v13  ;;  %v4330_v10 = vld [vmem:[#allocation2 + $0x1df0] sm:$0xff]  ;;  %v3874_v12 = vmax.f32 %v8805_v6, 0.0  ;;  %v3876_v13 = vmax.f32 %v8807_v5, 0.0  ;;  %v8746_v5 = vcombine.high %v4334_v16, %v4338_v41 }
 0x3f1   :  { %v8737_v56 = vcombine.low %v4326_v38, %v4330_v10 }
 0x3f3   :  { %7513 = vmatpush1.bf16.msra.mxu0 %v8697_v48  ;;  %7677 = vmatpush1.bf16.msra.mxu1 %v8699_v33  ;;  %v4327_v48 = vld [vmem:[#allocation2 + $0x1dd8] sm:$0xff] }
 0x3f4   :  { %7514 = vmatprep.subr.bf16.mxu0 %v8706_v40  ;;  %7678 = vmatprep.subr.bf16.mxu1 %v8708_v20  ;;  %v4331_v33 = vld [vmem:[#allocation2 + $0x1df8] sm:$0xff] }
 0x3f5   :  { %v8740_v39 = vcombine.high %v4327_v48, %v4331_v33  ;;  %v8739_v6 = vcombine.low %v4327_v48, %v4331_v33  ;;  %v4362_v48 = vld [vmem:[#allocation2 + $0x1ef0] sm:$0xff]  ;;  %v4359_v33 = vld [vmem:[#allocation2 + $0x1ed8] sm:$0xff] }
 0x3f7   :  { %7515 = vmatpush1.bf16.msra.mxu0 %v8705_v44  ;;  %7679 = vmatpush1.bf16.msra.mxu1 %v8707_v59  ;;  %v8738_v59 = vcombine.high %v4326_v38, %v4330_v10  ;;  %v4351_v10 = vld [vmem:[#allocation2 + $0x1e98] sm:$0xff] }
 0x3f8   :  { %7516 = vmatprep.subr.bf16.mxu0 %v8714_v52  ;;  %7680 = vmatprep.subr.bf16.mxu1 %v8716_v36  ;;  %v3875_v52 = vmax.f32 %v8806_v32, 0.0 }
 0x3fb   :  { %7517 = vmatpush1.bf16.msra.mxu0 %v8713_v45  ;;  %7681 = vmatpush1.bf16.msra.mxu1 %v8715_v49  ;;  %v4335_v45 = vld [vmem:[#allocation2 + $0x1e18] sm:$0xff] }
 0x3fc   :  { %7518 = vmatprep.subr.bf16.mxu0 %v8722_v9  ;;  %7682 = vmatprep.subr.bf16.mxu1 %v8724_v54  ;;  %v4339_v49 = vld [vmem:[#allocation2 + $0x1e38] sm:$0xff]  ;;  %v9240_v54 = vsub.s32 %v7741_v21, %v9032_v43 }
 0x3fd   :  { %v7214_v7 = vpop.f32.mrb[8].mxu0  ;;  %v7378_v19 = vpop.f32.mrb[8].mxu1 }
 0x3fe   :  { %v8813_v15 = vadd.f32 %v7214_v7, %v4402_v61  ;;  %v7216_v58 = vpop.f32.mrb[9].mxu0  ;;  %v8815_v40 = vadd.f32 %v7378_v19, %v4410_v29  ;;  %v7380_v22 = vpop.f32.mrb[9].mxu1  ;;  %v8748_v61 = vcombine.high %v4335_v45, %v4339_v49  ;;  %v4350_v7 = vld [vmem:[#allocation2 + $0x1e90] sm:$0xff] }
 0x3ff   :  { %v8814_v20 = vadd.f32 %v7216_v58, %v4406_v1  ;;  %v7218_v24 = vpop.f32.mrb[10].mxu0  ;;  %7519 = vmatpush1.bf16.msra.mxu0 %v8721_v17  ;;  %v8816_v27 = vadd.f32 %v7380_v22, %v4414_v4  ;;  %v7382_v28 = vpop.f32.mrb[10].mxu1  ;;  %7683 = vmatpush1.bf16.msra.mxu1 %v8723_v46  ;;  %v4343_v1 = vld [vmem:[#allocation2 + $0x1e58] sm:$0xff]  ;;  %v8745_v17 = vcombine.low %v4334_v16, %v4338_v41  ;;  %v4358_v58 = vld [vmem:[#allocation2 + $0x1ed0] sm:$0xff] }
 0x400   :  { %v7713_v25 = vmax.f32 %v8813_v15, 0.0  ;;  %v7219_v44 = vpop.f32.mrb[11].mxu0  ;;  %7520 = vmatprep.subr.bf16.mxu0 %v8730_v50  ;;  %v7715_v34 = vmax.f32 %v8815_v40, 0.0  ;;  %v7383_v37 = vpop.f32.mrb[11].mxu1  ;;  %7684 = vmatprep.subr.bf16.mxu1 %v8732_v8  ;;  %v8747_v46 = vcombine.low %v4335_v45, %v4339_v49  ;;  %v8754_v50 = vcombine.high %v4342_v62, %v4346_v0  ;;  %v4354_v8 = vld [vmem:[#allocation2 + $0x1eb0] sm:$0xff]  ;;  %v4363_v40 = vld [vmem:[#allocation2 + $0x1ef8] sm:$0xff] }
 0x401   :  { %v7714_v36 = vmax.f32 %v8814_v20, 0.0  ;;  %v7716_v60 = vmax.f32 %v8816_v27, 0.0  ;;  %v8756_v32 = vcombine.high %v4343_v1, %v4347_v2  ;;  %v8755_v14 = vcombine.low %v4343_v1, %v4347_v2  ;;  %v4367_v27 = vld [vmem:[#allocation2 + $0x1f18] sm:$0xff]  ;;  %v4386_v45 = vld [vmem:[#allocation2 + $0x1fb0] sm:$0xff] }
 0x402   :  { %v7721_v53 = vmul.f32 %v7713_v25, %v3874_v12  ;;  %v7723_v9 = vmul.f32 %v7715_v34, %v3876_v13  ;;  %v4355_v12 = vld [vmem:[#allocation2 + $0x1eb8] sm:$0xff]  ;;  %v8753_v13 = vcombine.low %v4342_v62, %v4346_v0  ;;  %v8762_v15 = vcombine.high %v4350_v7, %v4354_v8  ;;  %v4370_v25 = vld [vmem:[#allocation2 + $0x1f30] sm:$0xff] }
 0x403   :  { %v7722_v11 = vmul.f32 %v7714_v36, %v3875_v52  ;;  %7521 = vmatpush1.bf16.msra.mxu0 %v8729_v51  ;;  %v7724_v57 = vmul.f32 %v7716_v60, %v3877_v42  ;;  %7685 = vmatpush1.bf16.msra.mxu1 %v8731_v55  ;;  %v8764_v19 = vcombine.high %v4351_v10, %v4355_v12  ;;  %v4366_v51 = vld [vmem:[#allocation2 + $0x1f10] sm:$0xff]  ;;  %v4371_v28 = vld [vmem:[#allocation2 + $0x1f38] sm:$0xff] }
 0x404   :  { %7522 = vmatprep.subr.bf16.mxu0 %v8738_v59  ;;  %7686 = vmatprep.subr.bf16.mxu1 %v8740_v39  ;;  %v8761_v20 = vcombine.low %v4350_v7, %v4354_v8  ;;  %v8763_v21 = vcombine.low %v4351_v10, %v4355_v12  ;;  %v8770_v22 = vcombine.high %v4358_v58, %v4362_v48  ;;  %v4374_v34 = vld [vmem:[#allocation2 + $0x1f50] sm:$0xff]  ;;  %v4375_v37 = vld [vmem:[#allocation2 + $0x1f58] sm:$0xff] }
 0x405   :  { %v7737_v23 = vcombine.low %v7721_v53, %v7722_v11  ;;  %v7738_v29 = vcombine.low %v7723_v9, %v7724_v57  ;;  %v8772_v24 = vcombine.high %v4359_v33, %v4363_v40  ;;  %v8769_v44 = vcombine.low %v4358_v58, %v4362_v48  ;;  %v4378_v36 = vld [vmem:[#allocation2 + $0x1f70] sm:$0xff]  ;;  %v4379_v39 = vld [vmem:[#allocation2 + $0x1f78] sm:$0xff] }
 0x406   :  { %v8771_v55 = vcombine.low %v4359_v33, %v4363_v40  ;;  %v8778_v59 = vcombine.high %v4366_v51, %v4370_v25  ;;  %v8780_v52 = vcombine.high %v4367_v27, %v4371_v28  ;;  %v8777_v16 = vcombine.low %v4366_v51, %v4370_v25  ;;  %v4382_v60 = vld [vmem:[#allocation2 + $0x1f90] sm:$0xff]  ;;  %v4383_v49 = vld [vmem:[#allocation2 + $0x1f98] sm:$0xff] }
 0x407   :  { %v7745_v3 = vrot.slane %v7737_v23, %v9240_v54  ;;  %7523 = vmatpush1.bf16.msra.mxu0 %v8737_v56  ;;  %v7752_v4 = vrot.slane %v7738_v29, %v9240_v54  ;;  %7687 = vmatpush1.bf16.msra.mxu1 %v8739_v6  ;;  %v8779_v41 = vcombine.low %v4367_v27, %v4371_v28  ;;  %v4387_v9 = vld [vmem:[#allocation2 + $0x1fb8] sm:$0xff]  ;;  %v4394_v23 = vld [vmem:[#allocation2 + $0x1ff0] sm:$0xff] }
 0x408   :  { %7524 = vmatprep.subr.bf16.mxu0 %v8746_v5  ;;  %7688 = vmatprep.subr.bf16.mxu1 %v8748_v61  ;;  %v8786_v42 = vcombine.high %v4374_v34, %v4378_v36  ;;  %v8788_v53 = vcombine.high %v4375_v37, %v4379_v39  ;;  %v8785_v11 = vcombine.low %v4374_v34, %v4378_v36  ;;  %v4390_v5 = vld [vmem:[#allocation2 + $0x1fd0] sm:$0xff]  ;;  %v4391_v61 = vld [vmem:[#allocation2 + $0x1fd8] sm:$0xff] }
 0x409   :  { %v7753_v38 = vcombine.low %v7745_v3, %v7752_v4  ;;  %v8787_v56 = vcombine.low %v4375_v37, %v4379_v39  ;;  %v8794_v57 = vcombine.high %v4382_v60, %v4386_v45  ;;  %v8796_v6 = vcombine.high %v4383_v49, %v4387_v9  ;;  %v4395_v62 = vld [vmem:[#allocation2 + $0x1ff8] sm:$0xff] }
 0x40a   :  { %v8793_v0 = vcombine.low %v4382_v60, %v4386_v45  ;;  %v8795_v29 = vcombine.low %v4383_v49, %v4387_v9  ;;  %v8802_v1 = vcombine.high %v4390_v5, %v4394_v23  ;;  %v8804_v2 = vcombine.high %v4391_v61, %v4395_v62 }
 0x40b   :  { %7525 = vmatpush1.bf16.msra.mxu0 %v8745_v17  ;;  %7773 = vst [vmem:[%s9274_s4] sm:$0xff] %v7753_v38  ;;  %7689 = vmatpush1.bf16.msra.mxu1 %v8747_v46  ;;  %v8801_v3 = vcombine.low %v4390_v5, %v4394_v23  ;;  %v8803_v17 = vcombine.low %v4391_v61, %v4395_v62  ;;  %v578_v4 = vsub.s32 4, %v9032_v43  ;;  %v586_v46 = vsub.s32 6, %v9032_v43 }
 0x40c   :  { %7526 = vmatprep.subr.bf16.mxu0 %v8754_v50  ;;  %7690 = vmatprep.subr.bf16.mxu1 %v8756_v32  ;;  %v582_v50 = vsub.s32 5, %v9032_v43  ;;  %v590_v32 = vsub.s32 7, %v9032_v43 }
 0x40d   :  { %v579_v7 = vrot.slane %v9213_v30, %v578_v4  ;;  %v587_v8 = vrot.slane %v9213_v30, %v586_v46  ;;  %v4418_v12 = vrot.slane %v9219_v47, %v578_v4 }
 0x40e   :  { %v583_v38 = vrot.slane %v9213_v30, %v582_v50  ;;  %v591_v10 = vrot.slane %v9213_v30, %v590_v32 }
 0x40f   :  { %7527 = vmatpush1.bf16.msra.mxu0 %v8753_v13  ;;  %7691 = vmatpush1.bf16.msra.mxu1 %v8755_v14  ;;  %v4422_v13 = vrot.slane %v9219_v47, %v582_v50  ;;  %v8809_v14 = vadd.f32 %v9183_v26, %v579_v7  ;;  %v8811_v43 = vadd.f32 %v9185_v31, %v587_v8 }
 0x410   :  { %7528 = vmatprep.subr.bf16.mxu0 %v8762_v15  ;;  %7692 = vmatprep.subr.bf16.mxu1 %v8764_v19  ;;  %v4430_v15 = vrot.slane %v9219_v47, %v590_v32  ;;  %v8810_v19 = vadd.f32 %v9187_v63, %v583_v38  ;;  %v8812_v48 = vadd.f32 %v9189_v35, %v591_v10 }
 0x411   :  { %v3878_v51 = vmax.f32 %v8809_v14, 0.0 }
 0x413   :  { %7529 = vmatpush1.bf16.msra.mxu0 %v8761_v20  ;;  %7693 = vmatpush1.bf16.msra.mxu1 %v8763_v21 }
 0x414   :  { %7530 = vmatprep.subr.bf16.mxu0 %v8770_v22  ;;  %7694 = vmatprep.subr.bf16.mxu1 %v8772_v24 }
 0x417   :  { %7531 = vmatpush1.bf16.msra.mxu0 %v8769_v44  ;;  %7695 = vmatpush1.bf16.msra.mxu1 %v8771_v55  ;;  %v3879_v44 = vmax.f32 %v8810_v19, 0.0 }
 0x418   :  { %7532 = vmatprep.subr.bf16.mxu0 %v8778_v59  ;;  %7696 = vmatprep.subr.bf16.mxu1 %v8780_v52  ;;  %v3881_v59 = vmax.f32 %v8812_v48, 0.0 }
 0x41b   :  { %7533 = vmatpush1.bf16.msra.mxu0 %v8777_v16  ;;  %7697 = vmatpush1.bf16.msra.mxu1 %v8779_v41 }
 0x41c   :  { %7534 = vmatprep.subr.bf16.mxu0 %v8786_v42  ;;  %7698 = vmatprep.subr.bf16.mxu1 %v8788_v53 }
 0x41f   :  { %7535 = vmatpush1.bf16.msra.mxu0 %v8785_v11  ;;  %7699 = vmatpush1.bf16.msra.mxu1 %v8787_v56 }
 0x420   :  { %7536 = vmatprep.subr.bf16.mxu0 %v8794_v57  ;;  %7700 = vmatprep.subr.bf16.mxu1 %v8796_v6 }
 0x423   :  { %7537 = vmatpush1.bf16.msra.mxu0 %v8793_v0  ;;  %7701 = vmatpush1.bf16.msra.mxu1 %v8795_v29 }
 0x424   :  { %7538 = vmatprep.subr.bf16.mxu0 %v8802_v1  ;;  %7702 = vmatprep.subr.bf16.mxu1 %v8804_v2 }
 0x427   :  { %7539 = vmatpush1.bf16.msra.mxu0 %v8801_v3  ;;  %7703 = vmatpush1.bf16.msra.mxu1 %v8803_v17 }
 0x42a   :  { %7541 = vmatmul.mubr.bf16.vlgmr.msra.gmra.mrb[12].mxu0 %v9193_v18  ;;  %7705 = vmatmul.mubr.bf16.vlgmr.msra.gmra.mrb[12].mxu1 %v9193_v18  ;;  %v4426_v18 = vrot.slane %v9219_v47, %v586_v46  ;;  %v3880_v47 = vmax.f32 %v8811_v43, 0.0 }
 0x4fd   :  { %v7542_v58 = vpop.f32.mrb[12].mxu0  ;;  %v7706_v40 = vpop.f32.mrb[12].mxu1 }
 0x4fe   :  { %v8817_v33 = vadd.f32 %v7542_v58, %v4418_v12  ;;  %v7544_v30 = vpop.f32.mrb[13].mxu0  ;;  %v8819_v20 = vadd.f32 %v7706_v40, %v4426_v18  ;;  %v7708_v22 = vpop.f32.mrb[13].mxu1 }
 0x4ff   :  { %v8818_v21 = vadd.f32 %v7544_v30, %v4422_v13  ;;  %v7546_v24 = vpop.f32.mrb[14].mxu0  ;;  %v8820_v27 = vadd.f32 %v7708_v22, %v4430_v15  ;;  %v7710_v26 = vpop.f32.mrb[14].mxu1 }
 0x500   :  { %v7717_v25 = vmax.f32 %v8817_v33, 0.0  ;;  %v7547_v28 = vpop.f32.mrb[15].mxu0  ;;  %v7719_v31 = vmax.f32 %v8819_v20, 0.0  ;;  %v7711_v63 = vpop.f32.mrb[15].mxu1 }
 0x501   :  { %v7718_v55 = vmax.f32 %v8818_v21, 0.0  ;;  %v7720_v35 = vmax.f32 %v8820_v27, 0.0 }
 0x502   :  { %v7725_v52 = vmul.f32 %v7717_v25, %v3878_v51  ;;  %v7727_v34 = vmul.f32 %v7719_v31, %v3880_v47 }
 0x503   :  { %v7726_v36 = vmul.f32 %v7718_v55, %v3879_v44  ;;  %v7728_v37 = vmul.f32 %v7720_v35, %v3881_v59 }
 0x505   :  { %v7754_v39 = vcombine.low %v7725_v52, %v7726_v36  ;;  %v7755_v16 = vcombine.low %v7727_v34, %v7728_v37 }
 0x507   :  { %v7762_v41 = vrot.slane %v7754_v39, %v9240_v54  ;;  %v7769_v42 = vrot.slane %v7755_v16, %v9240_v54 }
 0x509   :  { %v7770_v53 = vcombine.low %v7762_v41, %v7769_v42 }
 0x50b   :  { %7774 = vst [vmem:[%s9274_s4 + $0x8] sm:$0xff] %v7770_v53 }
 0x50c   :  { %7779 = vsyncpa [#allocation3], 1 }
 0x50d   :  { %7780 = vsyncpa [#allocation5], 1 }

</bundles_post_ra>
